<compile_context>
chip_gen: v7x
topology: tpu7x:2x2x1
jax: 0.10.0
libtpu: 0.0.40
codegen_flags: <defaults>
</compile_context>

<pallas_src>
import jax
import jax.numpy as jnp
from jax.experimental import pallas as pl
from jax.experimental.pallas import tpu as pltpu

DIMS = [1470, 1024, 512, 256, 128, 64, 1]
F_IN_PAD = 1536          # 1470 rounded up to a multiple of 128
TK = 512                 # K tile for the layer-1 matmul  (grid = 1536 // 512 = 3)
N_LAYERS = 6
BN_EPS = 1e-5
B_TOT = 2176             # packed bias slab width: 1024+512+256+128+128+128


def _fused_mlp_kernel(x_ref, w1_ref, w2_ref, w3_ref, wt_ref, b_ref, o_ref, acc_ref):
    """K-tiled layer-1 accumulation; layers 2..6 + store on the last K step."""
    k = pl.program_id(0)

    @pl.when(k == 0)
    def _init():
        acc_ref[...] = jnp.zeros_like(acc_ref)

    # Layer-1 partial product for this K tile (bf16 x bf16 -> f32 accumulate).
    # Overlaps with the DMA of the next w1 / x tile via the grid pipeline.
    acc_ref[...] += jnp.dot(
        x_ref[...].astype(jnp.bfloat16), w1_ref[...],
        preferred_element_type=jnp.float32)

    @pl.when(k == pl.num_programs(0) - 1)
    def _epilogue():
        # Layer 1 epilogue (BN of each layer is pre-folded into the next layer).
        h = jnp.maximum(acc_ref[...] + b_ref[:, 0:1024], 0.0)
        # Layer 2
        h = jnp.maximum(
            jnp.dot(h.astype(jnp.bfloat16), w2_ref[...],
                    preferred_element_type=jnp.float32) + b_ref[:, 1024:1536], 0.0)
        # Layer 3
        h = jnp.maximum(
            jnp.dot(h.astype(jnp.bfloat16), w3_ref[...],
                    preferred_element_type=jnp.float32) + b_ref[:, 1536:1792], 0.0)
        # Layer 4  (tail slab rows [0, 256))
        h = jnp.maximum(
            jnp.dot(h.astype(jnp.bfloat16), wt_ref[0:256, :],
                    preferred_element_type=jnp.float32) + b_ref[:, 1792:1920], 0.0)
        # Layer 5  (tail slab rows [256, 384); outputs zero-padded 64 -> 128)
        h = jnp.maximum(
            jnp.dot(h.astype(jnp.bfloat16), wt_ref[256:384, :],
                    preferred_element_type=jnp.float32) + b_ref[:, 1920:2048], 0.0)
        # Layer 6  (tail slab rows [384, 512); outputs zero-padded 1 -> 128)
        h = jnp.maximum(
            jnp.dot(h.astype(jnp.bfloat16), wt_ref[384:512, :],
                    preferred_element_type=jnp.float32) + b_ref[:, 2048:2176], 0.0)
        o_ref[...] = h[:, 0:1].astype(o_ref.dtype)


def cnn_forward_fused(x, packed):
    """x: [B, 1470] f32.  packed = (w1, w2, w3, w_tail, b_all) from prepare_params."""
    w1, w2, w3, wt, b_all = packed
    b_in = x.shape[0]
    b_pad = max(8, -(-b_in // 8) * 8)               # rows -> multiple of 8 (sublane)
    x = jnp.pad(x.astype(jnp.float32),
                ((0, b_pad - b_in), (0, F_IN_PAD - x.shape[1])))

    out = pl.pallas_call(
        _fused_mlp_kernel,
        out_shape=jax.ShapeDtypeStruct((b_pad, 1), jnp.float32),
        grid=(F_IN_PAD // TK,),
        in_specs=[
            pl.BlockSpec((b_pad, TK), lambda k: (0, k)),        # x: K-tiled
            pl.BlockSpec((TK, DIMS[1]), lambda k: (k, 0)),      # w1: K-tiled (dominant DMA)
            pl.BlockSpec(w2.shape, lambda k: (0, 0)),           # constant index -> fetched once
            pl.BlockSpec(w3.shape, lambda k: (0, 0)),
            pl.BlockSpec(wt.shape, lambda k: (0, 0)),           # packed w4/w5/w6 slab
            pl.BlockSpec(b_all.shape, lambda k: (0, 0)),        # packed bias slab
        ],
        out_specs=pl.BlockSpec((b_pad, 1), lambda k: (0, 0)),
        scratch_shapes=[pltpu.VMEM((b_pad, DIMS[1]), jnp.float32)],   # layer-1 f32 acc
        compiler_params=pltpu.CompilerParams(
            dimension_semantics=("arbitrary",),
            vmem_limit_bytes=32 << 20,   # safe on v5e/v6e/v7x; bf16 weights fit easily
        ),
    )(x, w1, w2, w3, wt, b_all)
    return out[:b_in]


cnn_forward = jax.jit(cnn_forward_fused)


def init_raw_params(key):
    """Deterministic parameters matching the PyTorch module's shapes (eval mode)."""
    params = []
    for li in range(N_LAYERS):
        f_in, f_out = DIMS[li], DIMS[li + 1]
        key, kw, kb, kg, kbeta, km, kv = jax.random.split(key, 7)
        bound = 1.0 / jnp.sqrt(f_in)
        # PyTorch Linear weight is [out, in]; stored transposed [in, out] here.
        w = jax.random.uniform(kw, (f_in, f_out), jnp.float32, -bound, bound)
        b = jax.random.uniform(kb, (1, f_out), jnp.float32, -bound, bound)
        if li < 5:
            gamma = 1.0 + 0.1 * jax.random.normal(kg, (1, f_out), jnp.float32)
            beta = 0.1 * jax.random.normal(kbeta, (1, f_out), jnp.float32)
            r_mean = 0.1 * jax.random.normal(km, (1, f_out), jnp.float32)
            r_var = jnp.abs(1.0 + 0.1 * jax.random.normal(kv, (1, f_out), jnp.float32))
        else:
            gamma = beta = r_mean = r_var = None
        params.append(dict(w=w, b=b, gamma=gamma, beta=beta, mean=r_mean, var=r_var))
    return params


def fold_params(raw):
    """Fold each layer's BN (eval) affine into the NEXT layer's linear weights/bias.
    Exact up to f32 re-association:  (a*s + t) @ W + b == a @ (s.T * W) + (t @ W + b)."""
    folded = []
    prev_s = prev_t = None
    for li, p in enumerate(raw):
        w_orig, b_orig = p["w"], p["b"]
        if prev_s is not None:
            w = prev_s.T * w_orig
            b = prev_t @ w_orig + b_orig
        else:
            w, b = w_orig, b_orig
        if li < 5:
            s = p["gamma"] / jnp.sqrt(p["var"] + BN_EPS)
            t = p["beta"] - p["mean"] * s
            prev_s, prev_t = s, t
        else:
            prev_s = prev_t = None
        folded.append((w, b))
    return folded


def prepare_params(raw):
    """BN fold (f32, exact) -> pad -> pack -> bf16 weight cast.

    Returns (w1 [1536,1024] bf16, w2 [1024,512] bf16, w3 [512,256] bf16,
             w_tail [512,128] bf16 (w4 | w5 padded 64->128 | w6 padded 1->128),
             b_all [1,2176] f32 (all 6 biases, lane-aligned segments))."""
    folded = fold_params(raw)
    (w1, b1), (w2, b2), (w3, b3), (w4, b4), (w5, b5), (w6, b6) = folded

    w1 = jnp.pad(w1, ((0, F_IN_PAD - w1.shape[0]), (0, 0)))          # 1470 -> 1536 rows
    w5 = jnp.pad(w5, ((0, 0), (0, 128 - w5.shape[1])))               # out 64 -> 128
    b5 = jnp.pad(b5, ((0, 0), (0, 128 - b5.shape[1])))
    w6 = jnp.pad(w6, ((0, 128 - w6.shape[0]), (0, 128 - w6.shape[1])))  # (64,1) -> (128,128)
    b6 = jnp.pad(b6, ((0, 0), (0, 128 - b6.shape[1])))

    w_tail = jnp.concatenate([w4, w5, w6], axis=0)                   # (512, 128)
    b_all = jnp.concatenate([b1, b2, b3, b4, b5, b6], axis=1)        # (1, 2176)
    assert b_all.shape[1] == B_TOT

    bf16 = jnp.bfloat16
    return (w1.astype(bf16), w2.astype(bf16), w3.astype(bf16),
            w_tail.astype(bf16), b_all.astype(jnp.float32))


def reference_forward(x, raw):
    """Pure-JAX f32 reference with the ORIGINAL (unfolded) layer structure."""
    h = x
    for li, p in enumerate(raw):
        h = jnp.maximum(h @ p["w"] + p["b"], 0.0)   # Linear + ReLU (+ Dropout=identity)
        if li < 5:
            s = p["gamma"] / jnp.sqrt(p["var"] + BN_EPS)
            t = p["beta"] - p["mean"] * s
            h = h * s + t                            # BatchNorm1d, eval mode
    return h


if __name__ == "__main__":
    key = jax.random.PRNGKey(0)
    k_params, k_x = jax.random.split(key)
    raw_params = init_raw_params(k_params)
    packed_params = prepare_params(raw_params)

    B = 8
    x = jax.random.normal(k_x, (B, DIMS[0]), jnp.float32)

    out = jax.block_until_ready(cnn_forward(x, packed_params))
    assert out.shape == (B, 1), out.shape

    ref = reference_forward(x, raw_params)
    max_err = float(jnp.max(jnp.abs(out - ref)))
    # bf16 weights => relaxed tolerance vs. the pure-f32 reference.
    assert jnp.allclose(out, ref, atol=3e-2, rtol=3e-2), max_err
    print("KERNEL_OK")
</pallas_src>

<mosaic_0001>
module attributes {stable_mosaic.version = 11 : i64} {
  func.func @_fused_mlp_kernel(%arg0: i32, %arg1: memref<8x512xf32, #tpu.memory_space<vmem>>, %arg2: memref<512x1024xbf16, #tpu.memory_space<vmem>>, %arg3: memref<1024x512xbf16, #tpu.memory_space<vmem>>, %arg4: memref<512x256xbf16, #tpu.memory_space<vmem>>, %arg5: memref<512x128xbf16, #tpu.memory_space<vmem>>, %arg6: memref<1x2176xf32, #tpu.memory_space<vmem>>, %arg7: memref<8x1xf32, #tpu.memory_space<vmem>>, %arg8: memref<8x1024xf32, #tpu.memory_space<vmem>>) attributes {dimension_semantics = [#tpu.dimension_semantics<arbitrary>], iteration_bounds = array<i64: 3>, scalar_prefetch = 0 : i64, scratch_operands = 1 : i64, tpu.core_type = #tpu.core_type<tc>, window_params = [{transform_indices = @transform_0, window_bounds = array<i64: 8, 512>}, {transform_indices = @transform_1, window_bounds = array<i64: 512, 1024>}, {pipeline_mode = #tpu.pipeline_mode<synchronous>, transform_indices = @transform_2, window_bounds = array<i64: 1024, 512>}, {pipeline_mode = #tpu.pipeline_mode<synchronous>, transform_indices = @transform_3, window_bounds = array<i64: 512, 256>}, {pipeline_mode = #tpu.pipeline_mode<synchronous>, transform_indices = @transform_4, window_bounds = array<i64: 512, 128>}, {pipeline_mode = #tpu.pipeline_mode<synchronous>, transform_indices = @transform_5, window_bounds = array<i64: 1, 2176>}, {pipeline_mode = #tpu.pipeline_mode<synchronous>, transform_indices = @transform_6, window_bounds = array<i64: 8, 1>}]} {
    %c0_i32 = arith.constant 0 : i32
    %0 = arith.cmpi eq, %arg0, %c0_i32 : i32
    %1 = arith.extui %0 : i1 to i32
    %c0_i32_0 = arith.constant 0 : i32
    %2 = arith.cmpi ne, %1, %c0_i32_0 : i32
    scf.if %2 {
      %cst_9 = arith.constant 0.000000e+00 : f32
      %13 = vector.broadcast %cst_9 : f32 to vector<8x1024xf32>
      %c0_10 = arith.constant 0 : index
      %c0_11 = arith.constant 0 : index
      %14 = vector.load %arg8[%c0_10, %c0_11] : memref<8x1024xf32, #tpu.memory_space<vmem>>, vector<8x1024xf32>
      tpu.vector_store %arg8[%c0_10, %c0_11], %13 {strides = array<i32>} : memref<8x1024xf32, #tpu.memory_space<vmem>>, vector<8x1024xf32>,
    } else {
    }
    %c0 = arith.constant 0 : index
    %c0_1 = arith.constant 0 : index
    %3 = vector.load %arg8[%c0, %c0_1] : memref<8x1024xf32, #tpu.memory_space<vmem>>, vector<8x1024xf32>
    %c0_2 = arith.constant 0 : index
    %c0_3 = arith.constant 0 : index
    %4 = vector.load %arg1[%c0_2, %c0_3] : memref<8x512xf32, #tpu.memory_space<vmem>>, vector<8x512xf32>
    %5 = arith.truncf %4 : vector<8x512xf32> to vector<8x512xbf16>
    %c0_4 = arith.constant 0 : index
    %c0_5 = arith.constant 0 : index
    %6 = vector.load %arg2[%c0_4, %c0_5] : memref<512x1024xbf16, #tpu.memory_space<vmem>>, vector<512x1024xbf16>
    %cst = arith.constant dense<0.000000e+00> : vector<8x1024xf32>
    %7 = tpu.matmul %5, %6, %cst {dimension_numbers = #tpu.dot_dimension_numbers<[1], [0], [0], [1], [0, 0, 1, 1], [], []>} : vector<8x512xbf16>, vector<512x1024xbf16>, vector<8x1024xf32> -> vector<8x1024xf32>
    %8 = arith.addf %3, %7 : vector<8x1024xf32>
    %c0_6 = arith.constant 0 : index
    %c0_7 = arith.constant 0 : index
    %9 = vector.load %arg8[%c0_6, %c0_7] : memref<8x1024xf32, #tpu.memory_space<vmem>>, vector<8x1024xf32>
    tpu.vector_store %arg8[%c0_6, %c0_7], %8 {strides = array<i32>} : memref<8x1024xf32, #tpu.memory_space<vmem>>, vector<8x1024xf32>,
    %c2_i32 = arith.constant 2 : i32
    %10 = arith.cmpi eq, %arg0, %c2_i32 : i32
    %11 = arith.extui %10 : i1 to i32
    %c0_i32_8 = arith.constant 0 : i32
    %12 = arith.cmpi ne, %11, %c0_i32_8 : i32
    scf.if %12 {
      %c0_9 = arith.constant 0 : index
      %c0_10 = arith.constant 0 : index
      %13 = vector.load %arg8[%c0_9, %c0_10] : memref<8x1024xf32, #tpu.memory_space<vmem>>, vector<8x1024xf32>
      %c0_11 = arith.constant 0 : index
      %c0_12 = arith.constant 0 : index
      %14 = vector.load %arg6[%c0_11, %c0_12] : memref<1x2176xf32, #tpu.memory_space<vmem>>, vector<1x1024xf32>
      %15 = vector.broadcast %14 : vector<1x1024xf32> to vector<8x1024xf32>
      %16 = arith.addf %13, %15 : vector<8x1024xf32>
      %cst_13 = arith.constant 0.000000e+00 : f32
      %17 = vector.broadcast %cst_13 : f32 to vector<8x1024xf32>
      %18 = arith.maximumf %16, %17 : vector<8x1024xf32>
      %19 = arith.truncf %18 : vector<8x1024xf32> to vector<8x1024xbf16>
      %c0_14 = arith.constant 0 : index
      %c0_15 = arith.constant 0 : index
      %20 = vector.load %arg3[%c0_14, %c0_15] : memref<1024x512xbf16, #tpu.memory_space<vmem>>, vector<1024x512xbf16>
      %cst_16 = arith.constant dense<0.000000e+00> : vector<8x512xf32>
      %21 = tpu.matmul %19, %20, %cst_16 {dimension_numbers = #tpu.dot_dimension_numbers<[1], [0], [0], [1], [0, 0, 1, 1], [], []>} : vector<8x1024xbf16>, vector<1024x512xbf16>, vector<8x512xf32> -> vector<8x512xf32>
      %c0_17 = arith.constant 0 : index
      %c1024 = arith.constant 1024 : index
      %22 = vector.load %arg6[%c0_17, %c1024] : memref<1x2176xf32, #tpu.memory_space<vmem>>, vector<1x512xf32>
      %23 = vector.broadcast %22 : vector<1x512xf32> to vector<8x512xf32>
      %24 = arith.addf %21, %23 : vector<8x512xf32>
      %cst_18 = arith.constant 0.000000e+00 : f32
      %25 = vector.broadcast %cst_18 : f32 to vector<8x512xf32>
      %26 = arith.maximumf %24, %25 : vector<8x512xf32>
      %27 = arith.truncf %26 : vector<8x512xf32> to vector<8x512xbf16>
      %c0_19 = arith.constant 0 : index
      %c0_20 = arith.constant 0 : index
      %28 = vector.load %arg4[%c0_19, %c0_20] : memref<512x256xbf16, #tpu.memory_space<vmem>>, vector<512x256xbf16>
      %cst_21 = arith.constant dense<0.000000e+00> : vector<8x256xf32>
      %29 = tpu.matmul %27, %28, %cst_21 {dimension_numbers = #tpu.dot_dimension_numbers<[1], [0], [0], [1], [0, 0, 1, 1], [], []>} : vector<8x512xbf16>, vector<512x256xbf16>, vector<8x256xf32> -> vector<8x256xf32>
      %c0_22 = arith.constant 0 : index
      %c1536 = arith.constant 1536 : index
      %30 = vector.load %arg6[%c0_22, %c1536] : memref<1x2176xf32, #tpu.memory_space<vmem>>, vector<1x256xf32>
      %31 = vector.broadcast %30 : vector<1x256xf32> to vector<8x256xf32>
      %32 = arith.addf %29, %31 : vector<8x256xf32>
      %cst_23 = arith.constant 0.000000e+00 : f32
      %33 = vector.broadcast %cst_23 : f32 to vector<8x256xf32>
      %34 = arith.maximumf %32, %33 : vector<8x256xf32>
      %35 = arith.truncf %34 : vector<8x256xf32> to vector<8x256xbf16>
      %c0_24 = arith.constant 0 : index
      %c0_25 = arith.constant 0 : index
      %36 = vector.load %arg5[%c0_24, %c0_25] : memref<512x128xbf16, #tpu.memory_space<vmem>>, vector<256x128xbf16>
      %cst_26 = arith.constant dense<0.000000e+00> : vector<8x128xf32>
      %37 = tpu.matmul %35, %36, %cst_26 {dimension_numbers = #tpu.dot_dimension_numbers<[1], [0], [0], [1], [0, 0, 1, 1], [], []>} : vector<8x256xbf16>, vector<256x128xbf16>, vector<8x128xf32> -> vector<8x128xf32>
      %c0_27 = arith.constant 0 : index
      %c1792 = arith.constant 1792 : index
      %38 = vector.load %arg6[%c0_27, %c1792] : memref<1x2176xf32, #tpu.memory_space<vmem>>, vector<1x128xf32>
      %39 = vector.broadcast %38 : vector<1x128xf32> to vector<8x128xf32>
      %40 = arith.addf %37, %39 : vector<8x128xf32>
      %cst_28 = arith.constant 0.000000e+00 : f32
      %41 = vector.broadcast %cst_28 : f32 to vector<8x128xf32>
      %42 = arith.maximumf %40, %41 : vector<8x128xf32>
      %43 = arith.truncf %42 : vector<8x128xf32> to vector<8x128xbf16>
      %c256 = arith.constant 256 : index
      %c0_29 = arith.constant 0 : index
      %44 = vector.load %arg5[%c256, %c0_29] : memref<512x128xbf16, #tpu.memory_space<vmem>>, vector<128x128xbf16>
      %cst_30 = arith.constant dense<0.000000e+00> : vector<8x128xf32>
      %45 = tpu.matmul %43, %44, %cst_30 {dimension_numbers = #tpu.dot_dimension_numbers<[1], [0], [0], [1], [0, 0, 1, 1], [], []>} : vector<8x128xbf16>, vector<128x128xbf16>, vector<8x128xf32> -> vector<8x128xf32>
      %c0_31 = arith.constant 0 : index
      %c1920 = arith.constant 1920 : index
      %46 = vector.load %arg6[%c0_31, %c1920] : memref<1x2176xf32, #tpu.memory_space<vmem>>, vector<1x128xf32>
      %47 = vector.broadcast %46 : vector<1x128xf32> to vector<8x128xf32>
      %48 = arith.addf %45, %47 : vector<8x128xf32>
      %cst_32 = arith.constant 0.000000e+00 : f32
      %49 = vector.broadcast %cst_32 : f32 to vector<8x128xf32>
      %50 = arith.maximumf %48, %49 : vector<8x128xf32>
      %51 = arith.truncf %50 : vector<8x128xf32> to vector<8x128xbf16>
      %c384 = arith.constant 384 : index
      %c0_33 = arith.constant 0 : index
      %52 = vector.load %arg5[%c384, %c0_33] : memref<512x128xbf16, #tpu.memory_space<vmem>>, vector<128x128xbf16>
      %cst_34 = arith.constant dense<0.000000e+00> : vector<8x128xf32>
      %53 = tpu.matmul %51, %52, %cst_34 {dimension_numbers = #tpu.dot_dimension_numbers<[1], [0], [0], [1], [0, 0, 1, 1], [], []>} : vector<8x128xbf16>, vector<128x128xbf16>, vector<8x128xf32> -> vector<8x128xf32>
      %c0_35 = arith.constant 0 : index
      %c2048 = arith.constant 2048 : index
      %54 = vector.load %arg6[%c0_35, %c2048] : memref<1x2176xf32, #tpu.memory_space<vmem>>, vector<1x128xf32>
      %55 = vector.broadcast %54 : vector<1x128xf32> to vector<8x128xf32>
      %56 = arith.addf %53, %55 : vector<8x128xf32>
      %cst_36 = arith.constant 0.000000e+00 : f32
      %57 = vector.broadcast %cst_36 : f32 to vector<8x128xf32>
      %58 = arith.maximumf %56, %57 : vector<8x128xf32>
      %59 = vector.extract_strided_slice %58 {offsets = [0, 0], sizes = [8, 1], strides = [1, 1]} : vector<8x128xf32> to vector<8x1xf32>
      %c0_37 = arith.constant 0 : index
      %c0_38 = arith.constant 0 : index
      %60 = vector.load %arg7[%c0_37, %c0_38] : memref<8x1xf32, #tpu.memory_space<vmem>>, vector<8x1xf32>
      tpu.vector_store %arg7[%c0_37, %c0_38], %59 {strides = array<i32>} : memref<8x1xf32, #tpu.memory_space<vmem>>, vector<8x1xf32>,
    } else {
    }
    return
  }
  func.func @transform_0(%arg0: i32) -> (i32, i32) {
    %c0_i32 = arith.constant 0 : i32
    %c0_i32_0 = arith.constant 0 : i32
    return %c0_i32, %arg0 : i32, i32
  }
  func.func @transform_1(%arg0: i32) -> (i32, i32) {
    %c0_i32 = arith.constant 0 : i32
    %c0_i32_0 = arith.constant 0 : i32
    return %arg0, %c0_i32 : i32, i32
  }
  func.func @transform_2(%arg0: i32) -> (i32, i32) {
    %c0_i32 = arith.constant 0 : i32
    %c0_i32_0 = arith.constant 0 : i32
    %c0_i32_1 = arith.constant 0 : i32
    return %c0_i32, %c0_i32_0 : i32, i32
  }
  func.func @transform_3(%arg0: i32) -> (i32, i32) {
    %c0_i32 = arith.constant 0 : i32
    %c0_i32_0 = arith.constant 0 : i32
    %c0_i32_1 = arith.constant 0 : i32
    return %c0_i32, %c0_i32_0 : i32, i32
  }
  func.func @transform_4(%arg0: i32) -> (i32, i32) {
    %c0_i32 = arith.constant 0 : i32
    %c0_i32_0 = arith.constant 0 : i32
    %c0_i32_1 = arith.constant 0 : i32
    return %c0_i32, %c0_i32_0 : i32, i32
  }
  func.func @transform_5(%arg0: i32) -> (i32, i32) {
    %c0_i32 = arith.constant 0 : i32
    %c0_i32_0 = arith.constant 0 : i32
    %c0_i32_1 = arith.constant 0 : i32
    return %c0_i32, %c0_i32_0 : i32, i32
  }
  func.func @transform_6(%arg0: i32) -> (i32, i32) {
    %c0_i32 = arith.constant 0 : i32
    %c0_i32_0 = arith.constant 0 : i32
    %c0_i32_1 = arith.constant 0 : i32
    return %c0_i32, %c0_i32_0 : i32, i32
  }
}

</mosaic_0001>

<bundles_post_ra>
// kernel: cnn_forward_fused.1
= control target key start
LH: loop header
LB: loop body
LE: loop exit
PB: predicated region body
PF: predicated region fallthrough
CT: control target
= control target key end

     0   :  { %11 = vsyncpa [#allocation4], 0  ;;  %s7360_s0 = inlined_call_operand.vmem [shape: f32[8,1536], index: 0, kind: input, shape index: {}]   ;;  %s7361_s1 = inlined_call_operand.hbm [shape: bf16[1536,1024], index: 1, kind: input, shape index: {}]   ;;  %s7362_s2 = inlined_call_operand.hbm [shape: bf16[1024,512], index: 2, kind: input, shape index: {}]   ;;  %s7363_s3 = inlined_call_operand.hbm [shape: bf16[512,256], index: 3, kind: input, shape index: {}]   ;;  %s7364_s4 = inlined_call_operand.hbm [shape: bf16[512,128], index: 4, kind: input, shape index: {}]   ;;  %s7365_s5 = inlined_call_operand.hbm [shape: f32[1,2176], index: 5, kind: input, shape index: {}]   ;;  %s7366_s6 = inlined_call_operand.vmem [shape: f32[8,1], index: 6, kind: output, shape index: {}]  }
   0x1   :  { %13 = vsyncpa [#allocation4 + $0x1], 0 }
   0x2   :  { %14 = vsyncpa [#allocation6], 0 }
   0x3   :  { %15 = vsyncpa [#allocation9], 0  ;;  %s6784_s21 = smov 0   ;;  %s6786_s22 = smov 0  }
   0x4   :  { %s6788_s23 = smov 0   ;;  %s6790_s24 = smov 0  }
   0x5 LB: > { %s6803_s25 = sadd.s32 4294967295, %s6731_s24   ;;  %p67_p0 = scmp.ne.s32.totalorder %s6723_s22, %s6719_s21  ;;  %s6731_s24 = sphi %s6790_s24, %s7385_s24   ;;  %s6727_s23 = sphi %s6788_s23, %s7384_s23   ;;  %s6723_s22 = sphi %s6786_s22, %s7383_s22   ;;  %s6719_s21 = sphi %s6784_s21, %s7382_s21  }
   0x6   : > { %p7367_p1 = scmp.eq.s32.totalorder %s6803_s25, 0  ;;  %p5194_p2 = scmp.ge.s32.totalorder %s6731_s24, 1 }
   0x7   : > { %p183_p3 = scmp.lt.s32.totalorder %s6731_s24, 4  ;;  %s6733_s28 = smov [#allocation5]  }
   0x8   : > { %p6812_p5 = por %p7367_p1, %p67_p0  ;;  %s195_s29 = sshll.u32 %s6733_s28, 4  ;;  %s196_s29 = int_to_ptr.vmem [resolvable:$true] %s195_s29 }
   0x9   : > { %p6816_p6 = pnand %p5194_p2, %p183_p3  ;;  %s6734_s7 = smov [#allocation8]  }
   0xa   : > { %s7370_s26 = scalar_select %p6812_p5, 1, 0 }
   0xb   : > { %s7371_s27 = scalar_select %p6816_p6, 1, 0 }
   0xc   : > { %p5961_p7 = pneg %p6816_p6  ;;  %s221_s8 = sshll.u32 %s6734_s7, 4  ;;  %s6828_s8 = int_to_ptr.vmem [resolvable:$true] %s221_s8 }
   0xd   : > { %s6547_s11 = scalar_lea.hbm %s7362_s2, 32768 }
   0xe   : > { %p6824_p8 = pnand %p5961_p7, %p7367_p1  ;;  %p6548_p9 = scmp.ne.s32.totalorder %s7362_s2, %s6547_s11 }
   0xf   : > { %p6554_p13 = scmp.lt.u32.totalorder %s6547_s11, %s7362_s2 }
  0x10   : > { %p6838_p10 = pneg %p6824_p8 }
  0x12   : > { %p6550_p11 = pnand %p6838_p10, %p6548_p9 }
  0x14   : > { %p6551_p12 = pneg %p6550_p11 }
  0x16   : > { %p6556_p0 = pnand %p6554_p13, %p6551_p12 }
  0x18   : > { %6559 = shalt.err (!%p6556_p0)
}
  0x19   : > { %s6560_s17 = scalar_lea.vmem %s196_s29, 32768  ;;  %p6568_p4 = scmp.lt.s32.totalorder %s196_s29, %s196_s29 }
  0x1a   : > { %p6561_p2 = scmp.ne.s32.totalorder %s196_s29, %s6560_s17  ;;  %p6569_p1 = scmp.lt.s32.totalorder %s6560_s17, %s6560_s17 }
  0x1c   : > { %p6563_p3 = pnand %p6561_p2, %p6838_p10  ;;  %p6570_p5 = por %p6569_p1, %p6568_p4 }
  0x1e   : > { %p6564_p7 = pneg %p6563_p3 }
  0x20   : > { %p6571_p6 = pnand %p6570_p5, %p6564_p7 }
  0x22   : > { %6574 = shalt.err (!%p6571_p6)
}
  0x23   : > { %s6735_s18 = smov 256   ;;  %s6736_s19 = smov 16  }
  0x24   : > { %5964 = dma.hbm_to_vmem [thread:$0]  (!%p6824_p8), %s7362_s2, 32768, %s196_s29, [#allocation6], %s6735_s18, %s6735_s18, %s6736_s19  }
  0x25   : > { %s6575_s9 = scalar_lea.hbm %s7364_s4, 4096 }
  0x26   : > { %p6576_p9 = scmp.ne.s32.totalorder %s7364_s4, %s6575_s9  ;;  %p6582_p5 = scmp.lt.u32.totalorder %s6575_s9, %s7364_s4 }
  0x28   : > { %p6578_p1 = pnand %p6576_p9, %p6838_p10 }
  0x2a   : > { %p6579_p4 = pneg %p6578_p1 }
  0x2c   : > { %p6584_p6 = pnand %p6582_p5, %p6579_p4 }
  0x2e   : > { %6587 = shalt.err (!%p6584_p6)
}
  0x2f   : > { %s6588_s29 = scalar_lea.vmem %s6828_s8, 4096  ;;  %p6596_p0 = scmp.lt.s32.totalorder %s6828_s8, %s6828_s8 }
  0x30   : > { %p6589_p11 = scmp.ne.s32.totalorder %s6828_s8, %s6588_s29  ;;  %p6597_p2 = scmp.lt.s32.totalorder %s6588_s29, %s6588_s29 }
  0x32   : > { %p6591_p12 = pnand %p6589_p11, %p6838_p10  ;;  %p6598_p3 = por %p6597_p2, %p6596_p0 }
  0x34   : > { %p6592_p13 = pneg %p6591_p12 }
  0x36   : > { %p6599_p7 = pnand %p6598_p3, %p6592_p13 }
  0x38   : > { %6602 = shalt.err (!%p6599_p7)
}
  0x39   : > { %s6737_s15 = smov 64   ;;  %s6738_s16 = smov 4  }
  0x3a   : > { %5970 = dma.hbm_to_vmem [thread:$0]  (!%p6824_p8), %s7364_s4, 4096, %s6828_s8, [#allocation9], %s6737_s15, %s6737_s15, %s6738_s16  }
  0x3b   : > { %s6739_s19 = smov [#allocation7]   ;;  %s6603_s7 = scalar_lea.hbm %s7363_s3, 8192 }
  0x3c   : > { %s208_s20 = sshll.u32 %s6739_s19, 4  ;;  %p6604_p9 = scmp.ne.s32.totalorder %s7363_s3, %s6603_s7  ;;  %s209_s20 = int_to_ptr.vmem [resolvable:$true] %s208_s20 }
  0x3d   : > { %p6610_p5 = scmp.lt.u32.totalorder %s6603_s7, %s7363_s3 }
  0x3e   : > { %p6606_p1 = pnand %p6604_p9, %p6838_p10 }
  0x40   : > { %p6607_p4 = pneg %p6606_p1 }
  0x42   : > { %p6612_p6 = pnand %p6610_p5, %p6607_p4 }
  0x44   : > { %6615 = shalt.err (!%p6612_p6)
}
  0x45   : > { %s6616_s8 = scalar_lea.vmem %s209_s20, 8192  ;;  %p6624_p0 = scmp.lt.s32.totalorder %s209_s20, %s209_s20 }
  0x46   : > { %p6617_p11 = scmp.ne.s32.totalorder %s209_s20, %s6616_s8  ;;  %p6625_p2 = scmp.lt.s32.totalorder %s6616_s8, %s6616_s8 }
  0x48   : > { %p6619_p12 = pnand %p6617_p11, %p6838_p10  ;;  %p6626_p3 = por %p6625_p2, %p6624_p0 }
  0x4a   : > { %p6620_p13 = pneg %p6619_p12 }
  0x4c   : > { %p6627_p7 = pnand %p6626_p3, %p6620_p13 }
  0x4e   : > { %6630 = shalt.err (!%p6627_p7)
}
  0x4f   : > { %s6740_s13 = smov 128   ;;  %s6741_s29 = smov 8  }
  0x50   : > { %5967 = dma.hbm_to_vmem [thread:$0]  (!%p6824_p8), %s7363_s3, 8192, %s209_s20, [#allocation6], %s6740_s13, %s6740_s13, %s6741_s29  }
  0x51   : > { %s6742_s17 = smov [#allocation10]   ;;  %s6631_s28 = scalar_lea.hbm %s7365_s5, 272 }
  0x52   : > { %s235_s18 = sshll.u32 %s6742_s17, 4  ;;  %p6632_p9 = scmp.ne.s32.totalorder %s7365_s5, %s6631_s28  ;;  %s236_s18 = int_to_ptr.vmem [resolvable:$true] %s235_s18 }
  0x53   : > { %p6638_p5 = scmp.lt.u32.totalorder %s6631_s28, %s7365_s5 }
  0x54   : > { %p6634_p1 = pnand %p6632_p9, %p6838_p10 }
  0x56   : > { %p6635_p4 = pneg %p6634_p1 }
  0x58   : > { %p6640_p6 = pnand %p6638_p5, %p6635_p4 }
  0x5a   : > { %6643 = shalt.err (!%p6640_p6)
}
  0x5b   : > { %s6644_s20 = scalar_lea.vmem %s236_s18, 272  ;;  %s6651_s12 = scalar_lea.vmem %s236_s18, 288 }
  0x5c   : > { %p6645_p11 = scmp.ne.s32.totalorder %s236_s18, %s6644_s20  ;;  %p6652_p0 = scmp.lt.s32.totalorder %s236_s18, %s236_s18 }
  0x5d   : > { %p6653_p2 = scmp.lt.s32.totalorder %s6651_s12, %s6644_s20 }
  0x5e   : > { %p6647_p12 = pnand %p6645_p11, %p6838_p10 }
  0x5f   : > { %p6654_p3 = por %p6653_p2, %p6652_p0 }
  0x60   : > { %p6648_p13 = pneg %p6647_p12 }
  0x62   : > { %p6655_p7 = pnand %p6654_p3, %p6648_p13 }
  0x64   : > { %6658 = shalt.err (!%p6655_p7)
}
  0x65   : > { %5973 = dma.hbm_to_vmem [thread:$0]  (!%p6824_p8), %s7365_s5, 272, %s236_s18, [#allocation9]  }
  0x66   : > { %s6914_s14 = sadd.s32 1, %s6731_s24   ;;  %s54_s29 = sadd.s32 1, %s6727_s23 }
  0x67   : > { %s51_s15 = ssub.s32 %s6731_s24, %s6914_s14  ;;  %p61_p10 = scmp.ne.s32.totalorder %s6727_s23, %s6723_s22 }
  0x68   : > { %p52_p9 = scmp.eq.s32.totalorder %s51_s15, 0  ;;  %p62_p1 = scmp.eq.s32.totalorder %s6731_s24, 0 }
  0x69   : > { %p5982_p4 = scmp.lt.s32.totalorder %s6731_s24, 3  ;;  %s255_s30 = sand.u32 1, %s6727_s23  }
  0x6a   : > { %s6925_s16 = scalar_select %p52_p9, %s6727_s23, %s54_s29  }
  0x6b   : > { %p63_p5 = por %p62_p1, %p61_p10  ;;  %s5200_s17 = sshll.u32 %s255_s30, 11 }
  0x6c   : > { %s5828_s19 = sshll.u32 %s6731_s24, 15  ;;  %s259_s18 = scalar_lea.vmem [#allocation3], %s5200_s17 }
  0x6d   : > { %s6931_s7 = scalar_lea.hbm %s7361_s1, %s5828_s19  ;;  %s267_s9 = sshll.u32 %s259_s18, 4  ;;  %s6937_s9 = int_to_ptr.vmem [resolvable:$true] %s267_s9 }
  0x6e   : > { %p6933_p8 = pnand %p5982_p4, %p63_p5  ;;  %s6939_s24 = scalar_lea.sflag [#allocation4], %s255_s30 }
  0x6f   : > { %s6659_s11 = scalar_lea.hbm %s6931_s7, 32768  ;;  %s6664_s8 = scalar_lea.hbm %s7361_s1, 98304 }
  0x70   : > { %p6660_p6 = scmp.ne.s32.totalorder %s6931_s7, %s6659_s11  ;;  %p6661_p11 = pneg %p6933_p8 }
  0x71   : > { %p6665_p0 = scmp.lt.u32.totalorder %s6931_s7, %s7361_s1  ;;  %p6666_p2 = scmp.lt.u32.totalorder %s6664_s8, %s6659_s11 }
  0x72   : > { %p6662_p12 = pnand %p6661_p11, %p6660_p6  ;;  %p6668_p7 = scmp.lt.u32.totalorder %s6659_s11, %s6931_s7 }
  0x73   : > { %p6667_p3 = por %p6666_p2, %p6665_p0 }
  0x74   : > { %p6663_p13 = pneg %p6662_p12 }
  0x75   : > { %p6669_p10 = por %p6668_p7, %p6667_p3 }
  0x77   : > { %p6670_p9 = pnand %p6669_p10, %p6663_p13 }
  0x79   : > { %6673 = shalt.err (!%p6670_p9)
}
  0x7a   : > { %s6674_s15 = scalar_lea.vmem %s6937_s9, 32768  ;;  %s6743_s30 = smov [#allocation3]  }
  0x7b   : > { %p6675_p1 = scmp.ne.s32.totalorder %s6937_s9, %s6674_s15  ;;  %s6679_s17 = sshll.u32 %s6743_s30, 4  ;;  %s6680_s17 = int_to_ptr.vmem [resolvable:$false] %s6679_s17 }
  0x7c   : > { %s6681_s19 = scalar_lea.vmem %s6680_s17, 65536  ;;  %p6682_p6 = scmp.lt.s32.totalorder %s6937_s9, %s6680_s17 }
  0x7d   : > { %p6677_p4 = pnand %p6675_p1, %p6661_p11  ;;  %p6683_p12 = scmp.lt.s32.totalorder %s6681_s19, %s6674_s15 }
  0x7f   : > { %p6678_p5 = pneg %p6677_p4  ;;  %p6684_p0 = por %p6683_p12, %p6682_p6 }
  0x81   : > { %p6685_p2 = pnand %p6684_p0, %p6678_p5 }
  0x83   : > { %6688 = shalt.err (!%p6685_p2)
}
  0x84   : > { %s6744_s21 = smov 512   ;;  %s6745_s28 = smov 32  }
  0x85   : > { %5977 = dma.hbm_to_vmem [thread:$0]  (!%p6933_p8), %s6931_s7, 32768, %s6937_s9, %s6939_s24, %s6744_s21, %s6744_s21, %s6745_s28  }
  0x86   : > { %p7375_p11 = scmp.ne.s32.totalorder %s7371_s27, 0 }
  0x87   : > { %s281_s18 = sand.u32 (!%p7375_p11), 1, %s6723_s22   ;;  %p7376_p13 = scmp.ne.s32.totalorder (!%p7375_p11), %s7370_s26, 0 }
  0x88   : > { %279 = sbr.rel (%p7375_p11) target bundleno = 2007 (0x7d7), region = 44  ;;  %s5205_s11 = sshll.u32 (!%p7375_p11), %s281_s18, 11 }
  0x89   : > { %s282_s20 = scalar_lea.sflag (!%p7375_p11), [#allocation4], %s281_s18  ;;  %s6970_s12 = scalar_lea.vmem (!%p7375_p11), [#allocation3], %s5205_s11 }
  0x8f   : > { %6706 = dma.done.wait (%p7376_p13), %s282_s20, 32768  }
  0x90   : > { %6708 = vsyncadd (%p7376_p13), %s282_s20, 4294934528  ;;  %p7377_p3 = scmp.eq.s32.totalorder %s6803_s25, 0 }
  0x92   : > { %6710 = dma.done.wait (%p7377_p3), [#allocation6], 40960   ;;  %p7378_p8 = pmov %p7377_p3 }
  0x93   : > { %p7379_p7 = pmov %p7377_p3 }
  0x94   : > { %6712 = vsyncadd (%p7378_p8), [#allocation6], 4294926336 }
  0x95   : > { %6714 = dma.done.wait (%p7379_p7), [#allocation9], 4368   ;;  %p7380_p10 = pmov %p7377_p3 }
  0x96   : > { %s5210_s27 = sshll.u32 %s6803_s25, 2  ;;  %p7381_p1 = scmp.ne.s32.totalorder %s6803_s25, 0 }
  0x97   : > { %6716 = vsyncadd (%p7380_p10), [#allocation9], 4294962928  ;;  %p331_p9 = scmp.lt.s32.totalorder %s5210_s27, 11  ;;  %v6746_v0 = vmov (!%p7381_p1), 0.0  }
  0x98   : > { %341 = sbr.rel (%p7381_p1) target bundleno = 159 (0x9f), region = 68  ;;  %342 = vst [vmem:[#allocation2] sm:$0xff] (!%p7381_p1), %v6746_v0  ;;  %343 = vst [vmem:[#allocation2 + $0x8] sm:$0xff] (!%p7381_p1), %v6746_v0 }
  0x99   : > { %s7387_s27 = smov (!%p331_p9, %s5210_s27), 11  ;;  %344 = vst [vmem:[#allocation2 + $0x10] sm:$0xff] (!%p7381_p1), %v6746_v0  ;;  %345 = vst [vmem:[#allocation2 + $0x18] sm:$0xff] (!%p7381_p1), %v6746_v0 }
  0x9a   : > { %s5211_s7 = sshll.u32 %s7387_s27, 3  ;;  %346 = vst [vmem:[#allocation2 + $0x20] sm:$0xff] (!%p7381_p1), %v6746_v0  ;;  %347 = vst [vmem:[#allocation2 + $0x28] sm:$0xff] (!%p7381_p1), %v6746_v0 }
  0x9b   : > { %s6988_s10 = scalar_lea.vmem %s7360_s0, %s5211_s7  ;;  %348 = vst [vmem:[#allocation2 + $0x30] sm:$0xff] (!%p7381_p1), %v6746_v0  ;;  %349 = vst [vmem:[#allocation2 + $0x38] sm:$0xff] (!%p7381_p1), %v6746_v0 }
  0x9f PF: > { %v366_v1 = vld [vmem:[%s6970_s12] sm:$0xff]  ;;  %v359_v54 = vld [vmem:[%s6988_s10 + $0x8] sm:$0xff]  ;;  %v361_v55 = vld [vmem:[%s6988_s10 + $0x18] sm:$0xff]  ;;  %p5469_p4 = scmp.ne.s32.totalorder %s6803_s25, 2 }
  0xa0   : > { %v370_v2 = vld [vmem:[%s6970_s12 + $0x20] sm:$0xff]  ;;  %v7024_v59 = vpack.c.bf16 %v359_v54, %v359_v54  ;;  %v7026_v60 = vpack.c.bf16 %v361_v55, %v361_v55  ;;  %vm6748_vm0 = vmmov (!%p5469_p4), 0   ;;  %vm5102_vm1 = vcmask (!%p5469_p4), 7168  }
  0xa1   : > { %v494_v3 = vld [vmem:[%s6970_s12 + $0x400] sm:$0xff]  ;;  %v5214_v4 = vcombine.high %v366_v1, %v370_v2  ;;  %v5213_v6 = vcombine.low %v366_v1, %v370_v2 }
  0xa2   : > { %v498_v5 = vld [vmem:[%s6970_s12 + $0x420] sm:$0xff]  ;;  %1934 = vmatprep.mubr.bf16.mxu0 %v7024_v59  ;;  %1975 = vmatprep.mubr.bf16.mxu1 %v7026_v60 }
  0xa3   : > { %v374_v7 = vld [vmem:[%s6970_s12 + $0x40] sm:$0xff]  ;;  %v5342_v9 = vcombine.high %v494_v3, %v498_v5  ;;  %v5341_v10 = vcombine.low %v494_v3, %v498_v5  ;;  %1902 = vmatprep.subr.bf16.mxu0 %v5214_v4 }
  0xa4   : > { %v378_v8 = vld [vmem:[%s6970_s12 + $0x60] sm:$0xff]  ;;  %1903 = vmatpush1.bf16.msra.mxu0 %v5213_v6 }
  0xa5   : > { %v5222_v11 = vcombine.high %v374_v7, %v378_v8  ;;  %v502_v12 = vld [vmem:[%s6970_s12 + $0x440] sm:$0xff]  ;;  %1943 = vmatprep.subr.bf16.mxu1 %v5342_v9  ;;  %v5221_v19 = vcombine.low %v374_v7, %v378_v8 }
  0xa6   : > { %v506_v13 = vld [vmem:[%s6970_s12 + $0x460] sm:$0xff]  ;;  %1944 = vmatpush1.bf16.msra.mxu1 %v5341_v10 }
  0xa7   : > { %v382_v14 = vld [vmem:[%s6970_s12 + $0x80] sm:$0xff]  ;;  %v5350_v15 = vcombine.high %v502_v12, %v506_v13  ;;  %1904 = vmatprep.subr.bf16.mxu0 %v5222_v11  ;;  %v5349_v20 = vcombine.low %v502_v12, %v506_v13 }
  0xa8   : > { %v386_v16 = vld [vmem:[%s6970_s12 + $0xa0] sm:$0xff]  ;;  %1905 = vmatpush1.bf16.msra.mxu0 %v5221_v19 }
  0xa9   : > { %v510_v17 = vld [vmem:[%s6970_s12 + $0x480] sm:$0xff]  ;;  %v5230_v21 = vcombine.high %v382_v14, %v386_v16  ;;  %1945 = vmatprep.subr.bf16.mxu1 %v5350_v15  ;;  %v5229_v27 = vcombine.low %v382_v14, %v386_v16 }
  0xaa   : > { %v514_v18 = vld [vmem:[%s6970_s12 + $0x4a0] sm:$0xff]  ;;  %1946 = vmatpush1.bf16.msra.mxu1 %v5349_v20 }
  0xab   : > { %v5358_v22 = vcombine.high %v510_v17, %v514_v18  ;;  %v390_v23 = vld [vmem:[%s6970_s12 + $0xc0] sm:$0xff]  ;;  %1906 = vmatprep.subr.bf16.mxu0 %v5230_v21  ;;  %v5357_v28 = vcombine.low %v510_v17, %v514_v18 }
  0xac   : > { %v394_v24 = vld [vmem:[%s6970_s12 + $0xe0] sm:$0xff]  ;;  %1907 = vmatpush1.bf16.msra.mxu0 %v5229_v27 }
  0xad   : > { %v518_v25 = vld [vmem:[%s6970_s12 + $0x4c0] sm:$0xff]  ;;  %v5238_v29 = vcombine.high %v390_v23, %v394_v24  ;;  %1947 = vmatprep.subr.bf16.mxu1 %v5358_v22  ;;  %v5237_v35 = vcombine.low %v390_v23, %v394_v24 }
  0xae   : > { %v522_v26 = vld [vmem:[%s6970_s12 + $0x4e0] sm:$0xff]  ;;  %1948 = vmatpush1.bf16.msra.mxu1 %v5357_v28 }
  0xaf   : > { %v5366_v30 = vcombine.high %v518_v25, %v522_v26  ;;  %v398_v31 = vld [vmem:[%s6970_s12 + $0x100] sm:$0xff]  ;;  %1908 = vmatprep.subr.bf16.mxu0 %v5238_v29  ;;  %v5365_v36 = vcombine.low %v518_v25, %v522_v26 }
  0xb0   : > { %v402_v32 = vld [vmem:[%s6970_s12 + $0x120] sm:$0xff]  ;;  %1909 = vmatpush1.bf16.msra.mxu0 %v5237_v35 }
  0xb1   : > { %v526_v33 = vld [vmem:[%s6970_s12 + $0x500] sm:$0xff]  ;;  %v5246_v37 = vcombine.high %v398_v31, %v402_v32  ;;  %1949 = vmatprep.subr.bf16.mxu1 %v5366_v30  ;;  %v5245_v43 = vcombine.low %v398_v31, %v402_v32 }
  0xb2   : > { %v530_v34 = vld [vmem:[%s6970_s12 + $0x520] sm:$0xff]  ;;  %1950 = vmatpush1.bf16.msra.mxu1 %v5365_v36 }
  0xb3   : > { %v5374_v38 = vcombine.high %v526_v33, %v530_v34  ;;  %v406_v39 = vld [vmem:[%s6970_s12 + $0x140] sm:$0xff]  ;;  %1910 = vmatprep.subr.bf16.mxu0 %v5246_v37  ;;  %v5373_v44 = vcombine.low %v526_v33, %v530_v34 }
  0xb4   : > { %v410_v40 = vld [vmem:[%s6970_s12 + $0x160] sm:$0xff]  ;;  %1911 = vmatpush1.bf16.msra.mxu0 %v5245_v43 }
  0xb5   : > { %v534_v41 = vld [vmem:[%s6970_s12 + $0x540] sm:$0xff]  ;;  %v5254_v45 = vcombine.high %v406_v39, %v410_v40  ;;  %1951 = vmatprep.subr.bf16.mxu1 %v5374_v38  ;;  %v5253_v51 = vcombine.low %v406_v39, %v410_v40 }
  0xb6   : > { %v538_v42 = vld [vmem:[%s6970_s12 + $0x560] sm:$0xff]  ;;  %1952 = vmatpush1.bf16.msra.mxu1 %v5373_v44 }
  0xb7   : > { %v5382_v46 = vcombine.high %v534_v41, %v538_v42  ;;  %v414_v47 = vld [vmem:[%s6970_s12 + $0x180] sm:$0xff]  ;;  %1912 = vmatprep.subr.bf16.mxu0 %v5254_v45  ;;  %v5381_v52 = vcombine.low %v534_v41, %v538_v42 }
  0xb8   : > { %v418_v48 = vld [vmem:[%s6970_s12 + $0x1a0] sm:$0xff]  ;;  %1913 = vmatpush1.bf16.msra.mxu0 %v5253_v51 }
  0xb9   : > { %v542_v49 = vld [vmem:[%s6970_s12 + $0x580] sm:$0xff]  ;;  %v5262_v53 = vcombine.high %v414_v47, %v418_v48  ;;  %1953 = vmatprep.subr.bf16.mxu1 %v5382_v46  ;;  %v5261_v63 = vcombine.low %v414_v47, %v418_v48 }
  0xba   : > { %v546_v50 = vld [vmem:[%s6970_s12 + $0x5a0] sm:$0xff]  ;;  %1954 = vmatpush1.bf16.msra.mxu1 %v5381_v52 }
  0xbb   : > { %v5390_v56 = vcombine.high %v542_v49, %v546_v50  ;;  %v422_v57 = vld [vmem:[%s6970_s12 + $0x1c0] sm:$0xff]  ;;  %1914 = vmatprep.subr.bf16.mxu0 %v5262_v53  ;;  %v5389_v0 = vcombine.low %v542_v49, %v546_v50 }
  0xbc   : > { %v426_v58 = vld [vmem:[%s6970_s12 + $0x1e0] sm:$0xff]  ;;  %1915 = vmatpush1.bf16.msra.mxu0 %v5261_v63 }
  0xbd   : > { %v550_v61 = vld [vmem:[%s6970_s12 + $0x5c0] sm:$0xff]  ;;  %v5270_v1 = vcombine.high %v422_v57, %v426_v58  ;;  %1955 = vmatprep.subr.bf16.mxu1 %v5390_v56  ;;  %v5269_v7 = vcombine.low %v422_v57, %v426_v58 }
  0xbe   : > { %v554_v62 = vld [vmem:[%s6970_s12 + $0x5e0] sm:$0xff]  ;;  %1956 = vmatpush1.bf16.msra.mxu1 %v5389_v0 }
  0xbf   : > { %v5398_v2 = vcombine.high %v550_v61, %v554_v62  ;;  %v430_v3 = vld [vmem:[%s6970_s12 + $0x200] sm:$0xff]  ;;  %1916 = vmatprep.subr.bf16.mxu0 %v5270_v1  ;;  %v5397_v8 = vcombine.low %v550_v61, %v554_v62 }
  0xc0   : > { %v434_v4 = vld [vmem:[%s6970_s12 + $0x220] sm:$0xff]  ;;  %1917 = vmatpush1.bf16.msra.mxu0 %v5269_v7  ;;  %v495_v7 = vld [vmem:[%s6970_s12 + $0x408] sm:$0xff] }
  0xc1   : > { %v558_v5 = vld [vmem:[%s6970_s12 + $0x600] sm:$0xff]  ;;  %v5278_v9 = vcombine.high %v430_v3, %v434_v4  ;;  %1957 = vmatprep.subr.bf16.mxu1 %v5398_v2  ;;  %v5277_v15 = vcombine.low %v430_v3, %v434_v4 }
  0xc2   : > { %v562_v6 = vld [vmem:[%s6970_s12 + $0x620] sm:$0xff]  ;;  %1958 = vmatpush1.bf16.msra.mxu1 %v5397_v8  ;;  %v499_v8 = vld [vmem:[%s6970_s12 + $0x428] sm:$0xff] }
  0xc3   : > { %v5406_v10 = vcombine.high %v558_v5, %v562_v6  ;;  %v438_v11 = vld [vmem:[%s6970_s12 + $0x240] sm:$0xff]  ;;  %1918 = vmatprep.subr.bf16.mxu0 %v5278_v9  ;;  %v5405_v16 = vcombine.low %v558_v5, %v562_v6  ;;  %v367_v5 = vld [vmem:[%s6970_s12 + $0x8] sm:$0xff] }
  0xc4   : > { %v442_v12 = vld [vmem:[%s6970_s12 + $0x260] sm:$0xff]  ;;  %1919 = vmatpush1.bf16.msra.mxu0 %v5277_v15  ;;  %v371_v6 = vld [vmem:[%s6970_s12 + $0x28] sm:$0xff] }
  0xc5   : > { %v566_v13 = vld [vmem:[%s6970_s12 + $0x640] sm:$0xff]  ;;  %v5286_v17 = vcombine.high %v438_v11, %v442_v12  ;;  %1959 = vmatprep.subr.bf16.mxu1 %v5406_v10  ;;  %v5285_v23 = vcombine.low %v438_v11, %v442_v12  ;;  %v360_v12 = vld [vmem:[%s6988_s10 + $0x10] sm:$0xff]  ;;  %v375_v15 = vld [vmem:[%s6970_s12 + $0x48] sm:$0xff] }
  0xc6   : > { %v570_v14 = vld [vmem:[%s6970_s12 + $0x660] sm:$0xff]  ;;  %1960 = vmatpush1.bf16.msra.mxu1 %v5405_v16  ;;  %v379_v16 = vld [vmem:[%s6970_s12 + $0x68] sm:$0xff] }
  0xc7   : > { %v5414_v18 = vcombine.high %v566_v13, %v570_v14  ;;  %v446_v19 = vld [vmem:[%s6970_s12 + $0x280] sm:$0xff]  ;;  %1920 = vmatprep.subr.bf16.mxu0 %v5286_v17  ;;  %v5413_v24 = vcombine.low %v566_v13, %v570_v14  ;;  %v5216_v13 = vcombine.high %v367_v5, %v371_v6  ;;  %v5344_v14 = vcombine.high %v495_v7, %v499_v8 }
  0xc8   : > { %v450_v20 = vld [vmem:[%s6970_s12 + $0x2a0] sm:$0xff]  ;;  %1921 = vmatpush1.bf16.msra.mxu0 %v5285_v23  ;;  %v5224_v23 = vcombine.high %v375_v15, %v379_v16 }
  0xc9   : > { %v574_v21 = vld [vmem:[%s6970_s12 + $0x680] sm:$0xff]  ;;  %v5294_v25 = vcombine.high %v446_v19, %v450_v20  ;;  %1961 = vmatprep.subr.bf16.mxu1 %v5414_v18  ;;  %v5293_v31 = vcombine.low %v446_v19, %v450_v20  ;;  %v503_v18 = vld [vmem:[%s6970_s12 + $0x448] sm:$0xff]  ;;  %v7076_v20 = vpack.c.bf16 %v360_v12, %v360_v12 }
  0xca   : > { %v578_v22 = vld [vmem:[%s6970_s12 + $0x6a0] sm:$0xff]  ;;  %1962 = vmatpush1.bf16.msra.mxu1 %v5413_v24  ;;  %v507_v19 = vld [vmem:[%s6970_s12 + $0x468] sm:$0xff] }
  0xcb   : > { %v5422_v26 = vcombine.high %v574_v21, %v578_v22  ;;  %v454_v27 = vld [vmem:[%s6970_s12 + $0x2c0] sm:$0xff]  ;;  %1922 = vmatprep.subr.bf16.mxu0 %v5294_v25  ;;  %v5421_v32 = vcombine.low %v574_v21, %v578_v22  ;;  %v5215_v21 = vcombine.low %v367_v5, %v371_v6  ;;  %v5343_v22 = vcombine.low %v495_v7, %v499_v8  ;;  %v383_v25 = vld [vmem:[%s6970_s12 + $0x88] sm:$0xff] }
  0xcc   : > { %v458_v28 = vld [vmem:[%s6970_s12 + $0x2e0] sm:$0xff]  ;;  %1923 = vmatpush1.bf16.msra.mxu0 %v5293_v31  ;;  %v5352_v24 = vcombine.high %v503_v18, %v507_v19  ;;  %v551_v5 = vld [vmem:[%s6970_s12 + $0x5c8] sm:$0xff] }
  0xcd   : > { %v582_v29 = vld [vmem:[%s6970_s12 + $0x6c0] sm:$0xff]  ;;  %v5302_v33 = vcombine.high %v454_v27, %v458_v28  ;;  %1963 = vmatprep.subr.bf16.mxu1 %v5422_v26  ;;  %v5301_v39 = vcombine.low %v454_v27, %v458_v28  ;;  %v387_v26 = vld [vmem:[%s6970_s12 + $0xa8] sm:$0xff] }
  0xce   : > { %v586_v30 = vld [vmem:[%s6970_s12 + $0x6e0] sm:$0xff]  ;;  %1964 = vmatpush1.bf16.msra.mxu1 %v5421_v32  ;;  %v511_v27 = vld [vmem:[%s6970_s12 + $0x488] sm:$0xff]  ;;  %v5232_v31 = vcombine.high %v383_v25, %v387_v26 }
  0xcf   : > { %v5430_v34 = vcombine.high %v582_v29, %v586_v30  ;;  %v462_v35 = vld [vmem:[%s6970_s12 + $0x300] sm:$0xff]  ;;  %1924 = vmatprep.subr.bf16.mxu0 %v5302_v33  ;;  %v5429_v40 = vcombine.low %v582_v29, %v586_v30  ;;  %v515_v28 = vld [vmem:[%s6970_s12 + $0x4a8] sm:$0xff]  ;;  %v5223_v29 = vcombine.low %v375_v15, %v379_v16  ;;  %v5351_v30 = vcombine.low %v503_v18, %v507_v19 }
  0xd0   : > { %v466_v36 = vld [vmem:[%s6970_s12 + $0x320] sm:$0xff]  ;;  %1925 = vmatpush1.bf16.msra.mxu0 %v5301_v39  ;;  %v5360_v32 = vcombine.high %v511_v27, %v515_v28  ;;  %v391_v33 = vld [vmem:[%s6970_s12 + $0xc8] sm:$0xff] }
  0xd1   : > { %v590_v37 = vld [vmem:[%s6970_s12 + $0x700] sm:$0xff]  ;;  %v5310_v41 = vcombine.high %v462_v35, %v466_v36  ;;  %1965 = vmatprep.subr.bf16.mxu1 %v5430_v34  ;;  %v5309_v47 = vcombine.low %v462_v35, %v466_v36  ;;  %v395_v34 = vld [vmem:[%s6970_s12 + $0xe8] sm:$0xff] }
  0xd2   : > { %v594_v38 = vld [vmem:[%s6970_s12 + $0x720] sm:$0xff]  ;;  %1966 = vmatpush1.bf16.msra.mxu1 %v5429_v40  ;;  %v519_v35 = vld [vmem:[%s6970_s12 + $0x4c8] sm:$0xff]  ;;  %v5240_v39 = vcombine.high %v391_v33, %v395_v34 }
  0xd3   : > { %v5438_v42 = vcombine.high %v590_v37, %v594_v38  ;;  %v470_v43 = vld [vmem:[%s6970_s12 + $0x340] sm:$0xff]  ;;  %1926 = vmatprep.subr.bf16.mxu0 %v5310_v41  ;;  %v5437_v48 = vcombine.low %v590_v37, %v594_v38  ;;  %v523_v36 = vld [vmem:[%s6970_s12 + $0x4e8] sm:$0xff]  ;;  %v5231_v37 = vcombine.low %v383_v25, %v387_v26  ;;  %v5359_v38 = vcombine.low %v511_v27, %v515_v28 }
  0xd4   : > { %v474_v44 = vld [vmem:[%s6970_s12 + $0x360] sm:$0xff]  ;;  %1927 = vmatpush1.bf16.msra.mxu0 %v5309_v47  ;;  %v5368_v40 = vcombine.high %v519_v35, %v523_v36  ;;  %v399_v41 = vld [vmem:[%s6970_s12 + $0x108] sm:$0xff] }
  0xd5   : > { %v598_v45 = vld [vmem:[%s6970_s12 + $0x740] sm:$0xff]  ;;  %v5318_v49 = vcombine.high %v470_v43, %v474_v44  ;;  %1967 = vmatprep.subr.bf16.mxu1 %v5438_v42  ;;  %v5317_v55 = vcombine.low %v470_v43, %v474_v44  ;;  %v403_v42 = vld [vmem:[%s6970_s12 + $0x128] sm:$0xff] }
  0xd6   : > { %v602_v46 = vld [vmem:[%s6970_s12 + $0x760] sm:$0xff]  ;;  %1968 = vmatpush1.bf16.msra.mxu1 %v5437_v48  ;;  %v527_v43 = vld [vmem:[%s6970_s12 + $0x508] sm:$0xff]  ;;  %v5248_v47 = vcombine.high %v399_v41, %v403_v42 }
  0xd7   : > { %v5446_v50 = vcombine.high %v598_v45, %v602_v46  ;;  %v478_v51 = vld [vmem:[%s6970_s12 + $0x380] sm:$0xff]  ;;  %1928 = vmatprep.subr.bf16.mxu0 %v5318_v49  ;;  %v5445_v56 = vcombine.low %v598_v45, %v602_v46  ;;  %v531_v44 = vld [vmem:[%s6970_s12 + $0x528] sm:$0xff]  ;;  %v5239_v45 = vcombine.low %v391_v33, %v395_v34  ;;  %v5367_v46 = vcombine.low %v519_v35, %v523_v36 }
  0xd8   : > { %v482_v52 = vld [vmem:[%s6970_s12 + $0x3a0] sm:$0xff]  ;;  %1929 = vmatpush1.bf16.msra.mxu0 %v5317_v55  ;;  %v5376_v48 = vcombine.high %v527_v43, %v531_v44  ;;  %v407_v49 = vld [vmem:[%s6970_s12 + $0x148] sm:$0xff] }
  0xd9   : > { %v606_v53 = vld [vmem:[%s6970_s12 + $0x780] sm:$0xff]  ;;  %v5326_v57 = vcombine.high %v478_v51, %v482_v52  ;;  %1969 = vmatprep.subr.bf16.mxu1 %v5446_v50  ;;  %v5325_v1 = vcombine.low %v478_v51, %v482_v52  ;;  %v411_v50 = vld [vmem:[%s6970_s12 + $0x168] sm:$0xff] }
  0xda   : > { %v610_v54 = vld [vmem:[%s6970_s12 + $0x7a0] sm:$0xff]  ;;  %1970 = vmatpush1.bf16.msra.mxu1 %v5445_v56  ;;  %v535_v51 = vld [vmem:[%s6970_s12 + $0x548] sm:$0xff]  ;;  %v5256_v55 = vcombine.high %v407_v49, %v411_v50 }
  0xdb   : > { %v5454_v58 = vcombine.high %v606_v53, %v610_v54  ;;  %v486_v61 = vld [vmem:[%s6970_s12 + $0x3c0] sm:$0xff]  ;;  %1930 = vmatprep.subr.bf16.mxu0 %v5326_v57  ;;  %v5453_v2 = vcombine.low %v606_v53, %v610_v54  ;;  %v539_v52 = vld [vmem:[%s6970_s12 + $0x568] sm:$0xff]  ;;  %v5247_v53 = vcombine.low %v399_v41, %v403_v42  ;;  %v5375_v54 = vcombine.low %v527_v43, %v531_v44 }
  0xdc   : > { %v490_v62 = vld [vmem:[%s6970_s12 + $0x3e0] sm:$0xff]  ;;  %1931 = vmatpush1.bf16.msra.mxu0 %v5325_v1  ;;  %v5384_v56 = vcombine.high %v535_v51, %v539_v52  ;;  %v415_v57 = vld [vmem:[%s6970_s12 + $0x188] sm:$0xff] }
  0xdd   : > { %v614_v63 = vld [vmem:[%s6970_s12 + $0x7c0] sm:$0xff]  ;;  %v5334_v3 = vcombine.high %v486_v61, %v490_v62  ;;  %1971 = vmatprep.subr.bf16.mxu1 %v5454_v58  ;;  %v5333_v9 = vcombine.low %v486_v61, %v490_v62  ;;  %v419_v58 = vld [vmem:[%s6970_s12 + $0x1a8] sm:$0xff] }
  0xde   : > { %v618_v0 = vld [vmem:[%s6970_s12 + $0x7e0] sm:$0xff]  ;;  %1972 = vmatpush1.bf16.msra.mxu1 %v5453_v2  ;;  %v543_v61 = vld [vmem:[%s6970_s12 + $0x588] sm:$0xff]  ;;  %v5264_v1 = vcombine.high %v415_v57, %v419_v58  ;;  %v5263_v7 = vcombine.low %v415_v57, %v419_v58 }
  0xdf   : > { %v5462_v4 = vcombine.high %v614_v63, %v618_v0  ;;  %v358_v10 = vld [vmem:[%s6988_s10] sm:$0xff]  ;;  %1932 = vmatprep.subr.bf16.mxu0 %v5334_v3  ;;  %v5461_v11 = vcombine.low %v614_v63, %v618_v0  ;;  %v547_v62 = vld [vmem:[%s6970_s12 + $0x5a8] sm:$0xff]  ;;  %v5255_v63 = vcombine.low %v407_v49, %v411_v50  ;;  %v5383_v0 = vcombine.low %v535_v51, %v539_v52 }
  0xe0   : > { %v7072_v17 = vpack.c.bf16 %v358_v10, %v358_v10  ;;  %1933 = vmatpush1.bf16.msra.mxu0 %v5333_v9  ;;  %v5392_v2 = vcombine.high %v543_v61, %v547_v62  ;;  %v423_v3 = vld [vmem:[%s6970_s12 + $0x1c8] sm:$0xff]  ;;  %v5391_v8 = vcombine.low %v543_v61, %v547_v62 }
  0xe1   : > { %1973 = vmatprep.subr.bf16.mxu1 %v5462_v4  ;;  %1984 = vmatprep.subr.bf16.mxu0 %v5216_v13  ;;  %v427_v4 = vld [vmem:[%s6970_s12 + $0x1e8] sm:$0xff] }
  0xe2   : > { %1974 = vmatpush1.bf16.msra.mxu1 %v5461_v11  ;;  %v555_v6 = vld [vmem:[%s6970_s12 + $0x5e8] sm:$0xff]  ;;  %v5272_v9 = vcombine.high %v423_v3, %v427_v4  ;;  %v5271_v15 = vcombine.low %v423_v3, %v427_v4 }
  0xe3   : > { %2025 = vmatprep.subr.bf16.mxu1 %v5344_v14  ;;  %1935 = vmatmul.mubr.bf16.vlgmr.msra.gmra.mrb[0].mxu0 %v7072_v17  ;;  %v5400_v10 = vcombine.high %v551_v5, %v555_v6  ;;  %v431_v11 = vld [vmem:[%s6970_s12 + $0x208] sm:$0xff]  ;;  %v5399_v16 = vcombine.low %v551_v5, %v555_v6 }
  0xe4   : > { %1985 = vmatpush1.bf16.msra.mxu0 %v5215_v21  ;;  %2016 = vmatprep.mubr.bf16.mxu0 %v7024_v59  ;;  %v435_v12 = vld [vmem:[%s6970_s12 + $0x228] sm:$0xff] }
  0xe5   : > { %1976 = vmatmul.mubr.bf16.vlgmr.msra.gmra.mrb[0].mxu1 %v7076_v20  ;;  %1986 = vmatprep.subr.bf16.mxu0 %v5224_v23  ;;  %v559_v13 = vld [vmem:[%s6970_s12 + $0x608] sm:$0xff]  ;;  %v5280_v18 = vcombine.high %v431_v11, %v435_v12  ;;  %v5279_v25 = vcombine.low %v431_v11, %v435_v12 }
  0xe6   : > { %2026 = vmatpush1.bf16.msra.mxu1 %v5343_v22  ;;  %2057 = vmatprep.mubr.bf16.mxu1 %v7026_v60  ;;  %v563_v14 = vld [vmem:[%s6970_s12 + $0x628] sm:$0xff] }
  0xe7   : > { %2027 = vmatprep.subr.bf16.mxu1 %v5352_v24  ;;  %v5408_v19 = vcombine.high %v559_v13, %v563_v14  ;;  %v439_v21 = vld [vmem:[%s6970_s12 + $0x248] sm:$0xff]  ;;  %v5407_v26 = vcombine.low %v559_v13, %v563_v14 }
  0xe8   : > { %1987 = vmatpush1.bf16.msra.mxu0 %v5223_v29  ;;  %v443_v22 = vld [vmem:[%s6970_s12 + $0x268] sm:$0xff] }
  0xe9   : > { %1988 = vmatprep.subr.bf16.mxu0 %v5232_v31  ;;  %v567_v23 = vld [vmem:[%s6970_s12 + $0x648] sm:$0xff]  ;;  %v5288_v27 = vcombine.high %v439_v21, %v443_v22  ;;  %v5287_v33 = vcombine.low %v439_v21, %v443_v22 }
  0xea   : > { %2028 = vmatpush1.bf16.msra.mxu1 %v5351_v30  ;;  %v571_v24 = vld [vmem:[%s6970_s12 + $0x668] sm:$0xff] }
  0xeb   : > { %2029 = vmatprep.subr.bf16.mxu1 %v5360_v32  ;;  %v5416_v28 = vcombine.high %v567_v23, %v571_v24  ;;  %v447_v29 = vld [vmem:[%s6970_s12 + $0x288] sm:$0xff]  ;;  %v5415_v34 = vcombine.low %v567_v23, %v571_v24 }
  0xec   : > { %1989 = vmatpush1.bf16.msra.mxu0 %v5231_v37  ;;  %v451_v30 = vld [vmem:[%s6970_s12 + $0x2a8] sm:$0xff] }
  0xed   : > { %1990 = vmatprep.subr.bf16.mxu0 %v5240_v39  ;;  %v575_v31 = vld [vmem:[%s6970_s12 + $0x688] sm:$0xff]  ;;  %v5296_v35 = vcombine.high %v447_v29, %v451_v30  ;;  %v5295_v41 = vcombine.low %v447_v29, %v451_v30 }
  0xee   : > { %2030 = vmatpush1.bf16.msra.mxu1 %v5359_v38  ;;  %v579_v32 = vld [vmem:[%s6970_s12 + $0x6a8] sm:$0xff] }
  0xef   : > { %2031 = vmatprep.subr.bf16.mxu1 %v5368_v40  ;;  %v5424_v36 = vcombine.high %v575_v31, %v579_v32  ;;  %v455_v37 = vld [vmem:[%s6970_s12 + $0x2c8] sm:$0xff]  ;;  %v5423_v42 = vcombine.low %v575_v31, %v579_v32 }
  0xf0   : > { %1991 = vmatpush1.bf16.msra.mxu0 %v5239_v45  ;;  %v459_v38 = vld [vmem:[%s6970_s12 + $0x2e8] sm:$0xff] }
  0xf1   : > { %1992 = vmatprep.subr.bf16.mxu0 %v5248_v47  ;;  %v583_v39 = vld [vmem:[%s6970_s12 + $0x6c8] sm:$0xff]  ;;  %v5304_v43 = vcombine.high %v455_v37, %v459_v38  ;;  %v5303_v49 = vcombine.low %v455_v37, %v459_v38 }
  0xf2   : > { %2032 = vmatpush1.bf16.msra.mxu1 %v5367_v46  ;;  %v587_v40 = vld [vmem:[%s6970_s12 + $0x6e8] sm:$0xff] }
  0xf3   : > { %2033 = vmatprep.subr.bf16.mxu1 %v5376_v48  ;;  %v5432_v44 = vcombine.high %v583_v39, %v587_v40  ;;  %v463_v45 = vld [vmem:[%s6970_s12 + $0x308] sm:$0xff]  ;;  %v5431_v50 = vcombine.low %v583_v39, %v587_v40 }
  0xf4   : > { %1993 = vmatpush1.bf16.msra.mxu0 %v5247_v53  ;;  %v467_v46 = vld [vmem:[%s6970_s12 + $0x328] sm:$0xff] }
  0xf5   : > { %1994 = vmatprep.subr.bf16.mxu0 %v5256_v55  ;;  %v591_v47 = vld [vmem:[%s6970_s12 + $0x708] sm:$0xff]  ;;  %v5312_v51 = vcombine.high %v463_v45, %v467_v46  ;;  %v5311_v57 = vcombine.low %v463_v45, %v467_v46 }
  0xf6   : > { %2034 = vmatpush1.bf16.msra.mxu1 %v5375_v54  ;;  %v595_v48 = vld [vmem:[%s6970_s12 + $0x728] sm:$0xff] }
  0xf7   : > { %2035 = vmatprep.subr.bf16.mxu1 %v5384_v56  ;;  %v5440_v52 = vcombine.high %v591_v47, %v595_v48  ;;  %v471_v53 = vld [vmem:[%s6970_s12 + $0x348] sm:$0xff]  ;;  %v5439_v58 = vcombine.low %v591_v47, %v595_v48 }
  0xf8   : > { %1995 = vmatpush1.bf16.msra.mxu0 %v5255_v63  ;;  %v475_v54 = vld [vmem:[%s6970_s12 + $0x368] sm:$0xff] }
  0xf9   : > { %1996 = vmatprep.subr.bf16.mxu0 %v5264_v1  ;;  %v599_v55 = vld [vmem:[%s6970_s12 + $0x748] sm:$0xff]  ;;  %v5320_v61 = vcombine.high %v471_v53, %v475_v54  ;;  %v5319_v3 = vcombine.low %v471_v53, %v475_v54 }
  0xfa   : > { %2036 = vmatpush1.bf16.msra.mxu1 %v5383_v0  ;;  %v603_v56 = vld [vmem:[%s6970_s12 + $0x768] sm:$0xff] }
  0xfb   : > { %2037 = vmatprep.subr.bf16.mxu1 %v5392_v2  ;;  %v5448_v62 = vcombine.high %v599_v55, %v603_v56  ;;  %v479_v63 = vld [vmem:[%s6970_s12 + $0x388] sm:$0xff]  ;;  %v5447_v4 = vcombine.low %v599_v55, %v603_v56 }
  0xfc   : > { %1997 = vmatpush1.bf16.msra.mxu0 %v5263_v7  ;;  %v483_v0 = vld [vmem:[%s6970_s12 + $0x3a8] sm:$0xff] }
  0xfd   : > { %1998 = vmatprep.subr.bf16.mxu0 %v5272_v9  ;;  %v607_v1 = vld [vmem:[%s6970_s12 + $0x788] sm:$0xff]  ;;  %v5328_v5 = vcombine.high %v479_v63, %v483_v0  ;;  %v5327_v11 = vcombine.low %v479_v63, %v483_v0 }
  0xfe   : > { %2038 = vmatpush1.bf16.msra.mxu1 %v5391_v8  ;;  %v611_v2 = vld [vmem:[%s6970_s12 + $0x7a8] sm:$0xff] }
  0xff   : > { %2039 = vmatprep.subr.bf16.mxu1 %v5400_v10  ;;  %v5456_v6 = vcombine.high %v607_v1, %v611_v2  ;;  %v487_v7 = vld [vmem:[%s6970_s12 + $0x3c8] sm:$0xff]  ;;  %v5455_v12 = vcombine.low %v607_v1, %v611_v2 }
 0x100   : > { %1999 = vmatpush1.bf16.msra.mxu0 %v5271_v15  ;;  %v491_v8 = vld [vmem:[%s6970_s12 + $0x3e8] sm:$0xff]  ;;  %v368_v15 = vld [vmem:[%s6970_s12 + $0x10] sm:$0xff] }
 0x101   : > { %2000 = vmatprep.subr.bf16.mxu0 %v5280_v18  ;;  %v615_v9 = vld [vmem:[%s6970_s12 + $0x7c8] sm:$0xff]  ;;  %v5336_v13 = vcombine.high %v487_v7, %v491_v8  ;;  %v496_v18 = vld [vmem:[%s6970_s12 + $0x410] sm:$0xff]  ;;  %v5335_v21 = vcombine.low %v487_v7, %v491_v8 }
 0x102   : > { %2040 = vmatpush1.bf16.msra.mxu1 %v5399_v16  ;;  %v619_v10 = vld [vmem:[%s6970_s12 + $0x7e8] sm:$0xff]  ;;  %v372_v16 = vld [vmem:[%s6970_s12 + $0x30] sm:$0xff] }
 0x103   : > { %2041 = vmatprep.subr.bf16.mxu1 %v5408_v19  ;;  %v5464_v14 = vcombine.high %v615_v9, %v619_v10  ;;  %v500_v19 = vld [vmem:[%s6970_s12 + $0x430] sm:$0xff]  ;;  %v5463_v22 = vcombine.low %v615_v9, %v619_v10  ;;  %v5218_v23 = vcombine.high %v368_v15, %v372_v16  ;;  %v5217_v29 = vcombine.low %v368_v15, %v372_v16 }
 0x104   : > { %2001 = vmatpush1.bf16.msra.mxu0 %v5279_v25  ;;  %v5346_v24 = vcombine.high %v496_v18, %v500_v19  ;;  %v376_v25 = vld [vmem:[%s6970_s12 + $0x50] sm:$0xff]  ;;  %v5345_v30 = vcombine.low %v496_v18, %v500_v19 }
 0x105   : > { %2002 = vmatprep.subr.bf16.mxu0 %v5288_v27  ;;  %v504_v27 = vld [vmem:[%s6970_s12 + $0x450] sm:$0xff] }
 0x106   : > { %2042 = vmatpush1.bf16.msra.mxu1 %v5407_v26  ;;  %v380_v26 = vld [vmem:[%s6970_s12 + $0x70] sm:$0xff] }
 0x107   : > { %2043 = vmatprep.subr.bf16.mxu1 %v5416_v28  ;;  %v508_v28 = vld [vmem:[%s6970_s12 + $0x470] sm:$0xff]  ;;  %v5226_v31 = vcombine.high %v376_v25, %v380_v26  ;;  %v5225_v37 = vcombine.low %v376_v25, %v380_v26 }
 0x108   : > { %2003 = vmatpush1.bf16.msra.mxu0 %v5287_v33  ;;  %v5354_v32 = vcombine.high %v504_v27, %v508_v28  ;;  %v384_v33 = vld [vmem:[%s6970_s12 + $0x90] sm:$0xff]  ;;  %v5353_v38 = vcombine.low %v504_v27, %v508_v28 }
 0x109   : > { %2004 = vmatprep.subr.bf16.mxu0 %v5296_v35  ;;  %v512_v35 = vld [vmem:[%s6970_s12 + $0x490] sm:$0xff] }
 0x10a   : > { %2044 = vmatpush1.bf16.msra.mxu1 %v5415_v34  ;;  %v388_v34 = vld [vmem:[%s6970_s12 + $0xb0] sm:$0xff] }
 0x10b   : > { %2045 = vmatprep.subr.bf16.mxu1 %v5424_v36  ;;  %v516_v36 = vld [vmem:[%s6970_s12 + $0x4b0] sm:$0xff]  ;;  %v5234_v39 = vcombine.high %v384_v33, %v388_v34  ;;  %v5233_v45 = vcombine.low %v384_v33, %v388_v34 }
 0x10c   : > { %2005 = vmatpush1.bf16.msra.mxu0 %v5295_v41  ;;  %v5362_v40 = vcombine.high %v512_v35, %v516_v36  ;;  %v392_v41 = vld [vmem:[%s6970_s12 + $0xd0] sm:$0xff]  ;;  %v5361_v46 = vcombine.low %v512_v35, %v516_v36 }
 0x10d   : > { %2006 = vmatprep.subr.bf16.mxu0 %v5304_v43  ;;  %v520_v43 = vld [vmem:[%s6970_s12 + $0x4d0] sm:$0xff] }
 0x10e   : > { %2046 = vmatpush1.bf16.msra.mxu1 %v5423_v42  ;;  %v396_v42 = vld [vmem:[%s6970_s12 + $0xf0] sm:$0xff] }
 0x10f   : > { %2047 = vmatprep.subr.bf16.mxu1 %v5432_v44  ;;  %v524_v44 = vld [vmem:[%s6970_s12 + $0x4f0] sm:$0xff]  ;;  %v5242_v47 = vcombine.high %v392_v41, %v396_v42  ;;  %v5241_v53 = vcombine.low %v392_v41, %v396_v42 }
 0x110   : > { %2007 = vmatpush1.bf16.msra.mxu0 %v5303_v49  ;;  %v5370_v48 = vcombine.high %v520_v43, %v524_v44  ;;  %v400_v49 = vld [vmem:[%s6970_s12 + $0x110] sm:$0xff]  ;;  %v5369_v54 = vcombine.low %v520_v43, %v524_v44 }
 0x111   : > { %2008 = vmatprep.subr.bf16.mxu0 %v5312_v51  ;;  %v528_v51 = vld [vmem:[%s6970_s12 + $0x510] sm:$0xff] }
 0x112   : > { %2048 = vmatpush1.bf16.msra.mxu1 %v5431_v50  ;;  %v404_v50 = vld [vmem:[%s6970_s12 + $0x130] sm:$0xff] }
 0x113   : > { %2049 = vmatprep.subr.bf16.mxu1 %v5440_v52  ;;  %v532_v52 = vld [vmem:[%s6970_s12 + $0x530] sm:$0xff]  ;;  %v5250_v55 = vcombine.high %v400_v49, %v404_v50  ;;  %v5249_v63 = vcombine.low %v400_v49, %v404_v50 }
 0x114   : > { %2009 = vmatpush1.bf16.msra.mxu0 %v5311_v57  ;;  %v5378_v56 = vcombine.high %v528_v51, %v532_v52  ;;  %v408_v57 = vld [vmem:[%s6970_s12 + $0x150] sm:$0xff]  ;;  %v5377_v0 = vcombine.low %v528_v51, %v532_v52 }
 0x115   : > { %2010 = vmatprep.subr.bf16.mxu0 %v5320_v61  ;;  %v536_v61 = vld [vmem:[%s6970_s12 + $0x550] sm:$0xff] }
 0x116   : > { %2050 = vmatpush1.bf16.msra.mxu1 %v5439_v58  ;;  %v412_v58 = vld [vmem:[%s6970_s12 + $0x170] sm:$0xff] }
 0x117   : > { %2051 = vmatprep.subr.bf16.mxu1 %v5448_v62  ;;  %v540_v62 = vld [vmem:[%s6970_s12 + $0x570] sm:$0xff]  ;;  %v5258_v1 = vcombine.high %v408_v57, %v412_v58  ;;  %v5257_v7 = vcombine.low %v408_v57, %v412_v58 }
 0x118   : > { %2011 = vmatpush1.bf16.msra.mxu0 %v5319_v3  ;;  %v5386_v2 = vcombine.high %v536_v61, %v540_v62  ;;  %v416_v3 = vld [vmem:[%s6970_s12 + $0x190] sm:$0xff]  ;;  %v5385_v8 = vcombine.low %v536_v61, %v540_v62 }
 0x119   : > { %2012 = vmatprep.subr.bf16.mxu0 %v5328_v5  ;;  %v544_v5 = vld [vmem:[%s6970_s12 + $0x590] sm:$0xff] }
 0x11a   : > { %2052 = vmatpush1.bf16.msra.mxu1 %v5447_v4  ;;  %v420_v4 = vld [vmem:[%s6970_s12 + $0x1b0] sm:$0xff] }
 0x11b   : > { %2053 = vmatprep.subr.bf16.mxu1 %v5456_v6  ;;  %v548_v6 = vld [vmem:[%s6970_s12 + $0x5b0] sm:$0xff]  ;;  %v5266_v9 = vcombine.high %v416_v3, %v420_v4  ;;  %v5265_v15 = vcombine.low %v416_v3, %v420_v4 }
 0x11c   : > { %2013 = vmatpush1.bf16.msra.mxu0 %v5327_v11  ;;  %v5394_v10 = vcombine.high %v544_v5, %v548_v6  ;;  %v424_v11 = vld [vmem:[%s6970_s12 + $0x1d0] sm:$0xff]  ;;  %v5393_v16 = vcombine.low %v544_v5, %v548_v6 }
 0x11d   : > { %2014 = vmatprep.subr.bf16.mxu0 %v5336_v13  ;;  %v552_v13 = vld [vmem:[%s6970_s12 + $0x5d0] sm:$0xff] }
 0x11e   : > { %2054 = vmatpush1.bf16.msra.mxu1 %v5455_v12  ;;  %v428_v12 = vld [vmem:[%s6970_s12 + $0x1f0] sm:$0xff] }
 0x11f   : > { %2055 = vmatprep.subr.bf16.mxu1 %v5464_v14  ;;  %v556_v14 = vld [vmem:[%s6970_s12 + $0x5f0] sm:$0xff]  ;;  %v5274_v18 = vcombine.high %v424_v11, %v428_v12  ;;  %v5273_v25 = vcombine.low %v424_v11, %v428_v12 }
 0x120   : > { %2015 = vmatpush1.bf16.msra.mxu0 %v5335_v21  ;;  %v5402_v19 = vcombine.high %v552_v13, %v556_v14  ;;  %v432_v21 = vld [vmem:[%s6970_s12 + $0x210] sm:$0xff]  ;;  %v5401_v26 = vcombine.low %v552_v13, %v556_v14 }
 0x121   : > { %2066 = vmatprep.subr.bf16.mxu0 %v5218_v23  ;;  %v560_v23 = vld [vmem:[%s6970_s12 + $0x610] sm:$0xff] }
 0x122   : > { %2056 = vmatpush1.bf16.msra.mxu1 %v5463_v22  ;;  %v436_v22 = vld [vmem:[%s6970_s12 + $0x230] sm:$0xff] }
 0x123   : > { %2107 = vmatprep.subr.bf16.mxu1 %v5346_v24  ;;  %2017 = vmatmul.mubr.bf16.vlgmr.msra.gmra.mrb[4].mxu0 %v7072_v17  ;;  %v564_v24 = vld [vmem:[%s6970_s12 + $0x630] sm:$0xff]  ;;  %v5282_v27 = vcombine.high %v432_v21, %v436_v22  ;;  %v5281_v33 = vcombine.low %v432_v21, %v436_v22 }
 0x124   : > { %2067 = vmatpush1.bf16.msra.mxu0 %v5217_v29  ;;  %2098 = vmatprep.mubr.bf16.mxu0 %v7024_v59  ;;  %v5410_v28 = vcombine.high %v560_v23, %v564_v24  ;;  %v440_v29 = vld [vmem:[%s6970_s12 + $0x250] sm:$0xff]  ;;  %v5409_v34 = vcombine.low %v560_v23, %v564_v24 }
 0x125   : > { %2058 = vmatmul.mubr.bf16.vlgmr.msra.gmra.mrb[4].mxu1 %v7076_v20  ;;  %2068 = vmatprep.subr.bf16.mxu0 %v5226_v31  ;;  %v568_v31 = vld [vmem:[%s6970_s12 + $0x650] sm:$0xff] }
 0x126   : > { %2108 = vmatpush1.bf16.msra.mxu1 %v5345_v30  ;;  %2139 = vmatprep.mubr.bf16.mxu1 %v7026_v60  ;;  %v444_v30 = vld [vmem:[%s6970_s12 + $0x270] sm:$0xff] }
 0x127   : > { %2109 = vmatprep.subr.bf16.mxu1 %v5354_v32  ;;  %v572_v32 = vld [vmem:[%s6970_s12 + $0x670] sm:$0xff]  ;;  %v5290_v35 = vcombine.high %v440_v29, %v444_v30  ;;  %v5289_v41 = vcombine.low %v440_v29, %v444_v30 }
 0x128   : > { %2069 = vmatpush1.bf16.msra.mxu0 %v5225_v37  ;;  %v5418_v36 = vcombine.high %v568_v31, %v572_v32  ;;  %v448_v37 = vld [vmem:[%s6970_s12 + $0x290] sm:$0xff]  ;;  %v5417_v42 = vcombine.low %v568_v31, %v572_v32 }
 0x129   : > { %2070 = vmatprep.subr.bf16.mxu0 %v5234_v39  ;;  %v576_v39 = vld [vmem:[%s6970_s12 + $0x690] sm:$0xff] }
 0x12a   : > { %2110 = vmatpush1.bf16.msra.mxu1 %v5353_v38  ;;  %v452_v38 = vld [vmem:[%s6970_s12 + $0x2b0] sm:$0xff] }
 0x12b   : > { %2111 = vmatprep.subr.bf16.mxu1 %v5362_v40  ;;  %v580_v40 = vld [vmem:[%s6970_s12 + $0x6b0] sm:$0xff]  ;;  %v5298_v43 = vcombine.high %v448_v37, %v452_v38  ;;  %v5297_v49 = vcombine.low %v448_v37, %v452_v38 }
 0x12c   : > { %2071 = vmatpush1.bf16.msra.mxu0 %v5233_v45  ;;  %v5426_v44 = vcombine.high %v576_v39, %v580_v40  ;;  %v456_v45 = vld [vmem:[%s6970_s12 + $0x2d0] sm:$0xff]  ;;  %v5425_v50 = vcombine.low %v576_v39, %v580_v40 }
 0x12d   : > { %2072 = vmatprep.subr.bf16.mxu0 %v5242_v47  ;;  %v584_v47 = vld [vmem:[%s6970_s12 + $0x6d0] sm:$0xff] }
 0x12e   : > { %2112 = vmatpush1.bf16.msra.mxu1 %v5361_v46  ;;  %v460_v46 = vld [vmem:[%s6970_s12 + $0x2f0] sm:$0xff] }
 0x12f   : > { %2113 = vmatprep.subr.bf16.mxu1 %v5370_v48  ;;  %v588_v48 = vld [vmem:[%s6970_s12 + $0x6f0] sm:$0xff]  ;;  %v5306_v51 = vcombine.high %v456_v45, %v460_v46  ;;  %v5305_v57 = vcombine.low %v456_v45, %v460_v46 }
 0x130   : > { %2073 = vmatpush1.bf16.msra.mxu0 %v5241_v53  ;;  %v5434_v52 = vcombine.high %v584_v47, %v588_v48  ;;  %v464_v53 = vld [vmem:[%s6970_s12 + $0x310] sm:$0xff]  ;;  %v5433_v58 = vcombine.low %v584_v47, %v588_v48 }
 0x131   : > { %2074 = vmatprep.subr.bf16.mxu0 %v5250_v55  ;;  %v592_v55 = vld [vmem:[%s6970_s12 + $0x710] sm:$0xff] }
 0x132   : > { %2114 = vmatpush1.bf16.msra.mxu1 %v5369_v54  ;;  %v468_v54 = vld [vmem:[%s6970_s12 + $0x330] sm:$0xff] }
 0x133   : > { %2115 = vmatprep.subr.bf16.mxu1 %v5378_v56  ;;  %v596_v56 = vld [vmem:[%s6970_s12 + $0x730] sm:$0xff]  ;;  %v5314_v61 = vcombine.high %v464_v53, %v468_v54  ;;  %v5313_v3 = vcombine.low %v464_v53, %v468_v54 }
 0x134   : > { %2075 = vmatpush1.bf16.msra.mxu0 %v5249_v63  ;;  %v5442_v62 = vcombine.high %v592_v55, %v596_v56  ;;  %v472_v63 = vld [vmem:[%s6970_s12 + $0x350] sm:$0xff]  ;;  %v5441_v4 = vcombine.low %v592_v55, %v596_v56 }
 0x135   : > { %2076 = vmatprep.subr.bf16.mxu0 %v5258_v1  ;;  %v600_v1 = vld [vmem:[%s6970_s12 + $0x750] sm:$0xff] }
 0x136   : > { %2116 = vmatpush1.bf16.msra.mxu1 %v5377_v0  ;;  %v476_v0 = vld [vmem:[%s6970_s12 + $0x370] sm:$0xff] }
 0x137   : > { %2117 = vmatprep.subr.bf16.mxu1 %v5386_v2  ;;  %v604_v2 = vld [vmem:[%s6970_s12 + $0x770] sm:$0xff]  ;;  %v5322_v5 = vcombine.high %v472_v63, %v476_v0  ;;  %v5321_v11 = vcombine.low %v472_v63, %v476_v0 }
 0x138   : > { %2077 = vmatpush1.bf16.msra.mxu0 %v5257_v7  ;;  %v5450_v6 = vcombine.high %v600_v1, %v604_v2  ;;  %v480_v7 = vld [vmem:[%s6970_s12 + $0x390] sm:$0xff]  ;;  %v5449_v12 = vcombine.low %v600_v1, %v604_v2  ;;  %v409_v1 = vld [vmem:[%s6970_s12 + $0x158] sm:$0xff] }
 0x139   : > { %2078 = vmatprep.subr.bf16.mxu0 %v5266_v9  ;;  %v608_v9 = vld [vmem:[%s6970_s12 + $0x790] sm:$0xff]  ;;  %v413_v2 = vld [vmem:[%s6970_s12 + $0x178] sm:$0xff] }
 0x13a   : > { %2118 = vmatpush1.bf16.msra.mxu1 %v5385_v8  ;;  %v484_v8 = vld [vmem:[%s6970_s12 + $0x3b0] sm:$0xff] }
 0x13b   : > { %2119 = vmatprep.subr.bf16.mxu1 %v5394_v10  ;;  %v612_v10 = vld [vmem:[%s6970_s12 + $0x7b0] sm:$0xff]  ;;  %v5330_v13 = vcombine.high %v480_v7, %v484_v8  ;;  %v5329_v21 = vcombine.low %v480_v7, %v484_v8  ;;  %v5260_v7 = vcombine.high %v409_v1, %v413_v2 }
 0x13c   : > { %2079 = vmatpush1.bf16.msra.mxu0 %v5265_v15  ;;  %v5458_v14 = vcombine.high %v608_v9, %v612_v10  ;;  %v488_v15 = vld [vmem:[%s6970_s12 + $0x3d0] sm:$0xff]  ;;  %v5457_v22 = vcombine.low %v608_v9, %v612_v10  ;;  %v417_v9 = vld [vmem:[%s6970_s12 + $0x198] sm:$0xff] }
 0x13d   : > { %2080 = vmatprep.subr.bf16.mxu0 %v5274_v18  ;;  %v616_v18 = vld [vmem:[%s6970_s12 + $0x7d0] sm:$0xff]  ;;  %v421_v10 = vld [vmem:[%s6970_s12 + $0x1b8] sm:$0xff] }
 0x13e   : > { %2120 = vmatpush1.bf16.msra.mxu1 %v5393_v16  ;;  %v492_v16 = vld [vmem:[%s6970_s12 + $0x3f0] sm:$0xff] }
 0x13f   : > { %2121 = vmatprep.subr.bf16.mxu1 %v5402_v19  ;;  %v620_v19 = vld [vmem:[%s6970_s12 + $0x7f0] sm:$0xff]  ;;  %v5338_v23 = vcombine.high %v488_v15, %v492_v16  ;;  %v5337_v29 = vcombine.low %v488_v15, %v492_v16  ;;  %v5268_v15 = vcombine.high %v417_v9, %v421_v10 }
 0x140   : > { %2081 = vmatpush1.bf16.msra.mxu0 %v5273_v25  ;;  %v5466_v24 = vcombine.high %v616_v18, %v620_v19  ;;  %v369_v25 = vld [vmem:[%s6970_s12 + $0x18] sm:$0xff]  ;;  %v5465_v30 = vcombine.low %v616_v18, %v620_v19 }
 0x141   : > { %2082 = vmatprep.subr.bf16.mxu0 %v5282_v27  ;;  %v497_v27 = vld [vmem:[%s6970_s12 + $0x418] sm:$0xff] }
 0x142   : > { %2122 = vmatpush1.bf16.msra.mxu1 %v5401_v26  ;;  %v373_v26 = vld [vmem:[%s6970_s12 + $0x38] sm:$0xff] }
 0x143   : > { %2123 = vmatprep.subr.bf16.mxu1 %v5410_v28  ;;  %v501_v28 = vld [vmem:[%s6970_s12 + $0x438] sm:$0xff]  ;;  %v5220_v31 = vcombine.high %v369_v25, %v373_v26  ;;  %v5219_v37 = vcombine.low %v369_v25, %v373_v26 }
 0x144   : > { %2083 = vmatpush1.bf16.msra.mxu0 %v5281_v33  ;;  %v5348_v32 = vcombine.high %v497_v27, %v501_v28  ;;  %v377_v33 = vld [vmem:[%s6970_s12 + $0x58] sm:$0xff]  ;;  %v5347_v38 = vcombine.low %v497_v27, %v501_v28 }
 0x145   : > { %2084 = vmatprep.subr.bf16.mxu0 %v5290_v35  ;;  %v505_v35 = vld [vmem:[%s6970_s12 + $0x458] sm:$0xff] }
 0x146   : > { %2124 = vmatpush1.bf16.msra.mxu1 %v5409_v34  ;;  %v381_v34 = vld [vmem:[%s6970_s12 + $0x78] sm:$0xff] }
 0x147   : > { %2125 = vmatprep.subr.bf16.mxu1 %v5418_v36  ;;  %v509_v36 = vld [vmem:[%s6970_s12 + $0x478] sm:$0xff]  ;;  %v5228_v39 = vcombine.high %v377_v33, %v381_v34  ;;  %v5227_v45 = vcombine.low %v377_v33, %v381_v34 }
 0x148   : > { %2085 = vmatpush1.bf16.msra.mxu0 %v5289_v41  ;;  %v5356_v40 = vcombine.high %v505_v35, %v509_v36  ;;  %v385_v41 = vld [vmem:[%s6970_s12 + $0x98] sm:$0xff]  ;;  %v5355_v46 = vcombine.low %v505_v35, %v509_v36 }
 0x149   : > { %2086 = vmatprep.subr.bf16.mxu0 %v5298_v43  ;;  %v513_v43 = vld [vmem:[%s6970_s12 + $0x498] sm:$0xff] }
 0x14a   : > { %2126 = vmatpush1.bf16.msra.mxu1 %v5417_v42  ;;  %v389_v42 = vld [vmem:[%s6970_s12 + $0xb8] sm:$0xff] }
 0x14b   : > { %2127 = vmatprep.subr.bf16.mxu1 %v5426_v44  ;;  %v517_v44 = vld [vmem:[%s6970_s12 + $0x4b8] sm:$0xff]  ;;  %v5236_v47 = vcombine.high %v385_v41, %v389_v42  ;;  %v5235_v53 = vcombine.low %v385_v41, %v389_v42 }
 0x14c   : > { %2087 = vmatpush1.bf16.msra.mxu0 %v5297_v49  ;;  %v5364_v48 = vcombine.high %v513_v43, %v517_v44  ;;  %v393_v49 = vld [vmem:[%s6970_s12 + $0xd8] sm:$0xff]  ;;  %v5363_v54 = vcombine.low %v513_v43, %v517_v44 }
 0x14d   : > { %2088 = vmatprep.subr.bf16.mxu0 %v5306_v51  ;;  %v521_v51 = vld [vmem:[%s6970_s12 + $0x4d8] sm:$0xff] }
 0x14e   : > { %2128 = vmatpush1.bf16.msra.mxu1 %v5425_v50  ;;  %v397_v50 = vld [vmem:[%s6970_s12 + $0xf8] sm:$0xff] }
 0x14f   : > { %2129 = vmatprep.subr.bf16.mxu1 %v5434_v52  ;;  %v525_v52 = vld [vmem:[%s6970_s12 + $0x4f8] sm:$0xff]  ;;  %v5244_v55 = vcombine.high %v393_v49, %v397_v50 }
 0x150   : > { %2089 = vmatpush1.bf16.msra.mxu0 %v5305_v57  ;;  %v5372_v56 = vcombine.high %v521_v51, %v525_v52  ;;  %v401_v57 = vld [vmem:[%s6970_s12 + $0x118] sm:$0xff] }
 0x151   : > { %2090 = vmatprep.subr.bf16.mxu0 %v5314_v61  ;;  %v529_v61 = vld [vmem:[%s6970_s12 + $0x518] sm:$0xff] }
 0x152   : > { %2130 = vmatpush1.bf16.msra.mxu1 %v5433_v58  ;;  %v405_v58 = vld [vmem:[%s6970_s12 + $0x138] sm:$0xff] }
 0x153   : > { %2131 = vmatprep.subr.bf16.mxu1 %v5442_v62  ;;  %v5243_v62 = vcombine.low %v393_v49, %v397_v50  ;;  %v5252_v63 = vcombine.high %v401_v57, %v405_v58  ;;  %v425_v18 = vld [vmem:[%s6970_s12 + $0x1d8] sm:$0xff] }
 0x154   : > { %2091 = vmatpush1.bf16.msra.mxu0 %v5313_v3  ;;  %v537_v3 = vld [vmem:[%s6970_s12 + $0x558] sm:$0xff] }
 0x155   : > { %2092 = vmatprep.subr.bf16.mxu0 %v5322_v5  ;;  %v5251_v5 = vcombine.low %v401_v57, %v405_v58  ;;  %v429_v19 = vld [vmem:[%s6970_s12 + $0x1f8] sm:$0xff] }
 0x156   : > { %2132 = vmatpush1.bf16.msra.mxu1 %v5441_v4  ;;  %v541_v4 = vld [vmem:[%s6970_s12 + $0x578] sm:$0xff]  ;;  %v5276_v25 = vcombine.high %v425_v18, %v429_v19 }
 0x157   : > { %2133 = vmatprep.subr.bf16.mxu1 %v5450_v6  ;;  %v5388_v8 = vcombine.high %v537_v3, %v541_v4  ;;  %v433_v27 = vld [vmem:[%s6970_s12 + $0x218] sm:$0xff] }
 0x158   : > { %2093 = vmatpush1.bf16.msra.mxu0 %v5321_v11  ;;  %v545_v11 = vld [vmem:[%s6970_s12 + $0x598] sm:$0xff] }
 0x159   : > { %2094 = vmatprep.subr.bf16.mxu0 %v5330_v13  ;;  %v5259_v13 = vcombine.low %v409_v1, %v413_v2  ;;  %v437_v28 = vld [vmem:[%s6970_s12 + $0x238] sm:$0xff] }
 0x15a   : > { %2134 = vmatpush1.bf16.msra.mxu1 %v5449_v12  ;;  %v549_v12 = vld [vmem:[%s6970_s12 + $0x5b8] sm:$0xff]  ;;  %v5284_v33 = vcombine.high %v433_v27, %v437_v28 }
 0x15b   : > { %2135 = vmatprep.subr.bf16.mxu1 %v5458_v14  ;;  %v5387_v14 = vcombine.low %v537_v3, %v541_v4  ;;  %v5396_v16 = vcombine.high %v545_v11, %v549_v12  ;;  %v441_v35 = vld [vmem:[%s6970_s12 + $0x258] sm:$0xff] }
 0x15c   : > { %2095 = vmatpush1.bf16.msra.mxu0 %v5329_v21  ;;  %v553_v21 = vld [vmem:[%s6970_s12 + $0x5d8] sm:$0xff] }
 0x15d   : > { %2096 = vmatprep.subr.bf16.mxu0 %v5338_v23  ;;  %v5267_v23 = vcombine.low %v417_v9, %v421_v10  ;;  %v445_v36 = vld [vmem:[%s6970_s12 + $0x278] sm:$0xff] }
 0x15e   : > { %2136 = vmatpush1.bf16.msra.mxu1 %v5457_v22  ;;  %v557_v22 = vld [vmem:[%s6970_s12 + $0x5f8] sm:$0xff]  ;;  %v5292_v41 = vcombine.high %v441_v35, %v445_v36 }
 0x15f   : > { %2137 = vmatprep.subr.bf16.mxu1 %v5466_v24  ;;  %v5395_v24 = vcombine.low %v545_v11, %v549_v12  ;;  %v5404_v26 = vcombine.high %v553_v21, %v557_v22  ;;  %v449_v43 = vld [vmem:[%s6970_s12 + $0x298] sm:$0xff] }
 0x160   : > { %2097 = vmatpush1.bf16.msra.mxu0 %v5337_v29  ;;  %v561_v29 = vld [vmem:[%s6970_s12 + $0x618] sm:$0xff] }
 0x161   : > { %2148 = vmatprep.subr.bf16.mxu0 %v5220_v31  ;;  %v5275_v31 = vcombine.low %v425_v18, %v429_v19  ;;  %v453_v44 = vld [vmem:[%s6970_s12 + $0x2b8] sm:$0xff] }
 0x162   : > { %2138 = vmatpush1.bf16.msra.mxu1 %v5465_v30  ;;  %v565_v30 = vld [vmem:[%s6970_s12 + $0x638] sm:$0xff]  ;;  %v5300_v49 = vcombine.high %v449_v43, %v453_v44 }
 0x163   : > { %2189 = vmatprep.subr.bf16.mxu1 %v5348_v32  ;;  %2099 = vmatmul.mubr.bf16.vlgmr.msra.gmra.mrb[8].mxu0 %v7072_v17  ;;  %v5403_v32 = vcombine.low %v553_v21, %v557_v22  ;;  %v5412_v34 = vcombine.high %v561_v29, %v565_v30  ;;  %v473_v3 = vld [vmem:[%s6970_s12 + $0x358] sm:$0xff] }
 0x164   : > { %2149 = vmatpush1.bf16.msra.mxu0 %v5219_v37  ;;  %2180 = vmatprep.mubr.bf16.mxu0 %v7024_v59  ;;  %v533_v59 = vld [vmem:[%s6970_s12 + $0x538] sm:$0xff] }
 0x165   : > { %2140 = vmatmul.mubr.bf16.vlgmr.msra.gmra.mrb[8].mxu1 %v7076_v20  ;;  %2150 = vmatprep.subr.bf16.mxu0 %v5228_v39  ;;  %v5380_v0 = vcombine.high %v529_v61, %v533_v59  ;;  %v5379_v6 = vcombine.low %v529_v61, %v533_v59  ;;  %v569_v37 = vld [vmem:[%s6970_s12 + $0x658] sm:$0xff]  ;;  %v5283_v39 = vcombine.low %v433_v27, %v437_v28 }
 0x166   : > { %2190 = vmatpush1.bf16.msra.mxu1 %v5347_v38  ;;  %2221 = vmatprep.mubr.bf16.mxu1 %v7026_v60  ;;  %v5371_v60 = vcombine.low %v521_v51, %v525_v52  ;;  %v573_v38 = vld [vmem:[%s6970_s12 + $0x678] sm:$0xff] }
 0x167   : > { %2191 = vmatprep.subr.bf16.mxu1 %v5356_v40  ;;  %v5411_v40 = vcombine.low %v561_v29, %v565_v30  ;;  %v5420_v42 = vcombine.high %v569_v37, %v573_v38  ;;  %v457_v51 = vld [vmem:[%s6970_s12 + $0x2d8] sm:$0xff] }
 0x168   : > { %2151 = vmatpush1.bf16.msra.mxu0 %v5227_v45  ;;  %v577_v45 = vld [vmem:[%s6970_s12 + $0x698] sm:$0xff] }
 0x169   : > { %2152 = vmatprep.subr.bf16.mxu0 %v5236_v47  ;;  %v5291_v47 = vcombine.low %v441_v35, %v445_v36  ;;  %v461_v52 = vld [vmem:[%s6970_s12 + $0x2f8] sm:$0xff]  ;;  %v351_v36 = vld [vmem:[#allocation2 + $0x8] sm:$0xff] }
 0x16a   : > { %2192 = vmatpush1.bf16.msra.mxu1 %v5355_v46  ;;  %v581_v46 = vld [vmem:[%s6970_s12 + $0x6b8] sm:$0xff]  ;;  %v5308_v57 = vcombine.high %v457_v51, %v461_v52 }
 0x16b   : > { %2193 = vmatprep.subr.bf16.mxu1 %v5364_v48  ;;  %v5419_v48 = vcombine.low %v569_v37, %v573_v38  ;;  %v5428_v50 = vcombine.high %v577_v45, %v581_v46  ;;  %v465_v61 = vld [vmem:[%s6970_s12 + $0x318] sm:$0xff] }
 0x16c   : > { %2153 = vmatpush1.bf16.msra.mxu0 %v5235_v53  ;;  %v585_v53 = vld [vmem:[%s6970_s12 + $0x6d8] sm:$0xff] }
 0x16d   : > { %2154 = vmatprep.subr.bf16.mxu0 %v5244_v55  ;;  %v5299_v55 = vcombine.low %v449_v43, %v453_v44  ;;  %v469_v59 = vld [vmem:[%s6970_s12 + $0x338] sm:$0xff] }
 0x16e   : > { %2194 = vmatpush1.bf16.msra.mxu1 %v5363_v54  ;;  %v589_v54 = vld [vmem:[%s6970_s12 + $0x6f8] sm:$0xff]  ;;  %v5316_v1 = vcombine.high %v465_v61, %v469_v59 }
 0x16f   : > { %2195 = vmatprep.subr.bf16.mxu1 %v5372_v56  ;;  %v5427_v56 = vcombine.low %v577_v45, %v581_v46  ;;  %v5436_v58 = vcombine.high %v585_v53, %v589_v54  ;;  %v477_v4 = vld [vmem:[%s6970_s12 + $0x378] sm:$0xff] }
 0x170   : > { %2155 = vmatpush1.bf16.msra.mxu0 %v5243_v62  ;;  %v593_v62 = vld [vmem:[%s6970_s12 + $0x718] sm:$0xff]  ;;  %v5324_v9 = vcombine.high %v473_v3, %v477_v4 }
 0x171   : > { %2156 = vmatprep.subr.bf16.mxu0 %v5252_v63  ;;  %v5307_v63 = vcombine.low %v457_v51, %v461_v52  ;;  %v481_v11 = vld [vmem:[%s6970_s12 + $0x398] sm:$0xff] }
 0x172   : > { %2196 = vmatpush1.bf16.msra.mxu1 %v5371_v60  ;;  %v597_v60 = vld [vmem:[%s6970_s12 + $0x738] sm:$0xff] }
 0x173   : > { %2197 = vmatprep.subr.bf16.mxu1 %v5380_v0  ;;  %v5435_v0 = vcombine.low %v585_v53, %v589_v54  ;;  %v5444_v2 = vcombine.high %v593_v62, %v597_v60  ;;  %v485_v12 = vld [vmem:[%s6970_s12 + $0x3b8] sm:$0xff] }
 0x174   : > { %2157 = vmatpush1.bf16.msra.mxu0 %v5251_v5  ;;  %v601_v5 = vld [vmem:[%s6970_s12 + $0x758] sm:$0xff]  ;;  %v5332_v18 = vcombine.high %v481_v11, %v485_v12 }
 0x175   : > { %2158 = vmatprep.subr.bf16.mxu0 %v5260_v7  ;;  %v5315_v7 = vcombine.low %v465_v61, %v469_v59  ;;  %v489_v21 = vld [vmem:[%s6970_s12 + $0x3d8] sm:$0xff] }
 0x176   : > { %2198 = vmatpush1.bf16.msra.mxu1 %v5379_v6  ;;  %v605_v6 = vld [vmem:[%s6970_s12 + $0x778] sm:$0xff] }
 0x177   : > { %2199 = vmatprep.subr.bf16.mxu1 %v5388_v8  ;;  %v5443_v8 = vcombine.low %v593_v62, %v597_v60  ;;  %v5452_v10 = vcombine.high %v601_v5, %v605_v6  ;;  %v493_v22 = vld [vmem:[%s6970_s12 + $0x3f8] sm:$0xff]  ;;  %v355_v60 = vld [vmem:[#allocation2 + $0x28] sm:$0xff] }
 0x178   : > { %2159 = vmatpush1.bf16.msra.mxu0 %v5259_v13  ;;  %v609_v13 = vld [vmem:[%s6970_s12 + $0x798] sm:$0xff]  ;;  %v5340_v27 = vcombine.high %v489_v21, %v493_v22  ;;  %v5339_v29 = vcombine.low %v489_v21, %v493_v22 }
 0x179   : > { %2160 = vmatprep.subr.bf16.mxu0 %v5268_v15  ;;  %v5323_v15 = vcombine.low %v473_v3, %v477_v4 }
 0x17a   : > { %2200 = vmatpush1.bf16.msra.mxu1 %v5387_v14  ;;  %v613_v14 = vld [vmem:[%s6970_s12 + $0x7b8] sm:$0xff] }
 0x17b   : > { %2201 = vmatprep.subr.bf16.mxu1 %v5396_v16  ;;  %v5451_v16 = vcombine.low %v601_v5, %v605_v6  ;;  %v5460_v19 = vcombine.high %v609_v13, %v613_v14 }
 0x17c   : > { %2161 = vmatpush1.bf16.msra.mxu0 %v5267_v23  ;;  %v617_v23 = vld [vmem:[%s6970_s12 + $0x7d8] sm:$0xff] }
 0x17d   : > { %2162 = vmatprep.subr.bf16.mxu0 %v5276_v25  ;;  %v5331_v25 = vcombine.low %v481_v11, %v485_v12  ;;  %v357_v12 = vld [vmem:[#allocation2 + $0x38] sm:$0xff] }
 0x17e   : > { %2202 = vmatpush1.bf16.msra.mxu1 %v5395_v24  ;;  %v621_v24 = vld [vmem:[%s6970_s12 + $0x7f8] sm:$0xff] }
 0x17f   : > { %2203 = vmatprep.subr.bf16.mxu1 %v5404_v26  ;;  %v5459_v26 = vcombine.low %v609_v13, %v613_v14  ;;  %v5468_v28 = vcombine.high %v617_v23, %v621_v24  ;;  %v5467_v30 = vcombine.low %v617_v23, %v621_v24  ;;  %v6034_v23 = vld [vmem:[#allocation5 + $0x4] ss:$16 sps:$4 sm:$0xff] (!%p5469_p4)   ;;  %v6036_v24 = vld [vmem:[#allocation5 + $0xc] ss:$16 sps:$4 sm:$0xff] (!%p5469_p4)  }
 0x180   : > { %2163 = vmatpush1.bf16.msra.mxu0 %v5275_v31 }
 0x181   : > { %2164 = vmatprep.subr.bf16.mxu0 %v5284_v33 }
 0x182   : > { %2204 = vmatpush1.bf16.msra.mxu1 %v5403_v32  ;;  %v350_v32 = vld [vmem:[#allocation2] sm:$0xff] }
 0x183   : > { %2205 = vmatprep.subr.bf16.mxu1 %v5412_v34 }
 0x184   : > { %2165 = vmatpush1.bf16.msra.mxu0 %v5283_v39 }
 0x185   : > { %2166 = vmatprep.subr.bf16.mxu0 %v5292_v41 }
 0x186   : > { %2206 = vmatpush1.bf16.msra.mxu1 %v5411_v40 }
 0x187   : > { %2207 = vmatprep.subr.bf16.mxu1 %v5420_v42 }
 0x188   : > { %2167 = vmatpush1.bf16.msra.mxu0 %v5291_v47 }
 0x189   : > { %2168 = vmatprep.subr.bf16.mxu0 %v5300_v49 }
 0x18a   : > { %2208 = vmatpush1.bf16.msra.mxu1 %v5419_v48  ;;  %v353_v48 = vld [vmem:[#allocation2 + $0x18] sm:$0xff] }
 0x18b   : > { %2209 = vmatprep.subr.bf16.mxu1 %v5428_v50 }
 0x18c   : > { %2169 = vmatpush1.bf16.msra.mxu0 %v5299_v55 }
 0x18d   : > { %2170 = vmatprep.subr.bf16.mxu0 %v5308_v57 }
 0x18e   : > { %2210 = vmatpush1.bf16.msra.mxu1 %v5427_v56 }
 0x18f   : > { %2211 = vmatprep.subr.bf16.mxu1 %v5436_v58  ;;  %v354_v58 = vld [vmem:[#allocation2 + $0x20] sm:$0xff] }
 0x190   : > { %2171 = vmatpush1.bf16.msra.mxu0 %v5307_v63 }
 0x191   : > { %2172 = vmatprep.subr.bf16.mxu0 %v5316_v1 }
 0x192   : > { %2212 = vmatpush1.bf16.msra.mxu1 %v5435_v0 }
 0x193   : > { %2213 = vmatprep.subr.bf16.mxu1 %v5444_v2 }
 0x194   : > { %2173 = vmatpush1.bf16.msra.mxu0 %v5315_v7 }
 0x195   : > { %2174 = vmatprep.subr.bf16.mxu0 %v5324_v9 }
 0x196   : > { %2214 = vmatpush1.bf16.msra.mxu1 %v5443_v8  ;;  %v356_v8 = vld [vmem:[#allocation2 + $0x30] sm:$0xff] }
 0x197   : > { %2215 = vmatprep.subr.bf16.mxu1 %v5452_v10 }
 0x198   : > { %2175 = vmatpush1.bf16.msra.mxu0 %v5323_v15 }
 0x199   : > { %2176 = vmatprep.subr.bf16.mxu0 %v5332_v18 }
 0x19a   : > { %2216 = vmatpush1.bf16.msra.mxu1 %v5451_v16 }
 0x19b   : > { %2217 = vmatprep.subr.bf16.mxu1 %v5460_v19 }
 0x19c   : > { %2177 = vmatpush1.bf16.msra.mxu0 %v5331_v25  ;;  %v6038_v25 = vld [vmem:[#allocation5] ss:$16 sps:$4 sm:$0xff] (!%p5469_p4)  }
 0x19d   : > { %2178 = vmatprep.subr.bf16.mxu0 %v5340_v27  ;;  %v6040_v27 = vld [vmem:[#allocation5 + $0x24] ss:$16 sps:$4 sm:$0xff] (!%p5469_p4)  }
 0x19e   : > { %2218 = vmatpush1.bf16.msra.mxu1 %v5459_v26  ;;  %v6039_v26 = vld [vmem:[#allocation5 + $0x8] ss:$16 sps:$4 sm:$0xff] (!%p5469_p4)  }
 0x19f   : > { %2219 = vmatprep.subr.bf16.mxu1 %v5468_v28  ;;  %v6042_v28 = vld [vmem:[#allocation5 + $0x2c] ss:$16 sps:$4 sm:$0xff] (!%p5469_p4)  }
 0x1a0   : > { %2179 = vmatpush1.bf16.msra.mxu0 %v5339_v29  ;;  %v6044_v29 = vld [vmem:[#allocation5 + $0x20] ss:$16 sps:$4 sm:$0xff] (!%p5469_p4)  }
 0x1a1   : > { %3882 = vmatprep.subr.bf16.mxu0 (!%p5469_p4), %v6034_v23  ;;  %v6116_v23 = vld [vmem:[#allocation5 + $0x1a0] ss:$16 sps:$4 sm:$0xff] (!%p5469_p4)  }
 0x1a2   : > { %2220 = vmatpush1.bf16.msra.mxu1 %v5467_v30  ;;  %v6045_v30 = vld [vmem:[#allocation5 + $0x28] ss:$16 sps:$4 sm:$0xff] (!%p5469_p4)  }
 0x1a3   : > { %2181 = vmatmul.mubr.bf16.vlgmr.msra.gmra.mrb[12].mxu0 %v7072_v17  ;;  %v352_v17 = vld [vmem:[#allocation2 + $0x10] sm:$0xff]  ;;  %4046 = vmatprep.subr.bf16.mxu1 (!%p5469_p4), %v6036_v24  ;;  %v6117_v24 = vld [vmem:[#allocation5 + $0x1a8] ss:$16 sps:$4 sm:$0xff] (!%p5469_p4)  }
 0x1a4   : > { %3883 = vmatpush1.bf16.msra.mxu0 (!%p5469_p4), %v6038_v25 }
 0x1a5   : > { %2222 = vmatmul.mubr.bf16.vlgmr.msra.gmra.mrb[12].mxu1 %v7076_v20  ;;  %3884 = vmatprep.subr.bf16.mxu0 (!%p5469_p4), %v6040_v27 }
 0x1a6   : > { %4047 = vmatpush1.bf16.msra.mxu1 (!%p5469_p4), %v6039_v26  ;;  %v6118_v26 = vld [vmem:[#allocation5 + $0x1c4] ss:$16 sps:$4 sm:$0xff] (!%p5469_p4)  }
 0x1a7   : > { %4048 = vmatprep.subr.bf16.mxu1 (!%p5469_p4), %v6042_v28  ;;  %v6120_v28 = vld [vmem:[#allocation5 + $0x1cc] ss:$16 sps:$4 sm:$0xff] (!%p5469_p4)  }
 0x1a8   : > { %3885 = vmatpush1.bf16.msra.mxu0 (!%p5469_p4), %v6044_v29  ;;  %v6122_v29 = vld [vmem:[#allocation5 + $0x1c0] ss:$16 sps:$4 sm:$0xff] (!%p5469_p4)  }
 0x1aa   : > { %4049 = vmatpush1.bf16.msra.mxu1 (!%p5469_p4), %v6045_v30 }
 0x1b6   : > { %v1936_v31 = vpop.f32.mrb[0].mxu0 }
 0x1b7   : > { %v1938_v34 = vpop.f32.mrb[1].mxu0 }
 0x1b8   : > { %v1977_v33 = vpop.f32.mrb[0].mxu1  ;;  %v1940_v38 = vpop.f32.mrb[2].mxu0 }
 0x1b9   : > { %v1978_v35 = vadd.f32 %v1977_v33, %v1936_v31  ;;  %v1979_v37 = vpop.f32.mrb[1].mxu1  ;;  %v1941_v41 = vpop.f32.mrb[3].mxu0  ;;  %v6046_v31 = vld [vmem:[#allocation5 + $0x44] ss:$16 sps:$4 sm:$0xff] (!%p5469_p4)   ;;  %v6050_v33 = vld [vmem:[#allocation5 + $0x40] ss:$16 sps:$4 sm:$0xff] (!%p5469_p4)  }
 0x1ba   : > { %v1980_v39 = vadd.f32 %v1979_v37, %v1938_v34  ;;  %v1981_v40 = vpop.f32.mrb[2].mxu1  ;;  %v6051_v34 = vld [vmem:[#allocation5 + $0x48] ss:$16 sps:$4 sm:$0xff] (!%p5469_p4)   ;;  %3886 = vmatprep.subr.bf16.mxu0 (!%p5469_p4), %v6046_v31  ;;  %v6056_v37 = vld [vmem:[#allocation5 + $0x60] ss:$16 sps:$4 sm:$0xff] (!%p5469_p4)  }
 0x1bb   : > { %v2230_v42 = vadd.f32 %v1978_v35, %v350_v32  ;;  %v1982_v43 = vpop.f32.mrb[3].mxu1  ;;  %v6048_v32 = vld [vmem:[#allocation5 + $0x4c] ss:$16 sps:$4 sm:$0xff] (!%p5469_p4)   ;;  %v6052_v35 = vld [vmem:[#allocation5 + $0x64] ss:$16 sps:$4 sm:$0xff] (!%p5469_p4)   ;;  %3887 = vmatpush1.bf16.msra.mxu0 (!%p5469_p4), %v6050_v33 }
 0x1bc   : > { %v2231_v44 = vadd.f32 %v1980_v39, %v351_v36  ;;  %4050 = vmatprep.subr.bf16.mxu1 (!%p5469_p4), %v6048_v32  ;;  %v6054_v36 = vld [vmem:[#allocation5 + $0x6c] ss:$16 sps:$4 sm:$0xff] (!%p5469_p4)   ;;  %v6057_v38 = vld [vmem:[#allocation5 + $0x68] ss:$16 sps:$4 sm:$0xff] (!%p5469_p4)   ;;  %v6058_v39 = vld [vmem:[#allocation5 + $0x84] ss:$16 sps:$4 sm:$0xff] (!%p5469_p4)   ;;  %3888 = vmatprep.subr.bf16.mxu0 (!%p5469_p4), %v6052_v35 }
 0x1bd   : > { %2238 = vst [vmem:[#allocation2] sm:$0xff] %v2230_v42  ;;  %4051 = vmatpush1.bf16.msra.mxu1 (!%p5469_p4), %v6051_v34  ;;  %v6060_v40 = vld [vmem:[#allocation5 + $0x8c] ss:$16 sps:$4 sm:$0xff] (!%p5469_p4)   ;;  %v6062_v41 = vld [vmem:[#allocation5 + $0x80] ss:$16 sps:$4 sm:$0xff] (!%p5469_p4)  }
 0x1be   : > { %2239 = vst [vmem:[#allocation2 + $0x8] sm:$0xff] %v2231_v44  ;;  %4052 = vmatprep.subr.bf16.mxu1 (!%p5469_p4), %v6054_v36  ;;  %v6063_v42 = vld [vmem:[#allocation5 + $0x88] ss:$16 sps:$4 sm:$0xff] (!%p5469_p4)   ;;  %v6064_v43 = vld [vmem:[#allocation5 + $0xa4] ss:$16 sps:$4 sm:$0xff] (!%p5469_p4)  }
 0x1bf   : > { %3889 = vmatpush1.bf16.msra.mxu0 (!%p5469_p4), %v6056_v37  ;;  %v6066_v44 = vld [vmem:[#allocation5 + $0xac] ss:$16 sps:$4 sm:$0xff] (!%p5469_p4)   ;;  %v6123_v31 = vld [vmem:[#allocation5 + $0x1c8] ss:$16 sps:$4 sm:$0xff] (!%p5469_p4)   ;;  %v6124_v32 = vld [vmem:[#allocation5 + $0x1e4] ss:$16 sps:$4 sm:$0xff] (!%p5469_p4)  }
 0x1c0   : > { %3890 = vmatprep.subr.bf16.mxu0 (!%p5469_p4), %v6058_v39  ;;  %v6126_v33 = vld [vmem:[#allocation5 + $0x1ec] ss:$16 sps:$4 sm:$0xff] (!%p5469_p4)   ;;  %v6128_v34 = vld [vmem:[#allocation5 + $0x1e0] ss:$16 sps:$4 sm:$0xff] (!%p5469_p4)   ;;  %v6129_v36 = vld [vmem:[#allocation5 + $0x1e8] ss:$16 sps:$4 sm:$0xff] (!%p5469_p4)  }
 0x1c1   : > { %4053 = vmatpush1.bf16.msra.mxu1 (!%p5469_p4), %v6057_v38  ;;  %v6132_v37 = vld [vmem:[#allocation5 + $0x204] ss:$16 sps:$4 sm:$0xff] (!%p5469_p4)   ;;  %v6135_v38 = vld [vmem:[#allocation5 + $0x20c] ss:$16 sps:$4 sm:$0xff] (!%p5469_p4)   ;;  %v6130_v39 = vld [vmem:[#allocation5 + $0x200] ss:$16 sps:$4 sm:$0xff] (!%p5469_p4)  }
 0x1c2   : > { %4054 = vmatprep.subr.bf16.mxu1 (!%p5469_p4), %v6060_v40 }
 0x1c3   : > { %3891 = vmatpush1.bf16.msra.mxu0 (!%p5469_p4), %v6062_v41  ;;  %v6133_v41 = vld [vmem:[#allocation5 + $0x208] ss:$16 sps:$4 sm:$0xff] (!%p5469_p4)  }
 0x1c4   : > { %3892 = vmatprep.subr.bf16.mxu0 (!%p5469_p4), %v6064_v43  ;;  %v2250_v27 = vld [vmem:[#allocation2] sm:$0xff] (!%p5469_p4)  ;;  %v6141_v43 = vld [vmem:[#allocation5 + $0x22c] ss:$16 sps:$4 sm:$0xff] (!%p5469_p4)  }
 0x1c5   : > { %4055 = vmatpush1.bf16.msra.mxu1 (!%p5469_p4), %v6063_v42  ;;  %v6138_v42 = vld [vmem:[#allocation5 + $0x224] ss:$16 sps:$4 sm:$0xff] (!%p5469_p4)  }
 0x1c6   : > { %4056 = vmatprep.subr.bf16.mxu1 (!%p5469_p4), %v6066_v44  ;;  %v6136_v44 = vld [vmem:[#allocation5 + $0x220] ss:$16 sps:$4 sm:$0xff] (!%p5469_p4)  }
 0x1f6   : > { %v2018_v45 = vpop.f32.mrb[4].mxu0 }
 0x1f7   : > { %v2020_v20 = vpop.f32.mrb[5].mxu0 }
 0x1f8   : > { %v2059_v46 = vpop.f32.mrb[4].mxu1  ;;  %v2022_v50 = vpop.f32.mrb[6].mxu0 }
 0x1f9   : > { %v2060_v47 = vadd.f32 %v2059_v46, %v2018_v45  ;;  %v2061_v49 = vpop.f32.mrb[5].mxu1  ;;  %v2023_v53 = vpop.f32.mrb[7].mxu0  ;;  %v6068_v45 = vld [vmem:[#allocation5 + $0xa0] ss:$16 sps:$4 sm:$0xff] (!%p5469_p4)   ;;  %v6070_v46 = vld [vmem:[#allocation5 + $0xc4] ss:$16 sps:$4 sm:$0xff] (!%p5469_p4)  }
 0x1fa   : > { %v2062_v51 = vadd.f32 %v2061_v49, %v2020_v20  ;;  %v2063_v52 = vpop.f32.mrb[6].mxu1  ;;  %v6072_v20 = vld [vmem:[#allocation5 + $0xcc] ss:$16 sps:$4 sm:$0xff] (!%p5469_p4)   ;;  %3893 = vmatpush1.bf16.msra.mxu0 (!%p5469_p4), %v6068_v45  ;;  %v6076_v49 = vld [vmem:[#allocation5 + $0xe4] ss:$16 sps:$4 sm:$0xff] (!%p5469_p4)  }
 0x1fb   : > { %v2232_v54 = vadd.f32 %v2060_v47, %v352_v17  ;;  %v2064_v55 = vpop.f32.mrb[7].mxu1  ;;  %v6069_v17 = vld [vmem:[#allocation5 + $0xa8] ss:$16 sps:$4 sm:$0xff] (!%p5469_p4)   ;;  %v6074_v47 = vld [vmem:[#allocation5 + $0xc0] ss:$16 sps:$4 sm:$0xff] (!%p5469_p4)   ;;  %3894 = vmatprep.subr.bf16.mxu0 (!%p5469_p4), %v6070_v46 }
 0x1fc   : > { %v2233_v56 = vadd.f32 %v2062_v51, %v353_v48  ;;  %v6075_v48 = vld [vmem:[#allocation5 + $0xc8] ss:$16 sps:$4 sm:$0xff] (!%p5469_p4)   ;;  %4057 = vmatpush1.bf16.msra.mxu1 (!%p5469_p4), %v6069_v17  ;;  %v6078_v50 = vld [vmem:[#allocation5 + $0xec] ss:$16 sps:$4 sm:$0xff] (!%p5469_p4)   ;;  %v6080_v51 = vld [vmem:[#allocation5 + $0xe0] ss:$16 sps:$4 sm:$0xff] (!%p5469_p4)  }
 0x1fd   : > { %2240 = vst [vmem:[#allocation2 + $0x10] sm:$0xff] %v2232_v54  ;;  %4058 = vmatprep.subr.bf16.mxu1 (!%p5469_p4), %v6072_v20  ;;  %v6081_v52 = vld [vmem:[#allocation5 + $0xe8] ss:$16 sps:$4 sm:$0xff] (!%p5469_p4)   ;;  %v6082_v53 = vld [vmem:[#allocation5 + $0x104] ss:$16 sps:$4 sm:$0xff] (!%p5469_p4)  }
 0x1fe   : > { %2241 = vst [vmem:[#allocation2 + $0x18] sm:$0xff] %v2233_v56  ;;  %3895 = vmatpush1.bf16.msra.mxu0 (!%p5469_p4), %v6074_v47  ;;  %v6084_v54 = vld [vmem:[#allocation5 + $0x10c] ss:$16 sps:$4 sm:$0xff] (!%p5469_p4)   ;;  %v6086_v55 = vld [vmem:[#allocation5 + $0x100] ss:$16 sps:$4 sm:$0xff] (!%p5469_p4)  }
 0x1ff   : > { %3896 = vmatprep.subr.bf16.mxu0 (!%p5469_p4), %v6076_v49  ;;  %v6087_v56 = vld [vmem:[#allocation5 + $0x108] ss:$16 sps:$4 sm:$0xff] (!%p5469_p4)   ;;  %v6144_v17 = vld [vmem:[#allocation5 + $0x244] ss:$16 sps:$4 sm:$0xff] (!%p5469_p4)   ;;  %v6147_v46 = vld [vmem:[#allocation5 + $0x24c] ss:$16 sps:$4 sm:$0xff] (!%p5469_p4)  }
 0x200   : > { %4059 = vmatpush1.bf16.msra.mxu1 (!%p5469_p4), %v6075_v48  ;;  %v6139_v45 = vld [vmem:[#allocation5 + $0x228] ss:$16 sps:$4 sm:$0xff] (!%p5469_p4)   ;;  %v6142_v20 = vld [vmem:[#allocation5 + $0x240] ss:$16 sps:$4 sm:$0xff] (!%p5469_p4)   ;;  %v6150_v48 = vld [vmem:[#allocation5 + $0x264] ss:$16 sps:$4 sm:$0xff] (!%p5469_p4)  }
 0x201   : > { %4060 = vmatprep.subr.bf16.mxu1 (!%p5469_p4), %v6078_v50  ;;  %v6145_v47 = vld [vmem:[#allocation5 + $0x248] ss:$16 sps:$4 sm:$0xff] (!%p5469_p4)   ;;  %v6153_v49 = vld [vmem:[#allocation5 + $0x26c] ss:$16 sps:$4 sm:$0xff] (!%p5469_p4)   ;;  %v6148_v50 = vld [vmem:[#allocation5 + $0x260] ss:$16 sps:$4 sm:$0xff] (!%p5469_p4)  }
 0x202   : > { %3897 = vmatpush1.bf16.msra.mxu0 (!%p5469_p4), %v6080_v51  ;;  %v6151_v51 = vld [vmem:[#allocation5 + $0x268] ss:$16 sps:$4 sm:$0xff] (!%p5469_p4)  }
 0x203   : > { %3898 = vmatprep.subr.bf16.mxu0 (!%p5469_p4), %v6082_v53  ;;  %v6159_v53 = vld [vmem:[#allocation5 + $0x28c] ss:$16 sps:$4 sm:$0xff] (!%p5469_p4)  }
 0x204   : > { %4061 = vmatpush1.bf16.msra.mxu1 (!%p5469_p4), %v6081_v52  ;;  %v6156_v52 = vld [vmem:[#allocation5 + $0x284] ss:$16 sps:$4 sm:$0xff] (!%p5469_p4)  }
 0x205   : > { %4062 = vmatprep.subr.bf16.mxu1 (!%p5469_p4), %v6084_v54  ;;  %v6154_v54 = vld [vmem:[#allocation5 + $0x280] ss:$16 sps:$4 sm:$0xff] (!%p5469_p4)  }
 0x206   : > { %3899 = vmatpush1.bf16.msra.mxu0 (!%p5469_p4), %v6086_v55 }
 0x208   : > { %4063 = vmatpush1.bf16.msra.mxu1 (!%p5469_p4), %v6087_v56  ;;  %v6157_v56 = vld [vmem:[#allocation5 + $0x288] ss:$16 sps:$4 sm:$0xff] (!%p5469_p4)  }
 0x236   : > { %v2100_v57 = vpop.f32.mrb[8].mxu0 }
 0x237   : > { %v2102_v59 = vpop.f32.mrb[9].mxu0 }
 0x238   : > { %v2141_v61 = vpop.f32.mrb[8].mxu1  ;;  %v2104_v0 = vpop.f32.mrb[10].mxu0 }
 0x239   : > { %v2142_v62 = vadd.f32 %v2141_v61, %v2100_v57  ;;  %v2143_v63 = vpop.f32.mrb[9].mxu1  ;;  %v2105_v3 = vpop.f32.mrb[11].mxu0  ;;  %v6088_v57 = vld [vmem:[#allocation5 + $0x124] ss:$16 sps:$4 sm:$0xff] (!%p5469_p4)   ;;  %v6090_v61 = vld [vmem:[#allocation5 + $0x12c] ss:$16 sps:$4 sm:$0xff] (!%p5469_p4)  }
 0x23a   : > { %v2144_v1 = vadd.f32 %v2143_v63, %v2102_v59  ;;  %v2145_v2 = vpop.f32.mrb[10].mxu1  ;;  %v6092_v59 = vld [vmem:[#allocation5 + $0x120] ss:$16 sps:$4 sm:$0xff] (!%p5469_p4)   ;;  %3900 = vmatprep.subr.bf16.mxu0 (!%p5469_p4), %v6088_v57  ;;  %4064 = vmatprep.subr.bf16.mxu1 (!%p5469_p4), %v6090_v61  ;;  %v6096_v0 = vld [vmem:[#allocation5 + $0x14c] ss:$16 sps:$4 sm:$0xff] (!%p5469_p4)  }
 0x23b   : > { %v2234_v4 = vadd.f32 %v2142_v62, %v354_v58  ;;  %v2146_v5 = vpop.f32.mrb[11].mxu1  ;;  %v2260_v58 = vlaneseq (!%p5469_p4)  ;;  %v6093_v62 = vld [vmem:[#allocation5 + $0x128] ss:$16 sps:$4 sm:$0xff] (!%p5469_p4)   ;;  %3901 = vmatpush1.bf16.msra.mxu0 (!%p5469_p4), %v6092_v59  ;;  %v6100_v3 = vld [vmem:[#allocation5 + $0x164] ss:$16 sps:$4 sm:$0xff] (!%p5469_p4)  }
 0x23c   : > { %v2235_v6 = vadd.f32 %v2144_v1, %v355_v60  ;;  %v6094_v60 = vld [vmem:[#allocation5 + $0x144] ss:$16 sps:$4 sm:$0xff] (!%p5469_p4)   ;;  %v6098_v1 = vld [vmem:[#allocation5 + $0x140] ss:$16 sps:$4 sm:$0xff] (!%p5469_p4)   ;;  %v6099_v2 = vld [vmem:[#allocation5 + $0x148] ss:$16 sps:$4 sm:$0xff] (!%p5469_p4)   ;;  %4065 = vmatpush1.bf16.msra.mxu1 (!%p5469_p4), %v6093_v62 }
 0x23d   : > { %2242 = vst [vmem:[#allocation2 + $0x20] sm:$0xff] %v2234_v4  ;;  %v7277_v63 = vshrl.u32 (!%p5469_p4), %v2260_v58, 7  ;;  %3902 = vmatprep.subr.bf16.mxu0 (!%p5469_p4), %v6094_v60  ;;  %4066 = vmatprep.subr.bf16.mxu1 (!%p5469_p4), %v6096_v0  ;;  %v6102_v5 = vld [vmem:[#allocation5 + $0x16c] ss:$16 sps:$4 sm:$0xff] (!%p5469_p4)   ;;  %v6162_v57 = vld [vmem:[#allocation5 + $0x2a4] ss:$16 sps:$4 sm:$0xff] (!%p5469_p4)  }
 0x23e   : > { %2243 = vst [vmem:[#allocation2 + $0x28] sm:$0xff] %v2235_v6  ;;  %v2251_v6 = vld [vmem:[#allocation2 + $0x8] sm:$0xff] (!%p5469_p4)  ;;  %v6160_v61 = vld [vmem:[#allocation5 + $0x2a0] ss:$16 sps:$4 sm:$0xff] (!%p5469_p4)   ;;  %v6168_v60 = vld [vmem:[#allocation5 + $0x2c4] ss:$16 sps:$4 sm:$0xff] (!%p5469_p4)  }
 0x23f   : > { %v7280_v4 = vsub.s32 (!%p5469_p4), 1, %v7277_v63  ;;  %3903 = vmatpush1.bf16.msra.mxu0 (!%p5469_p4), %v6098_v1  ;;  %v2274_v55 = vsub.s32 (!%p5469_p4), 3, %v7277_v63  ;;  %v6165_v58 = vld [vmem:[#allocation5 + $0x2ac] ss:$16 sps:$4 sm:$0xff] (!%p5469_p4)   ;;  %v6163_v62 = vld [vmem:[#allocation5 + $0x2a8] ss:$16 sps:$4 sm:$0xff] (!%p5469_p4)  }
 0x240   : > { %4067 = vmatpush1.bf16.msra.mxu1 (!%p5469_p4), %v6099_v2  ;;  %3904 = vmatprep.subr.bf16.mxu0 (!%p5469_p4), %v6100_v3  ;;  %v6171_v0 = vld [vmem:[#allocation5 + $0x2cc] ss:$16 sps:$4 sm:$0xff] (!%p5469_p4)   ;;  %v6166_v2 = vld [vmem:[#allocation5 + $0x2c0] ss:$16 sps:$4 sm:$0xff] (!%p5469_p4)  }
 0x241   : > { %4068 = vmatprep.subr.bf16.mxu1 (!%p5469_p4), %v6102_v5  ;;  %v2253_v1 = vld [vmem:[#allocation2 + $0x18] sm:$0xff] (!%p5469_p4) }
 0x242   : > { %v6169_v5 = vld [vmem:[#allocation5 + $0x2c8] ss:$16 sps:$4 sm:$0xff] (!%p5469_p4)  }
 0x276   : > { %v2182_v7 = vpop.f32.mrb[12].mxu0 }
 0x277   : > { %v2184_v10 = vpop.f32.mrb[13].mxu0 }
 0x278   : > { %v2223_v9 = vpop.f32.mrb[12].mxu1  ;;  %v2186_v14 = vpop.f32.mrb[14].mxu0  ;;  %2249 = sbr.rel (%p5469_p4) target bundleno = 2007 (0x7d7), region = 72 }
 0x279   : > { %v2224_v11 = vadd.f32 %v2223_v9, %v2182_v7  ;;  %v2225_v13 = vpop.f32.mrb[13].mxu1  ;;  %v2187_v18 = vpop.f32.mrb[15].mxu0  ;;  %v7282_v7 = vld [vmem:[#allocation10] sm:$0xff] (!%p5469_p4)  ;;  %v6105_v9 = vld [vmem:[#allocation5 + $0x168] ss:$16 sps:$4 sm:$0xff] (!%p5469_p4)  }
 0x27a   : > { %v2226_v15 = vadd.f32 %v2225_v13, %v2184_v10  ;;  %v2227_v16 = vpop.f32.mrb[14].mxu1  ;;  %v2267_v10 = vrot.slane (!%p5469_p4), %v7282_v7, %v7280_v4  ;;  %v6110_v14 = vld [vmem:[#allocation5 + $0x180] ss:$16 sps:$4 sm:$0xff] (!%p5469_p4)   ;;  %4069 = vmatpush1.bf16.msra.mxu1 (!%p5469_p4), %v6105_v9  ;;  %v6112_v18 = vld [vmem:[#allocation5 + $0x1a4] ss:$16 sps:$4 sm:$0xff] (!%p5469_p4)   ;;  %v2275_v59 = vrot.slane (!%p5469_p4), %v7282_v7, %v2274_v55 }
 0x27b   : > { %v2236_v19 = vadd.f32 %v2224_v11, %v356_v8  ;;  %v2228_v21 = vpop.f32.mrb[15].mxu1  ;;  %v6104_v8 = vld [vmem:[#allocation5 + $0x160] ss:$16 sps:$4 sm:$0xff] (!%p5469_p4)   ;;  %v6106_v11 = vld [vmem:[#allocation5 + $0x184] ss:$16 sps:$4 sm:$0xff] (!%p5469_p4)  }
 0x27c   : > { %v2237_v22 = vadd.f32 %v2226_v15, %v357_v12  ;;  %v6108_v12 = vld [vmem:[#allocation5 + $0x18c] ss:$16 sps:$4 sm:$0xff] (!%p5469_p4)   ;;  %v2301_v13 = vadd.f32 (!%p5469_p4), %v2267_v10, %v2251_v6  ;;  %v7287_v15 = vsub.s32 (!%p5469_p4), 0, %v7277_v63  ;;  %3905 = vmatpush1.bf16.msra.mxu0 (!%p5469_p4), %v6104_v8  ;;  %v6111_v16 = vld [vmem:[#allocation5 + $0x188] ss:$16 sps:$4 sm:$0xff] (!%p5469_p4)   ;;  %v2303_v3 = vadd.f32 (!%p5469_p4), %v2275_v59, %v2253_v1 }
 0x27d   : > { %2244 = vst [vmem:[#allocation2 + $0x30] sm:$0xff] %v2236_v19  ;;  %3906 = vmatprep.subr.bf16.mxu0 (!%p5469_p4), %v6106_v11  ;;  %4070 = vmatprep.subr.bf16.mxu1 (!%p5469_p4), %v6108_v12  ;;  %v6114_v21 = vld [vmem:[#allocation5 + $0x1ac] ss:$16 sps:$4 sm:$0xff] (!%p5469_p4)   ;;  %v6174_v6 = vld [vmem:[#allocation5 + $0x2e4] ss:$16 sps:$4 sm:$0xff] (!%p5469_p4)  }
 0x27e   : > { %2245 = vst [vmem:[#allocation2 + $0x38] sm:$0xff] %v2237_v22  ;;  %v2309_v19 = vmax.f32 (!%p5469_p4), %v2301_v13, 0.0  ;;  %v2263_v25 = vrot.slane (!%p5469_p4), %v7282_v7, %v7287_v15  ;;  %4071 = vmatpush1.bf16.msra.mxu1 (!%p5469_p4), %v6111_v16  ;;  %v6177_v8 = vld [vmem:[#allocation5 + $0x2ec] ss:$16 sps:$4 sm:$0xff] (!%p5469_p4)   ;;  %v2311_v9 = vmax.f32 (!%p5469_p4), %v2303_v3, 0.0 }
 0x27f   : > { %4072 = vmatprep.subr.bf16.mxu1 %v6114_v21  ;;  %v6172_v10 = vld [vmem:[#allocation5 + $0x2e0] ss:$16 sps:$4 sm:$0xff]   ;;  %v6175_v12 = vld [vmem:[#allocation5 + $0x2e8] ss:$16 sps:$4 sm:$0xff]   ;;  %v6180_v13 = vld [vmem:[#allocation5 + $0x304] ss:$16 sps:$4 sm:$0xff]  }
 0x280   : > { %v2317_v22 = vpack.c.bf16 %v2309_v19, %v2309_v19  ;;  %3907 = vmatpush1.bf16.msra.mxu0 %v6110_v14  ;;  %v2300_v30 = vadd.f32 %v2263_v25, %v2250_v27  ;;  %v2319_v11 = vpack.c.bf16 %v2311_v9, %v2311_v9  ;;  %v6183_v14 = vld [vmem:[#allocation5 + $0x30c] ss:$16 sps:$4 sm:$0xff]   ;;  %v6178_v16 = vld [vmem:[#allocation5 + $0x300] ss:$16 sps:$4 sm:$0xff]   ;;  %v6186_v19 = vld [vmem:[#allocation5 + $0x324] ss:$16 sps:$4 sm:$0xff]  }
 0x281   : > { %3908 = vmatprep.subr.bf16.mxu0 %v6112_v18  ;;  %v6181_v18 = vld [vmem:[#allocation5 + $0x308] ss:$16 sps:$4 sm:$0xff]   ;;  %v6189_v21 = vld [vmem:[#allocation5 + $0x32c] ss:$16 sps:$4 sm:$0xff]   ;;  %v6246_v9 = vld [vmem:[#allocation5 + $0x464] ss:$16 sps:$4 sm:$0xff]  }
 0x282   : > { %3914 = vmatprep.mubr.bf16.mxu0 %v2317_v22  ;;  %4078 = vmatprep.mubr.bf16.mxu1 %v2317_v22  ;;  %v2308_v35 = vmax.f32 %v2300_v30, 0.0  ;;  %v6184_v22 = vld [vmem:[#allocation5 + $0x320] ss:$16 sps:$4 sm:$0xff]   ;;  %v6195_v25 = vld [vmem:[#allocation5 + $0x34c] ss:$16 sps:$4 sm:$0xff]  }
 0x283   : > { %4073 = vmatpush1.bf16.msra.mxu1 %v6117_v24  ;;  %v6192_v24 = vld [vmem:[#allocation5 + $0x344] ss:$16 sps:$4 sm:$0xff]   ;;  %v6193_v27 = vld [vmem:[#allocation5 + $0x348] ss:$16 sps:$4 sm:$0xff]   ;;  %v6196_v30 = vld [vmem:[#allocation5 + $0x360] ss:$16 sps:$4 sm:$0xff]  }
 0x284   : > { %3909 = vmatpush1.bf16.msra.mxu0 %v6116_v23  ;;  %4074 = vmatprep.subr.bf16.mxu1 %v6120_v28  ;;  %v2316_v40 = vpack.c.bf16 %v2308_v35, %v2308_v35  ;;  %v6187_v23 = vld [vmem:[#allocation5 + $0x328] ss:$16 sps:$4 sm:$0xff]   ;;  %v6198_v28 = vld [vmem:[#allocation5 + $0x364] ss:$16 sps:$4 sm:$0xff]   ;;  %v2270_v35 = vsub.s32 2, %v7277_v63 }
 0x285   : > { %3910 = vmatprep.subr.bf16.mxu0 %v6118_v26  ;;  %v6190_v26 = vld [vmem:[#allocation5 + $0x340] ss:$16 sps:$4 sm:$0xff]   ;;  %v6237_v59 = vld [vmem:[#allocation5 + $0x42c] ss:$16 sps:$4 sm:$0xff]   ;;  %v6235_v1 = vld [vmem:[#allocation5 + $0x428] ss:$16 sps:$4 sm:$0xff]  }
 0x287   : > { %4075 = vmatpush1.bf16.msra.mxu1 %v6123_v31  ;;  %v6199_v31 = vld [vmem:[#allocation5 + $0x368] ss:$16 sps:$4 sm:$0xff]  }
 0x288   : > { %3911 = vmatpush1.bf16.msra.mxu0 %v6122_v29  ;;  %4076 = vmatprep.subr.bf16.mxu1 %v6126_v33  ;;  %v6201_v29 = vld [vmem:[#allocation5 + $0x36c] ss:$16 sps:$4 sm:$0xff]  }
 0x289   : > { %3912 = vmatprep.subr.bf16.mxu0 %v6124_v32  ;;  %v6204_v32 = vld [vmem:[#allocation5 + $0x384] ss:$16 sps:$4 sm:$0xff]   ;;  %v6207_v33 = vld [vmem:[#allocation5 + $0x38c] ss:$16 sps:$4 sm:$0xff]  }
 0x28b   : > { %4077 = vmatpush1.bf16.msra.mxu1 %v6129_v36  ;;  %v6205_v36 = vld [vmem:[#allocation5 + $0x388] ss:$16 sps:$4 sm:$0xff]  }
 0x28c   : > { %3913 = vmatpush1.bf16.msra.mxu0 %v6128_v34  ;;  %4087 = vmatprep.subr.bf16.mxu1 %v6135_v38  ;;  %v6202_v34 = vld [vmem:[#allocation5 + $0x380] ss:$16 sps:$4 sm:$0xff]   ;;  %v6213_v38 = vld [vmem:[#allocation5 + $0x3ac] ss:$16 sps:$4 sm:$0xff]  }
 0x28d   : > { %3923 = vmatprep.subr.bf16.mxu0 %v6132_v37  ;;  %v6210_v37 = vld [vmem:[#allocation5 + $0x3a4] ss:$16 sps:$4 sm:$0xff]  }
 0x28e   : > { %4079 = vmatmul.mubr.bf16.vlgmr.msra.gmra.mrb[0].mxu1 %v2316_v40 }
 0x28f   : > { %3915 = vmatmul.mubr.bf16.vlgmr.msra.gmra.mrb[0].mxu0 %v2316_v40  ;;  %4088 = vmatpush1.bf16.msra.mxu1 %v6133_v41  ;;  %v6211_v40 = vld [vmem:[#allocation5 + $0x3a8] ss:$16 sps:$4 sm:$0xff]   ;;  %v2271_v41 = vrot.slane %v7282_v7, %v2270_v35 }
 0x290   : > { %3924 = vmatpush1.bf16.msra.mxu0 %v6130_v39  ;;  %4089 = vmatprep.subr.bf16.mxu1 %v6141_v43  ;;  %v6208_v39 = vld [vmem:[#allocation5 + $0x3a0] ss:$16 sps:$4 sm:$0xff]   ;;  %v6216_v43 = vld [vmem:[#allocation5 + $0x3c4] ss:$16 sps:$4 sm:$0xff]  }
 0x291   : > { %3925 = vmatprep.subr.bf16.mxu0 %v6138_v42  ;;  %3955 = vmatprep.mubr.bf16.mxu0 %v2319_v11  ;;  %v2252_v42 = vld [vmem:[#allocation2 + $0x10] sm:$0xff] }
 0x292   : > { %4119 = vmatprep.mubr.bf16.mxu1 %v2319_v11  ;;  %v6244_v11 = vld [vmem:[#allocation5 + $0x460] ss:$16 sps:$4 sm:$0xff]  }
 0x293   : > { %4090 = vmatpush1.bf16.msra.mxu1 %v6139_v45  ;;  %v6214_v45 = vld [vmem:[#allocation5 + $0x3c0] ss:$16 sps:$4 sm:$0xff]  }
 0x294   : > { %3926 = vmatpush1.bf16.msra.mxu0 %v6136_v44  ;;  %4091 = vmatprep.subr.bf16.mxu1 %v6147_v46  ;;  %v6219_v44 = vld [vmem:[#allocation5 + $0x3cc] ss:$16 sps:$4 sm:$0xff]   ;;  %v6217_v46 = vld [vmem:[#allocation5 + $0x3c8] ss:$16 sps:$4 sm:$0xff]  }
 0x295   : > { %3927 = vmatprep.subr.bf16.mxu0 %v6144_v17  ;;  %v2302_v17 = vadd.f32 %v2271_v41, %v2252_v42  ;;  %v6288_v41 = vld [vmem:[#allocation5 + $0x544] ss:$16 sps:$4 sm:$0xff]   ;;  %v6291_v42 = vld [vmem:[#allocation5 + $0x54c] ss:$16 sps:$4 sm:$0xff]  }
 0x297   : > { %4092 = vmatpush1.bf16.msra.mxu1 %v6145_v47  ;;  %v6225_v47 = vld [vmem:[#allocation5 + $0x3ec] ss:$16 sps:$4 sm:$0xff]  }
 0x298   : > { %3928 = vmatpush1.bf16.msra.mxu0 %v6142_v20  ;;  %4093 = vmatprep.subr.bf16.mxu1 %v6153_v49  ;;  %v6222_v20 = vld [vmem:[#allocation5 + $0x3e4] ss:$16 sps:$4 sm:$0xff]   ;;  %v6220_v49 = vld [vmem:[#allocation5 + $0x3e0] ss:$16 sps:$4 sm:$0xff]  }
 0x299   : > { %3929 = vmatprep.subr.bf16.mxu0 %v6150_v48  ;;  %v2282_v48 = vsub.s32 5, %v7277_v63 }
 0x29b   : > { %4094 = vmatpush1.bf16.msra.mxu1 %v6151_v51  ;;  %v6223_v51 = vld [vmem:[#allocation5 + $0x3e8] ss:$16 sps:$4 sm:$0xff]  }
 0x29c   : > { %3930 = vmatpush1.bf16.msra.mxu0 %v6148_v50  ;;  %4095 = vmatprep.subr.bf16.mxu1 %v6159_v53  ;;  %v2310_v50 = vmax.f32 %v2302_v17, 0.0  ;;  %v6231_v53 = vld [vmem:[#allocation5 + $0x40c] ss:$16 sps:$4 sm:$0xff]  }
 0x29d   : > { %3931 = vmatprep.subr.bf16.mxu0 %v6156_v52  ;;  %v6228_v52 = vld [vmem:[#allocation5 + $0x404] ss:$16 sps:$4 sm:$0xff]   ;;  %v6297_v17 = vld [vmem:[#allocation5 + $0x56c] ss:$16 sps:$4 sm:$0xff]  }
 0x29f   : > { %4096 = vmatpush1.bf16.msra.mxu1 %v6157_v56  ;;  %v6226_v56 = vld [vmem:[#allocation5 + $0x400] ss:$16 sps:$4 sm:$0xff]  }
 0x2a0   : > { %3932 = vmatpush1.bf16.msra.mxu0 %v6154_v54  ;;  %4097 = vmatprep.subr.bf16.mxu1 %v6165_v58  ;;  %v2283_v54 = vrot.slane %v7282_v7, %v2282_v48  ;;  %v6229_v58 = vld [vmem:[#allocation5 + $0x408] ss:$16 sps:$4 sm:$0xff]   ;;  %v6243_v7 = vld [vmem:[#allocation5 + $0x44c] ss:$16 sps:$4 sm:$0xff]  }
 0x2a1   : > { %3933 = vmatprep.subr.bf16.mxu0 %v6162_v57  ;;  %v2318_v57 = vpack.c.bf16 %v2310_v50, %v2310_v50  ;;  %v6303_v48 = vld [vmem:[#allocation5 + $0x58c] ss:$16 sps:$4 sm:$0xff]   ;;  %v2278_v50 = vsub.s32 4, %v7277_v63 }
 0x2a3   : > { %4098 = vmatpush1.bf16.msra.mxu1 %v6163_v62  ;;  %v2255_v62 = vld [vmem:[#allocation2 + $0x28] sm:$0xff] }
 0x2a4   : > { %3934 = vmatpush1.bf16.msra.mxu0 %v6160_v61  ;;  %4099 = vmatprep.subr.bf16.mxu1 %v6171_v0  ;;  %v6234_v61 = vld [vmem:[#allocation5 + $0x424] ss:$16 sps:$4 sm:$0xff]   ;;  %v6232_v0 = vld [vmem:[#allocation5 + $0x420] ss:$16 sps:$4 sm:$0xff]  }
 0x2a5   : > { %3935 = vmatprep.subr.bf16.mxu0 %v6168_v60  ;;  %v2305_v60 = vadd.f32 %v2283_v54, %v2255_v62  ;;  %v6304_v54 = vld [vmem:[#allocation5 + $0x5a0] ss:$16 sps:$4 sm:$0xff]   ;;  %v6312_v62 = vld [vmem:[#allocation5 + $0x5c4] ss:$16 sps:$4 sm:$0xff]  }
 0x2a7   : > { %4100 = vmatpush1.bf16.msra.mxu1 %v6169_v5  ;;  %v2313_v3 = vmax.f32 %v2305_v60, 0.0  ;;  %v6315_v60 = vld [vmem:[#allocation5 + $0x5cc] ss:$16 sps:$4 sm:$0xff]  }
 0x2a8   : > { %3936 = vmatpush1.bf16.msra.mxu0 %v6166_v2  ;;  %4101 = vmatprep.subr.bf16.mxu1 %v6177_v8  ;;  %v6240_v2 = vld [vmem:[#allocation5 + $0x444] ss:$16 sps:$4 sm:$0xff]   ;;  %v6241_v8 = vld [vmem:[#allocation5 + $0x448] ss:$16 sps:$4 sm:$0xff]  }
 0x2a9   : > { %3937 = vmatprep.subr.bf16.mxu0 %v6174_v6  ;;  %v2321_v5 = vpack.c.bf16 %v2313_v3, %v2313_v3  ;;  %v6238_v6 = vld [vmem:[#allocation5 + $0x440] ss:$16 sps:$4 sm:$0xff]   ;;  %v2257_v3 = vld [vmem:[#allocation2 + $0x38] sm:$0xff] }
 0x2ab   : > { %4102 = vmatpush1.bf16.msra.mxu1 %v6175_v12  ;;  %v6247_v12 = vld [vmem:[#allocation5 + $0x468] ss:$16 sps:$4 sm:$0xff]  }
 0x2ac   : > { %3938 = vmatpush1.bf16.msra.mxu0 %v6172_v10  ;;  %4103 = vmatprep.subr.bf16.mxu1 %v6183_v14  ;;  %v6249_v10 = vld [vmem:[#allocation5 + $0x46c] ss:$16 sps:$4 sm:$0xff]  }
 0x2ad   : > { %3939 = vmatprep.subr.bf16.mxu0 %v6180_v13  ;;  %v6252_v13 = vld [vmem:[#allocation5 + $0x484] ss:$16 sps:$4 sm:$0xff]   ;;  %v6255_v14 = vld [vmem:[#allocation5 + $0x48c] ss:$16 sps:$4 sm:$0xff]  }
 0x2af   : > { %4104 = vmatpush1.bf16.msra.mxu1 %v6181_v18  ;;  %v6253_v18 = vld [vmem:[#allocation5 + $0x488] ss:$16 sps:$4 sm:$0xff]  }
 0x2b0   : > { %3940 = vmatpush1.bf16.msra.mxu0 %v6178_v16  ;;  %4105 = vmatprep.subr.bf16.mxu1 %v6189_v21  ;;  %v6250_v16 = vld [vmem:[#allocation5 + $0x480] ss:$16 sps:$4 sm:$0xff]   ;;  %v6261_v21 = vld [vmem:[#allocation5 + $0x4ac] ss:$16 sps:$4 sm:$0xff]  }
 0x2b1   : > { %3941 = vmatprep.subr.bf16.mxu0 %v6186_v19  ;;  %v6258_v19 = vld [vmem:[#allocation5 + $0x4a4] ss:$16 sps:$4 sm:$0xff]  }
 0x2b3   : > { %4106 = vmatpush1.bf16.msra.mxu1 %v6187_v23  ;;  %v6259_v23 = vld [vmem:[#allocation5 + $0x4a8] ss:$16 sps:$4 sm:$0xff]  }
 0x2b4   : > { %3942 = vmatpush1.bf16.msra.mxu0 %v6184_v22  ;;  %4107 = vmatprep.subr.bf16.mxu1 %v6195_v25  ;;  %v6256_v22 = vld [vmem:[#allocation5 + $0x4a0] ss:$16 sps:$4 sm:$0xff]   ;;  %v6267_v25 = vld [vmem:[#allocation5 + $0x4cc] ss:$16 sps:$4 sm:$0xff]  }
 0x2b5   : > { %3943 = vmatprep.subr.bf16.mxu0 %v6192_v24  ;;  %v6264_v24 = vld [vmem:[#allocation5 + $0x4c4] ss:$16 sps:$4 sm:$0xff]  }
 0x2b7   : > { %4108 = vmatpush1.bf16.msra.mxu1 %v6193_v27  ;;  %v6265_v27 = vld [vmem:[#allocation5 + $0x4c8] ss:$16 sps:$4 sm:$0xff]  }
 0x2b8   : > { %3944 = vmatpush1.bf16.msra.mxu0 %v6190_v26  ;;  %4109 = vmatprep.subr.bf16.mxu1 %v6201_v29  ;;  %v6262_v26 = vld [vmem:[#allocation5 + $0x4c0] ss:$16 sps:$4 sm:$0xff]   ;;  %v6273_v29 = vld [vmem:[#allocation5 + $0x4ec] ss:$16 sps:$4 sm:$0xff]  }
 0x2b9   : > { %3945 = vmatprep.subr.bf16.mxu0 %v6198_v28  ;;  %v6270_v28 = vld [vmem:[#allocation5 + $0x4e4] ss:$16 sps:$4 sm:$0xff]  }
 0x2bb   : > { %4110 = vmatpush1.bf16.msra.mxu1 %v6199_v31  ;;  %v6271_v31 = vld [vmem:[#allocation5 + $0x4e8] ss:$16 sps:$4 sm:$0xff]  }
 0x2bc   : > { %3946 = vmatpush1.bf16.msra.mxu0 %v6196_v30  ;;  %4111 = vmatprep.subr.bf16.mxu1 %v6207_v33  ;;  %v6268_v30 = vld [vmem:[#allocation5 + $0x4e0] ss:$16 sps:$4 sm:$0xff]   ;;  %v6279_v33 = vld [vmem:[#allocation5 + $0x50c] ss:$16 sps:$4 sm:$0xff]  }
 0x2bd   : > { %3947 = vmatprep.subr.bf16.mxu0 %v6204_v32  ;;  %v6276_v32 = vld [vmem:[#allocation5 + $0x504] ss:$16 sps:$4 sm:$0xff]  }
 0x2bf   : > { %4112 = vmatpush1.bf16.msra.mxu1 %v6205_v36  ;;  %v6277_v36 = vld [vmem:[#allocation5 + $0x508] ss:$16 sps:$4 sm:$0xff]  }
 0x2c0   : > { %3948 = vmatpush1.bf16.msra.mxu0 %v6202_v34  ;;  %4113 = vmatprep.subr.bf16.mxu1 %v6213_v38  ;;  %v6274_v34 = vld [vmem:[#allocation5 + $0x500] ss:$16 sps:$4 sm:$0xff]   ;;  %v6285_v38 = vld [vmem:[#allocation5 + $0x52c] ss:$16 sps:$4 sm:$0xff]  }
 0x2c1   : > { %3949 = vmatprep.subr.bf16.mxu0 %v6210_v37  ;;  %v6282_v37 = vld [vmem:[#allocation5 + $0x524] ss:$16 sps:$4 sm:$0xff]  }
 0x2c3   : > { %4114 = vmatpush1.bf16.msra.mxu1 %v6211_v40  ;;  %v6283_v40 = vld [vmem:[#allocation5 + $0x528] ss:$16 sps:$4 sm:$0xff]  }
 0x2c4   : > { %3950 = vmatpush1.bf16.msra.mxu0 %v6208_v39  ;;  %4115 = vmatprep.subr.bf16.mxu1 %v6219_v44  ;;  %v6280_v39 = vld [vmem:[#allocation5 + $0x520] ss:$16 sps:$4 sm:$0xff]   ;;  %v6289_v44 = vld [vmem:[#allocation5 + $0x548] ss:$16 sps:$4 sm:$0xff]  }
 0x2c5   : > { %3951 = vmatprep.subr.bf16.mxu0 %v6216_v43  ;;  %v6286_v43 = vld [vmem:[#allocation5 + $0x540] ss:$16 sps:$4 sm:$0xff]  }
 0x2c7   : > { %4116 = vmatpush1.bf16.msra.mxu1 %v6217_v46  ;;  %v6292_v46 = vld [vmem:[#allocation5 + $0x560] ss:$16 sps:$4 sm:$0xff]  }
 0x2c8   : > { %3952 = vmatpush1.bf16.msra.mxu0 %v6214_v45  ;;  %4117 = vmatprep.subr.bf16.mxu1 %v6225_v47  ;;  %v6294_v45 = vld [vmem:[#allocation5 + $0x564] ss:$16 sps:$4 sm:$0xff]  }
 0x2c9   : > { %3953 = vmatprep.subr.bf16.mxu0 %v6222_v20  ;;  %v6295_v20 = vld [vmem:[#allocation5 + $0x568] ss:$16 sps:$4 sm:$0xff]   ;;  %v6300_v47 = vld [vmem:[#allocation5 + $0x584] ss:$16 sps:$4 sm:$0xff]  }
 0x2cb   : > { %4118 = vmatpush1.bf16.msra.mxu1 %v6223_v51  ;;  %v6301_v51 = vld [vmem:[#allocation5 + $0x588] ss:$16 sps:$4 sm:$0xff]  }
 0x2cc   : > { %3954 = vmatpush1.bf16.msra.mxu0 %v6220_v49  ;;  %4128 = vmatprep.subr.bf16.mxu1 %v6231_v53  ;;  %v6298_v49 = vld [vmem:[#allocation5 + $0x580] ss:$16 sps:$4 sm:$0xff]   ;;  %v6309_v53 = vld [vmem:[#allocation5 + $0x5ac] ss:$16 sps:$4 sm:$0xff]  }
 0x2cd   : > { %3964 = vmatprep.subr.bf16.mxu0 %v6228_v52  ;;  %v6306_v52 = vld [vmem:[#allocation5 + $0x5a4] ss:$16 sps:$4 sm:$0xff]  }
 0x2ce   : > { %4120 = vmatmul.mubr.bf16.vlgmr.msra.gmra.mrb[0].mxu1 %v2318_v57 }
 0x2cf   : > { %3956 = vmatmul.mubr.bf16.vlgmr.msra.gmra.mrb[0].mxu0 %v2318_v57  ;;  %4129 = vmatpush1.bf16.msra.mxu1 %v6229_v58  ;;  %v6307_v57 = vld [vmem:[#allocation5 + $0x5a8] ss:$16 sps:$4 sm:$0xff]   ;;  %v7303_v58 = vld [vmem:[#allocation10] sm:$0xff] }
 0x2d0   : > { %3965 = vmatpush1.bf16.msra.mxu0 %v6226_v56  ;;  %4130 = vmatprep.subr.bf16.mxu1 %v6237_v59  ;;  %v2290_v56 = vsub.s32 7, %v7277_v63  ;;  %v2254_v59 = vld [vmem:[#allocation2 + $0x20] sm:$0xff] }
 0x2d1   : > { %3966 = vmatprep.subr.bf16.mxu0 %v6234_v61  ;;  %3996 = vmatprep.mubr.bf16.mxu0 %v2321_v5  ;;  %v2279_v61 = vrot.slane %v7303_v58, %v2278_v50  ;;  %v6375_v50 = vld [vmem:[#allocation5 + $0x70c] ss:$16 sps:$4 sm:$0xff]  }
 0x2d2   : > { %4160 = vmatprep.mubr.bf16.mxu1 %v2321_v5  ;;  %v6318_v5 = vld [vmem:[#allocation5 + $0x5e4] ss:$16 sps:$4 sm:$0xff]  }
 0x2d3   : > { %4131 = vmatpush1.bf16.msra.mxu1 %v6235_v1  ;;  %v2291_v1 = vrot.slane %v7303_v58, %v2290_v56  ;;  %v6376_v56 = vld [vmem:[#allocation5 + $0x720] ss:$16 sps:$4 sm:$0xff]  }
 0x2d4   : > { %3967 = vmatpush1.bf16.msra.mxu0 %v6232_v0  ;;  %4132 = vmatprep.subr.bf16.mxu1 %v6243_v7  ;;  %v6310_v0 = vld [vmem:[#allocation5 + $0x5c0] ss:$16 sps:$4 sm:$0xff]   ;;  %v6313_v7 = vld [vmem:[#allocation5 + $0x5c8] ss:$16 sps:$4 sm:$0xff]  }
 0x2d5   : > { %3968 = vmatprep.subr.bf16.mxu0 %v6240_v2  ;;  %v2304_v2 = vadd.f32 %v2279_v61, %v2254_v59  ;;  %v6384_v61 = vld [vmem:[#allocation5 + $0x744] ss:$16 sps:$4 sm:$0xff]   ;;  %v6387_v59 = vld [vmem:[#allocation5 + $0x74c] ss:$16 sps:$4 sm:$0xff]  }
 0x2d7   : > { %4133 = vmatpush1.bf16.msra.mxu1 %v6241_v8  ;;  %v2307_v8 = vadd.f32 %v2291_v1, %v2257_v3  ;;  %v6393_v1 = vld [vmem:[#allocation5 + $0x76c] ss:$16 sps:$4 sm:$0xff]   ;;  %v6391_v3 = vld [vmem:[#allocation5 + $0x768] ss:$16 sps:$4 sm:$0xff]  }
 0x2d8   : > { %3969 = vmatpush1.bf16.msra.mxu0 %v6238_v6  ;;  %4134 = vmatprep.subr.bf16.mxu1 %v6249_v10  ;;  %v6321_v6 = vld [vmem:[#allocation5 + $0x5ec] ss:$16 sps:$4 sm:$0xff]   ;;  %v2312_v10 = vmax.f32 %v2304_v2, 0.0  ;;  %v6388_v2 = vld [vmem:[#allocation5 + $0x760] ss:$16 sps:$4 sm:$0xff]  }
 0x2d9   : > { %3970 = vmatprep.subr.bf16.mxu0 %v6246_v9  ;;  %v6316_v9 = vld [vmem:[#allocation5 + $0x5e0] ss:$16 sps:$4 sm:$0xff]  }
 0x2db   : > { %4135 = vmatpush1.bf16.msra.mxu1 %v6247_v12  ;;  %v6324_v12 = vld [vmem:[#allocation5 + $0x604] ss:$16 sps:$4 sm:$0xff]  }
 0x2dc   : > { %3971 = vmatpush1.bf16.msra.mxu0 %v6244_v11  ;;  %4136 = vmatprep.subr.bf16.mxu1 %v6255_v14  ;;  %v6319_v11 = vld [vmem:[#allocation5 + $0x5e8] ss:$16 sps:$4 sm:$0xff]   ;;  %v6322_v14 = vld [vmem:[#allocation5 + $0x600] ss:$16 sps:$4 sm:$0xff]  }
 0x2dd   : > { %3972 = vmatprep.subr.bf16.mxu0 %v6252_v13  ;;  %v6327_v13 = vld [vmem:[#allocation5 + $0x60c] ss:$16 sps:$4 sm:$0xff]  }
 0x2df   : > { %4137 = vmatpush1.bf16.msra.mxu1 %v6253_v18  ;;  %v6325_v18 = vld [vmem:[#allocation5 + $0x608] ss:$16 sps:$4 sm:$0xff]  }
 0x2e0   : > { %3973 = vmatpush1.bf16.msra.mxu0 %v6250_v16  ;;  %4138 = vmatprep.subr.bf16.mxu1 %v6261_v21  ;;  %v2315_v16 = vmax.f32 %v2307_v8, 0.0  ;;  %v6330_v21 = vld [vmem:[#allocation5 + $0x624] ss:$16 sps:$4 sm:$0xff]   ;;  %v6394_v8 = vld [vmem:[#allocation5 + $0x780] ss:$16 sps:$4 sm:$0xff]  }
 0x2e1   : > { %3974 = vmatprep.subr.bf16.mxu0 %v6258_v19  ;;  %v2320_v19 = vpack.c.bf16 %v2312_v10, %v2312_v10  ;;  %v6402_v10 = vld [vmem:[#allocation5 + $0x7a4] ss:$16 sps:$4 sm:$0xff]  }
 0x2e3   : > { %4139 = vmatpush1.bf16.msra.mxu1 %v6259_v23  ;;  %v6328_v23 = vld [vmem:[#allocation5 + $0x620] ss:$16 sps:$4 sm:$0xff]  }
 0x2e4   : > { %3975 = vmatpush1.bf16.msra.mxu0 %v6256_v22  ;;  %4140 = vmatprep.subr.bf16.mxu1 %v6267_v25  ;;  %v6333_v22 = vld [vmem:[#allocation5 + $0x62c] ss:$16 sps:$4 sm:$0xff]   ;;  %v2323_v25 = vpack.c.bf16 %v2315_v16, %v2315_v16  ;;  %v2256_v16 = vld [vmem:[#allocation2 + $0x30] sm:$0xff] }
 0x2e5   : > { %3976 = vmatprep.subr.bf16.mxu0 %v6264_v24  ;;  %v6331_v24 = vld [vmem:[#allocation5 + $0x628] ss:$16 sps:$4 sm:$0xff]  }
 0x2e7   : > { %4141 = vmatpush1.bf16.msra.mxu1 %v6265_v27  ;;  %v6339_v27 = vld [vmem:[#allocation5 + $0x64c] ss:$16 sps:$4 sm:$0xff]  }
 0x2e8   : > { %3977 = vmatpush1.bf16.msra.mxu0 %v6262_v26  ;;  %4142 = vmatprep.subr.bf16.mxu1 %v6273_v29  ;;  %v6336_v26 = vld [vmem:[#allocation5 + $0x644] ss:$16 sps:$4 sm:$0xff]   ;;  %v6337_v29 = vld [vmem:[#allocation5 + $0x648] ss:$16 sps:$4 sm:$0xff]  }
 0x2e9   : > { %3978 = vmatprep.subr.bf16.mxu0 %v6270_v28  ;;  %v6334_v28 = vld [vmem:[#allocation5 + $0x640] ss:$16 sps:$4 sm:$0xff]  }
 0x2eb   : > { %4143 = vmatpush1.bf16.msra.mxu1 %v6271_v31  ;;  %v6345_v31 = vld [vmem:[#allocation5 + $0x66c] ss:$16 sps:$4 sm:$0xff]  }
 0x2ec   : > { %3979 = vmatpush1.bf16.msra.mxu0 %v6268_v30  ;;  %4144 = vmatprep.subr.bf16.mxu1 %v6279_v33  ;;  %v6342_v30 = vld [vmem:[#allocation5 + $0x664] ss:$16 sps:$4 sm:$0xff]   ;;  %v6343_v33 = vld [vmem:[#allocation5 + $0x668] ss:$16 sps:$4 sm:$0xff]  }
 0x2ed   : > { %3980 = vmatprep.subr.bf16.mxu0 %v6276_v32  ;;  %v6340_v32 = vld [vmem:[#allocation5 + $0x660] ss:$16 sps:$4 sm:$0xff]  }
 0x2ef   : > { %4145 = vmatpush1.bf16.msra.mxu1 %v6277_v36  ;;  %v6351_v36 = vld [vmem:[#allocation5 + $0x68c] ss:$16 sps:$4 sm:$0xff]  }
 0x2f0   : > { %3981 = vmatpush1.bf16.msra.mxu0 %v6274_v34  ;;  %4146 = vmatprep.subr.bf16.mxu1 %v6285_v38  ;;  %v6348_v34 = vld [vmem:[#allocation5 + $0x684] ss:$16 sps:$4 sm:$0xff]   ;;  %v6349_v38 = vld [vmem:[#allocation5 + $0x688] ss:$16 sps:$4 sm:$0xff]  }
 0x2f1   : > { %3982 = vmatprep.subr.bf16.mxu0 %v6282_v37  ;;  %v6346_v37 = vld [vmem:[#allocation5 + $0x680] ss:$16 sps:$4 sm:$0xff]  }
 0x2f3   : > { %4147 = vmatpush1.bf16.msra.mxu1 %v6283_v40  ;;  %v6357_v40 = vld [vmem:[#allocation5 + $0x6ac] ss:$16 sps:$4 sm:$0xff]  }
 0x2f4   : > { %3983 = vmatpush1.bf16.msra.mxu0 %v6280_v39  ;;  %4148 = vmatprep.subr.bf16.mxu1 %v6291_v42  ;;  %v6354_v39 = vld [vmem:[#allocation5 + $0x6a4] ss:$16 sps:$4 sm:$0xff]   ;;  %v6355_v42 = vld [vmem:[#allocation5 + $0x6a8] ss:$16 sps:$4 sm:$0xff]  }
 0x2f5   : > { %3984 = vmatprep.subr.bf16.mxu0 %v6288_v41  ;;  %v6352_v41 = vld [vmem:[#allocation5 + $0x6a0] ss:$16 sps:$4 sm:$0xff]  }
 0x2f7   : > { %4149 = vmatpush1.bf16.msra.mxu1 %v6289_v44  ;;  %v6363_v44 = vld [vmem:[#allocation5 + $0x6cc] ss:$16 sps:$4 sm:$0xff]  }
 0x2f8   : > { %3985 = vmatpush1.bf16.msra.mxu0 %v6286_v43  ;;  %4150 = vmatprep.subr.bf16.mxu1 %v6297_v17  ;;  %v6360_v43 = vld [vmem:[#allocation5 + $0x6c4] ss:$16 sps:$4 sm:$0xff]   ;;  %v6361_v17 = vld [vmem:[#allocation5 + $0x6c8] ss:$16 sps:$4 sm:$0xff]  }
 0x2f9   : > { %3986 = vmatprep.subr.bf16.mxu0 %v6294_v45  ;;  %v6358_v45 = vld [vmem:[#allocation5 + $0x6c0] ss:$16 sps:$4 sm:$0xff]  }
 0x2fb   : > { %4151 = vmatpush1.bf16.msra.mxu1 %v6295_v20  ;;  %v6369_v20 = vld [vmem:[#allocation5 + $0x6ec] ss:$16 sps:$4 sm:$0xff]  }
 0x2fc   : > { %3987 = vmatpush1.bf16.msra.mxu0 %v6292_v46  ;;  %4152 = vmatprep.subr.bf16.mxu1 %v6303_v48  ;;  %v6366_v46 = vld [vmem:[#allocation5 + $0x6e4] ss:$16 sps:$4 sm:$0xff]   ;;  %v6367_v48 = vld [vmem:[#allocation5 + $0x6e8] ss:$16 sps:$4 sm:$0xff]  }
 0x2fd   : > { %3988 = vmatprep.subr.bf16.mxu0 %v6300_v47  ;;  %v6364_v47 = vld [vmem:[#allocation5 + $0x6e0] ss:$16 sps:$4 sm:$0xff]  }
 0x2ff   : > { %4153 = vmatpush1.bf16.msra.mxu1 %v6301_v51  ;;  %v6370_v51 = vld [vmem:[#allocation5 + $0x700] ss:$16 sps:$4 sm:$0xff]  }
 0x300   : > { %3989 = vmatpush1.bf16.msra.mxu0 %v6298_v49  ;;  %4154 = vmatprep.subr.bf16.mxu1 %v6309_v53  ;;  %v6372_v49 = vld [vmem:[#allocation5 + $0x704] ss:$16 sps:$4 sm:$0xff]  }
 0x301   : > { %3990 = vmatprep.subr.bf16.mxu0 %v6306_v52  ;;  %v6373_v52 = vld [vmem:[#allocation5 + $0x708] ss:$16 sps:$4 sm:$0xff]   ;;  %v6378_v53 = vld [vmem:[#allocation5 + $0x724] ss:$16 sps:$4 sm:$0xff]  }
 0x303   : > { %4155 = vmatpush1.bf16.msra.mxu1 %v6307_v57  ;;  %v6379_v57 = vld [vmem:[#allocation5 + $0x728] ss:$16 sps:$4 sm:$0xff]  }
 0x304   : > { %3991 = vmatpush1.bf16.msra.mxu0 %v6304_v54  ;;  %4156 = vmatprep.subr.bf16.mxu1 %v6315_v60  ;;  %v6381_v54 = vld [vmem:[#allocation5 + $0x72c] ss:$16 sps:$4 sm:$0xff]   ;;  %v6385_v60 = vld [vmem:[#allocation5 + $0x748] ss:$16 sps:$4 sm:$0xff]  }
 0x305   : > { %3992 = vmatprep.subr.bf16.mxu0 %v6312_v62  ;;  %v6382_v62 = vld [vmem:[#allocation5 + $0x740] ss:$16 sps:$4 sm:$0xff]  }
 0x307   : > { %4157 = vmatpush1.bf16.msra.mxu1 %v6313_v7  ;;  %v6396_v7 = vld [vmem:[#allocation5 + $0x784] ss:$16 sps:$4 sm:$0xff]  }
 0x308   : > { %3993 = vmatpush1.bf16.msra.mxu0 %v6310_v0  ;;  %4158 = vmatprep.subr.bf16.mxu1 %v6321_v6  ;;  %v6390_v0 = vld [vmem:[#allocation5 + $0x764] ss:$16 sps:$4 sm:$0xff]   ;;  %v2286_v6 = vsub.s32 6, %v7277_v63  ;;  %v6528_v63 = vld [vmem:[#allocation8 + $0x78] sm:$0xff]  }
 0x309   : > { %3994 = vmatprep.subr.bf16.mxu0 %v6318_v5  ;;  %v6399_v5 = vld [vmem:[#allocation5 + $0x78c] ss:$16 sps:$4 sm:$0xff]  }
 0x30b   : > { %4159 = vmatpush1.bf16.msra.mxu1 %v6319_v11  ;;  %v6405_v11 = vld [vmem:[#allocation5 + $0x7ac] ss:$16 sps:$4 sm:$0xff]  }
 0x30c   : > { %3995 = vmatpush1.bf16.msra.mxu0 %v6316_v9  ;;  %4169 = vmatprep.subr.bf16.mxu1 %v6327_v13  ;;  %v6397_v9 = vld [vmem:[#allocation5 + $0x788] ss:$16 sps:$4 sm:$0xff]   ;;  %v6400_v13 = vld [vmem:[#allocation5 + $0x7a0] ss:$16 sps:$4 sm:$0xff]  }
 0x30d   : > { %4005 = vmatprep.subr.bf16.mxu0 %v6324_v12  ;;  %v2287_v12 = vrot.slane %v7303_v58, %v2286_v6  ;;  %v6412_v58 = vld [vmem:[#allocation5 + $0x7e0] ss:$16 sps:$4 sm:$0xff]   ;;  %v6520_v6 = vld [vmem:[#allocation8 + $0x58] sm:$0xff]  }
 0x30e   : > { %4161 = vmatmul.mubr.bf16.vlgmr.msra.gmra.mrb[0].mxu1 %v2320_v19 }
 0x30f   : > { %3997 = vmatmul.mubr.bf16.vlgmr.msra.gmra.mrb[0].mxu0 %v2320_v19  ;;  %4170 = vmatpush1.bf16.msra.mxu1 %v6325_v18  ;;  %v6408_v18 = vld [vmem:[#allocation5 + $0x7c4] ss:$16 sps:$4 sm:$0xff]   ;;  %v6411_v19 = vld [vmem:[#allocation5 + $0x7cc] ss:$16 sps:$4 sm:$0xff]  }
 0x310   : > { %4006 = vmatpush1.bf16.msra.mxu0 %v6322_v14  ;;  %4171 = vmatprep.subr.bf16.mxu1 %v6333_v22  ;;  %v6403_v14 = vld [vmem:[#allocation5 + $0x7a8] ss:$16 sps:$4 sm:$0xff]   ;;  %v6406_v22 = vld [vmem:[#allocation5 + $0x7c0] ss:$16 sps:$4 sm:$0xff]  }
 0x311   : > { %4007 = vmatprep.subr.bf16.mxu0 %v6330_v21  ;;  %4037 = vmatprep.mubr.bf16.mxu0 %v2323_v25  ;;  %v2306_v21 = vadd.f32 %v2287_v12, %v2256_v16  ;;  %v6525_v12 = vld [vmem:[#allocation8 + $0x28] sm:$0xff]  }
 0x312   : > { %4201 = vmatprep.mubr.bf16.mxu1 %v2323_v25  ;;  %v6417_v25 = vld [vmem:[#allocation5 + $0x7ec] ss:$16 sps:$4 sm:$0xff]  }
 0x313   : > { %4172 = vmatpush1.bf16.msra.mxu1 %v6331_v24  ;;  %v6414_v24 = vld [vmem:[#allocation5 + $0x7e4] ss:$16 sps:$4 sm:$0xff]  }
 0x314   : > { %4008 = vmatpush1.bf16.msra.mxu0 %v6328_v23  ;;  %4173 = vmatprep.subr.bf16.mxu1 %v6339_v27  ;;  %v6409_v23 = vld [vmem:[#allocation5 + $0x7c8] ss:$16 sps:$4 sm:$0xff]  }
 0x315   : > { %4009 = vmatprep.subr.bf16.mxu0 %v6336_v26  ;;  %v2314_v26 = vmax.f32 %v2306_v21, 0.0  ;;  %v6415_v27 = vld [vmem:[#allocation5 + $0x7e8] ss:$16 sps:$4 sm:$0xff]  }
 0x317   : > { %4174 = vmatpush1.bf16.msra.mxu1 %v6337_v29  ;;  %v2322_v29 = vpack.c.bf16 %v2314_v26, %v2314_v26 }
 0x318   : > { %4010 = vmatpush1.bf16.msra.mxu0 %v6334_v28  ;;  %4175 = vmatprep.subr.bf16.mxu1 %v6345_v31  ;;  %v6420_v28 = vld [vmem:[#allocation7 + $0x4] ss:$8 sps:$4 sm:$0xff]   ;;  %v6423_v31 = vld [vmem:[#allocation7 + $0x14] ss:$8 sps:$4 sm:$0xff]  }
 0x319   : > { %4011 = vmatprep.subr.bf16.mxu0 %v6342_v30  ;;  %v6418_v30 = vld [vmem:[#allocation7] ss:$8 sps:$4 sm:$0xff]  }
 0x31b   : > { %4176 = vmatpush1.bf16.msra.mxu1 %v6343_v33  ;;  %v6426_v33 = vld [vmem:[#allocation7 + $0x24] ss:$8 sps:$4 sm:$0xff]  }
 0x31c   : > { %4012 = vmatpush1.bf16.msra.mxu0 %v6340_v32  ;;  %4177 = vmatprep.subr.bf16.mxu1 %v6351_v36  ;;  %v6421_v32 = vld [vmem:[#allocation7 + $0x10] ss:$8 sps:$4 sm:$0xff]   ;;  %v6429_v36 = vld [vmem:[#allocation7 + $0x34] ss:$8 sps:$4 sm:$0xff]  }
 0x31d   : > { %4013 = vmatprep.subr.bf16.mxu0 %v6348_v34  ;;  %v6424_v34 = vld [vmem:[#allocation7 + $0x20] ss:$8 sps:$4 sm:$0xff]  }
 0x31f   : > { %4178 = vmatpush1.bf16.msra.mxu1 %v6349_v38  ;;  %v6432_v38 = vld [vmem:[#allocation7 + $0x44] ss:$8 sps:$4 sm:$0xff]  }
 0x320   : > { %4014 = vmatpush1.bf16.msra.mxu0 %v6346_v37  ;;  %4179 = vmatprep.subr.bf16.mxu1 %v6357_v40  ;;  %v6427_v37 = vld [vmem:[#allocation7 + $0x30] ss:$8 sps:$4 sm:$0xff]   ;;  %v6435_v40 = vld [vmem:[#allocation7 + $0x54] ss:$8 sps:$4 sm:$0xff]  }
 0x321   : > { %4015 = vmatprep.subr.bf16.mxu0 %v6354_v39  ;;  %v6430_v39 = vld [vmem:[#allocation7 + $0x40] ss:$8 sps:$4 sm:$0xff]  }
 0x323   : > { %4180 = vmatpush1.bf16.msra.mxu1 %v6355_v42  ;;  %v6438_v42 = vld [vmem:[#allocation7 + $0x64] ss:$8 sps:$4 sm:$0xff]  }
 0x324   : > { %4016 = vmatpush1.bf16.msra.mxu0 %v6352_v41  ;;  %4181 = vmatprep.subr.bf16.mxu1 %v6363_v44  ;;  %v6433_v41 = vld [vmem:[#allocation7 + $0x50] ss:$8 sps:$4 sm:$0xff]   ;;  %v6441_v44 = vld [vmem:[#allocation7 + $0x74] ss:$8 sps:$4 sm:$0xff]  }
 0x325   : > { %4017 = vmatprep.subr.bf16.mxu0 %v6360_v43  ;;  %v6436_v43 = vld [vmem:[#allocation7 + $0x60] ss:$8 sps:$4 sm:$0xff]  }
 0x327   : > { %4182 = vmatpush1.bf16.msra.mxu1 %v6361_v17  ;;  %v6444_v17 = vld [vmem:[#allocation7 + $0x84] ss:$8 sps:$4 sm:$0xff]  }
 0x328   : > { %4018 = vmatpush1.bf16.msra.mxu0 %v6358_v45  ;;  %4183 = vmatprep.subr.bf16.mxu1 %v6369_v20  ;;  %v6439_v45 = vld [vmem:[#allocation7 + $0x70] ss:$8 sps:$4 sm:$0xff]   ;;  %v6447_v20 = vld [vmem:[#allocation7 + $0x94] ss:$8 sps:$4 sm:$0xff]  }
 0x329   : > { %4019 = vmatprep.subr.bf16.mxu0 %v6366_v46  ;;  %v6442_v46 = vld [vmem:[#allocation7 + $0x80] ss:$8 sps:$4 sm:$0xff]  }
 0x32b   : > { %4184 = vmatpush1.bf16.msra.mxu1 %v6367_v48  ;;  %v6450_v48 = vld [vmem:[#allocation7 + $0xa4] ss:$8 sps:$4 sm:$0xff]  }
 0x32c   : > { %4020 = vmatpush1.bf16.msra.mxu0 %v6364_v47  ;;  %4185 = vmatprep.subr.bf16.mxu1 %v6375_v50  ;;  %v6445_v47 = vld [vmem:[#allocation7 + $0x90] ss:$8 sps:$4 sm:$0xff]   ;;  %v6453_v50 = vld [vmem:[#allocation7 + $0xb4] ss:$8 sps:$4 sm:$0xff]  }
 0x32d   : > { %4021 = vmatprep.subr.bf16.mxu0 %v6372_v49  ;;  %v6448_v49 = vld [vmem:[#allocation7 + $0xa0] ss:$8 sps:$4 sm:$0xff]  }
 0x32f   : > { %4186 = vmatpush1.bf16.msra.mxu1 %v6373_v52  ;;  %v6456_v52 = vld [vmem:[#allocation7 + $0xc4] ss:$8 sps:$4 sm:$0xff]  }
 0x330   : > { %4022 = vmatpush1.bf16.msra.mxu0 %v6370_v51  ;;  %4187 = vmatprep.subr.bf16.mxu1 %v6381_v54  ;;  %v6451_v51 = vld [vmem:[#allocation7 + $0xb0] ss:$8 sps:$4 sm:$0xff]   ;;  %v6459_v54 = vld [vmem:[#allocation7 + $0xd4] ss:$8 sps:$4 sm:$0xff]  }
 0x331   : > { %4023 = vmatprep.subr.bf16.mxu0 %v6378_v53  ;;  %v6454_v53 = vld [vmem:[#allocation7 + $0xc0] ss:$8 sps:$4 sm:$0xff]  }
 0x333   : > { %4188 = vmatpush1.bf16.msra.mxu1 %v6379_v57  ;;  %v6462_v57 = vld [vmem:[#allocation7 + $0xe4] ss:$8 sps:$4 sm:$0xff]  }
 0x334   : > { %4024 = vmatpush1.bf16.msra.mxu0 %v6376_v56  ;;  %4189 = vmatprep.subr.bf16.mxu1 %v6387_v59  ;;  %v6457_v56 = vld [vmem:[#allocation7 + $0xd0] ss:$8 sps:$4 sm:$0xff]   ;;  %v6465_v59 = vld [vmem:[#allocation7 + $0xf4] ss:$8 sps:$4 sm:$0xff]  }
 0x335   : > { %4025 = vmatprep.subr.bf16.mxu0 %v6384_v61  ;;  %v6460_v61 = vld [vmem:[#allocation7 + $0xe0] ss:$8 sps:$4 sm:$0xff]  }
 0x337   : > { %4190 = vmatpush1.bf16.msra.mxu1 %v6385_v60  ;;  %v6468_v60 = vld [vmem:[#allocation7 + $0x104] ss:$8 sps:$4 sm:$0xff]  }
 0x338   : > { %4026 = vmatpush1.bf16.msra.mxu0 %v6382_v62  ;;  %4191 = vmatprep.subr.bf16.mxu1 %v6393_v1  ;;  %v6463_v62 = vld [vmem:[#allocation7 + $0xf0] ss:$8 sps:$4 sm:$0xff]   ;;  %v6515_v1 = vld [vmem:[#allocation8] sm:$0xff]  }
 0x339   : > { %4027 = vmatprep.subr.bf16.mxu0 %v6390_v0  ;;  %v6514_v0 = vld [vmem:[#allocation8 + $0x40] sm:$0xff]  }
 0x33b   : > { %4192 = vmatpush1.bf16.msra.mxu1 %v6391_v3  ;;  %v6517_v3 = vld [vmem:[#allocation8 + $0x8] sm:$0xff]  }
 0x33c   : > { %4028 = vmatpush1.bf16.msra.mxu0 %v6388_v2  ;;  %4193 = vmatprep.subr.bf16.mxu1 %v6399_v5  ;;  %v6516_v2 = vld [vmem:[#allocation8 + $0x48] sm:$0xff]   ;;  %v6519_v5 = vld [vmem:[#allocation8 + $0x10] sm:$0xff]  }
 0x33d   : > { %4029 = vmatprep.subr.bf16.mxu0 %v6396_v7  ;;  %v6518_v7 = vld [vmem:[#allocation8 + $0x50] sm:$0xff]  }
 0x33f   : > { %4194 = vmatpush1.bf16.msra.mxu1 %v6397_v9  ;;  %v6522_v9 = vld [vmem:[#allocation8 + $0x60] sm:$0xff]  }
 0x340   : > { %4030 = vmatpush1.bf16.msra.mxu0 %v6394_v8  ;;  %4195 = vmatprep.subr.bf16.mxu1 %v6405_v11  ;;  %v6521_v8 = vld [vmem:[#allocation8 + $0x18] sm:$0xff]   ;;  %v6524_v11 = vld [vmem:[#allocation8 + $0x68] sm:$0xff]  }
 0x341   : > { %4031 = vmatprep.subr.bf16.mxu0 %v6402_v10  ;;  %v6523_v10 = vld [vmem:[#allocation8 + $0x20] sm:$0xff]  }
 0x343   : > { %4196 = vmatpush1.bf16.msra.mxu1 %v6403_v14 }
 0x344   : > { %4032 = vmatpush1.bf16.msra.mxu0 %v6400_v13  ;;  %4197 = vmatprep.subr.bf16.mxu1 %v6411_v19  ;;  %v7309_v13 = vld [vmem:[#allocation10 + $0x8] sm:$0xf] }
 0x345   : > { %4033 = vmatprep.subr.bf16.mxu0 %v6408_v18  ;;  %v2585_v14 = vrot.slane %v7309_v13, %v7287_v15  ;;  %v2589_v16 = vrot.slane %v7309_v13, %v7280_v4  ;;  %v2597_v18 = vrot.slane %v7309_v13, %v2274_v55 }
 0x347   : > { %4198 = vmatpush1.bf16.msra.mxu1 %v6409_v23 }
 0x348   : > { %4034 = vmatpush1.bf16.msra.mxu0 %v6406_v22  ;;  %4199 = vmatprep.subr.bf16.mxu1 %v6417_v25 }
 0x349   : > { %4035 = vmatprep.subr.bf16.mxu0 %v6414_v24 }
 0x34b   : > { %4200 = vmatpush1.bf16.msra.mxu1 %v6415_v27 }
 0x34c   : > { %4036 = vmatpush1.bf16.msra.mxu0 %v6412_v58  ;;  %5829 = vmatprep.subr.bf16.mxu1 %v6514_v0  ;;  %v2593_v0 = vrot.slane %v7309_v13, %v2270_v35  ;;  %v6529_v35 = vld [vmem:[#allocation8 + $0x38] sm:$0xff]  }
 0x34d   : > { %4614 = vmatprep.subr.bf16.mxu0 %v6420_v28 }
 0x34e   : > { %4202 = vmatmul.mubr.bf16.vlgmr.msra.gmra.mrb[0].mxu1 %v2322_v29 }
 0x34f   : > { %4038 = vmatmul.mubr.bf16.vlgmr.msra.gmra.mrb[0].mxu0 %v2322_v29  ;;  %5830 = vmatpush3.bf16.msra.mxu1 %v6515_v1  ;;  %v6510_v1 = vld [vmem:[#allocation7 + $0x1e4] ss:$8 sps:$4 sm:$0xff]  }
 0x350   : > { %4615 = vmatpush1.bf16.msra.mxu0 %v6418_v30  ;;  %5831 = vmatprep.subr.bf16.mxu1 %v6516_v2  ;;  %v6508_v2 = vld [vmem:[#allocation7 + $0x1e0] ss:$8 sps:$4 sm:$0xff]  }
 0x351   : > { %4616 = vmatprep.subr.bf16.mxu0 %v6423_v31 }
 0x353   : > { %5832 = vmatpush3.bf16.msra.mxu1 %v6517_v3 }
 0x354   : > { %4617 = vmatpush1.bf16.msra.mxu0 %v6421_v32  ;;  %5833 = vmatprep.subr.bf16.mxu1 %v6518_v7  ;;  %v6513_v7 = vld [vmem:[#allocation7 + $0x1f4] ss:$8 sps:$4 sm:$0xff]  }
 0x355   : > { %4618 = vmatprep.subr.bf16.mxu0 %v6426_v33 }
 0x357   : > { %5834 = vmatpush3.bf16.msra.mxu1 %v6519_v5  ;;  %v6511_v5 = vld [vmem:[#allocation7 + $0x1f0] ss:$8 sps:$4 sm:$0xff]  }
 0x358   : > { %4619 = vmatpush1.bf16.msra.mxu0 %v6424_v34  ;;  %5835 = vmatprep.subr.bf16.mxu1 %v6520_v6  ;;  %v6466_v34 = vld [vmem:[#allocation7 + $0x100] ss:$8 sps:$4 sm:$0xff]  }
 0x359   : > { %4620 = vmatprep.subr.bf16.mxu0 %v6429_v36 }
 0x35b   : > { %5836 = vmatpush3.bf16.msra.mxu1 %v6521_v8 }
 0x35c   : > { %4621 = vmatpush1.bf16.msra.mxu0 %v6427_v37  ;;  %5837 = vmatprep.subr.bf16.mxu1 %v6522_v9  ;;  %v6471_v37 = vld [vmem:[#allocation7 + $0x114] ss:$8 sps:$4 sm:$0xff]  }
 0x35d   : > { %4622 = vmatprep.subr.bf16.mxu0 %v6432_v38  ;;  %v6469_v38 = vld [vmem:[#allocation7 + $0x110] ss:$8 sps:$4 sm:$0xff]  }
 0x35e   : > { %v6526_v9 = vld [vmem:[#allocation8 + $0x70] sm:$0xff]  }
 0x35f   : > { %5838 = vmatpush3.bf16.msra.mxu1 %v6523_v10  ;;  %v6527_v10 = vld [vmem:[#allocation8 + $0x30] sm:$0xff]  }
 0x360   : > { %4623 = vmatpush1.bf16.msra.mxu0 %v6430_v39  ;;  %5839 = vmatprep.subr.bf16.mxu1 %v6524_v11  ;;  %v6474_v39 = vld [vmem:[#allocation7 + $0x124] ss:$8 sps:$4 sm:$0xff]   ;;  %v6747_v11 = vmov 0.0  }
 0x361   : > { %4624 = vmatprep.subr.bf16.mxu0 %v6435_v40  ;;  %v6472_v40 = vld [vmem:[#allocation7 + $0x120] ss:$8 sps:$4 sm:$0xff]  }
 0x363   : > { %5840 = vmatpush3.bf16.msra.mxu1 %v6525_v12  ;;  %v4282_v12 = vld [vmem:[#allocation10 + $0xc] sm:$0x3] }
 0x364   : > { %4625 = vmatpush1.bf16.msra.mxu0 %v6433_v41  ;;  %v6477_v41 = vld [vmem:[#allocation7 + $0x134] ss:$8 sps:$4 sm:$0xff]   ;;  %5841 = vmatprep.subr.bf16.mxu1 %v6526_v9  ;;  %v4287_v13 = vrot.slane %v4282_v12, %v7287_v15 }
 0x365   : > { %4626 = vmatprep.subr.bf16.mxu0 %v6438_v42  ;;  %v6475_v42 = vld [vmem:[#allocation7 + $0x130] ss:$8 sps:$4 sm:$0xff]  }
 0x366   : > { %v6532_v15 = vld [vmem:[#allocation8 + $0x90] sm:$0xff]  }
 0x367   : > { %5842 = vmatpush3.bf16.msra.mxu1 %v6527_v10 }
 0x368   : > { %4627 = vmatpush1.bf16.msra.mxu0 %v6436_v43  ;;  %v6480_v43 = vld [vmem:[#allocation7 + $0x144] ss:$8 sps:$4 sm:$0xff]   ;;  %5843 = vmatprep.subr.bf16.mxu1 %v6528_v63 }
 0x369   : > { %4628 = vmatprep.subr.bf16.mxu0 %v6441_v44  ;;  %v6478_v44 = vld [vmem:[#allocation7 + $0x140] ss:$8 sps:$4 sm:$0xff]  }
 0x36b   : > { %5844 = vmatpush3.bf16.msra.mxu1 %v6529_v35 }
 0x36c   : > { %4629 = vmatpush1.bf16.msra.mxu0 %v6439_v45  ;;  %v6483_v45 = vld [vmem:[#allocation7 + $0x154] ss:$8 sps:$4 sm:$0xff]   ;;  %5869 = vmatprep.subr.bf16.mxu1 %v6747_v11 }
 0x36d   : > { %4630 = vmatprep.subr.bf16.mxu0 %v6444_v17  ;;  %v6481_v17 = vld [vmem:[#allocation7 + $0x150] ss:$8 sps:$4 sm:$0xff]  }
 0x370   : > { %4631 = vmatpush1.bf16.msra.mxu0 %v6442_v46  ;;  %v6486_v46 = vld [vmem:[#allocation7 + $0x164] ss:$8 sps:$4 sm:$0xff]  }
 0x371   : > { %4632 = vmatprep.subr.bf16.mxu0 %v6447_v20  ;;  %v6484_v20 = vld [vmem:[#allocation7 + $0x160] ss:$8 sps:$4 sm:$0xff]  }
 0x374   : > { %4633 = vmatpush1.bf16.msra.mxu0 %v6445_v47  ;;  %v6489_v47 = vld [vmem:[#allocation7 + $0x174] ss:$8 sps:$4 sm:$0xff]  }
 0x375   : > { %4634 = vmatprep.subr.bf16.mxu0 %v6450_v48  ;;  %v6487_v48 = vld [vmem:[#allocation7 + $0x170] ss:$8 sps:$4 sm:$0xff]  }
 0x378   : > { %4635 = vmatpush1.bf16.msra.mxu0 %v6448_v49  ;;  %v6492_v49 = vld [vmem:[#allocation7 + $0x184] ss:$8 sps:$4 sm:$0xff]  }
 0x379   : > { %4636 = vmatprep.subr.bf16.mxu0 %v6453_v50  ;;  %v6490_v50 = vld [vmem:[#allocation7 + $0x180] ss:$8 sps:$4 sm:$0xff]  }
 0x37c   : > { %4637 = vmatpush1.bf16.msra.mxu0 %v6451_v51  ;;  %v6495_v51 = vld [vmem:[#allocation7 + $0x194] ss:$8 sps:$4 sm:$0xff]  }
 0x37d   : > { %4638 = vmatprep.subr.bf16.mxu0 %v6456_v52  ;;  %v6493_v52 = vld [vmem:[#allocation7 + $0x190] ss:$8 sps:$4 sm:$0xff]  }
 0x380   : > { %4639 = vmatpush1.bf16.msra.mxu0 %v6454_v53  ;;  %v6498_v53 = vld [vmem:[#allocation7 + $0x1a4] ss:$8 sps:$4 sm:$0xff]  }
 0x381   : > { %4640 = vmatprep.subr.bf16.mxu0 %v6459_v54  ;;  %v6496_v54 = vld [vmem:[#allocation7 + $0x1a0] ss:$8 sps:$4 sm:$0xff]  }
 0x384   : > { %4641 = vmatpush1.bf16.msra.mxu0 %v6457_v56  ;;  %v6501_v56 = vld [vmem:[#allocation7 + $0x1b4] ss:$8 sps:$4 sm:$0xff]  }
 0x385   : > { %4642 = vmatprep.subr.bf16.mxu0 %v6462_v57  ;;  %v6499_v57 = vld [vmem:[#allocation7 + $0x1b0] ss:$8 sps:$4 sm:$0xff]  }
 0x388   : > { %4643 = vmatpush1.bf16.msra.mxu0 %v6460_v61  ;;  %v6504_v61 = vld [vmem:[#allocation7 + $0x1c4] ss:$8 sps:$4 sm:$0xff]  }
 0x389   : > { %4644 = vmatprep.subr.bf16.mxu0 %v6465_v59  ;;  %v6502_v59 = vld [vmem:[#allocation7 + $0x1c0] ss:$8 sps:$4 sm:$0xff]  }
 0x38c   : > { %4645 = vmatpush1.bf16.msra.mxu0 %v6463_v62  ;;  %v6507_v62 = vld [vmem:[#allocation7 + $0x1d4] ss:$8 sps:$4 sm:$0xff]  }
 0x38d   : > { %4655 = vmatprep.subr.bf16.mxu0 %v6468_v60  ;;  %v6505_v60 = vld [vmem:[#allocation7 + $0x1d0] ss:$8 sps:$4 sm:$0xff]  }
 0x421   : > { %v7318_v21 = vpop.f32.mrb[0].mxu1 }
 0x422   : > { %v4039_v19 = vpop.f32.mrb[0].mxu0  ;;  %v4205_v24 = vpop.f32.mrb[1].mxu1  ;;  %v5911_v3 = vadd.f32 %v7318_v21, %v2593_v0 }
 0x423   : > { %v5909_v22 = vadd.f32 %v4039_v19, %v2585_v14  ;;  %v4041_v23 = vpop.f32.mrb[1].mxu0  ;;  %v5912_v26 = vadd.f32 %v4205_v24, %v2597_v18  ;;  %v4207_v27 = vpop.f32.mrb[2].mxu1  ;;  %v4291_v14 = vrot.slane %v4282_v12, %v7280_v4  ;;  %v6533_v4 = vld [vmem:[#allocation8 + $0x98] sm:$0xff]  }
 0x424   : > { %v5910_v25 = vadd.f32 %v4041_v23, %v2589_v16  ;;  %v4043_v58 = vpop.f32.mrb[2].mxu0  ;;  %v4208_v30 = vpop.f32.mrb[3].mxu1  ;;  %v4212_v6 = vmax.f32 %v5911_v3, 0.0 }
 0x425   : > { %v4210_v28 = vmax.f32 %v5909_v22, 0.0  ;;  %v4044_v29 = vpop.f32.mrb[3].mxu0  ;;  %v4213_v32 = vmax.f32 %v5912_v26, 0.0  ;;  %v6530_v58 = vld [vmem:[#allocation8 + $0x80] sm:$0xff]   ;;  %v6535_v30 = vld [vmem:[#allocation8 + $0xa8] sm:$0xff]  }
 0x426   : > { %v4211_v31 = vmax.f32 %v5910_v25, 0.0  ;;  %v4216_v8 = vpack.c.bf16 %v4212_v6, %v4212_v6  ;;  %v6534_v29 = vld [vmem:[#allocation8 + $0xa0] sm:$0xff]  }
 0x427   : > { %v4214_v36 = vpack.c.bf16 %v4210_v28, %v4210_v28  ;;  %v4217_v55 = vpack.c.bf16 %v4213_v32, %v4213_v32  ;;  %v6531_v28 = vld [vmem:[#allocation8 + $0x88] sm:$0xff]   ;;  %v6537_v32 = vld [vmem:[#allocation8 + $0xb8] sm:$0xff]  }
 0x428   : > { %v4215_v33 = vpack.c.bf16 %v4211_v31, %v4211_v31  ;;  %v6536_v31 = vld [vmem:[#allocation8 + $0xb0] sm:$0xff]  }
 0x42a   : > { %4646 = vmatprep.mubr.bf16.mxu0 %v4215_v33 }
 0x42b   : > { %4647 = vmatmul.mubr.bf16.vlgmr.msra.gmra.mrb[4].mxu0 %v4214_v36 }
 0x42c   : > { %4656 = vmatpush1.bf16.msra.mxu0 %v6466_v34  ;;  %4687 = vmatprep.mubr.bf16.mxu0 %v4217_v55  ;;  %v5790_v34 = vld [vmem:[#allocation10 + $0xe] ss:$0 sm:$0xff] }
 0x42d   : > { %4657 = vmatprep.subr.bf16.mxu0 %v6471_v37 }
 0x430   : > { %4658 = vmatpush1.bf16.msra.mxu0 %v6469_v38 }
 0x431   : > { %4659 = vmatprep.subr.bf16.mxu0 %v6474_v39 }
 0x434   : > { %4660 = vmatpush1.bf16.msra.mxu0 %v6472_v40 }
 0x435   : > { %4661 = vmatprep.subr.bf16.mxu0 %v6477_v41  ;;  %v6538_v41 = vld [vmem:[#allocation8 + $0xc0] sm:$0xff]  }
 0x438   : > { %4662 = vmatpush1.bf16.msra.mxu0 %v6475_v42 }
 0x439   : > { %4663 = vmatprep.subr.bf16.mxu0 %v6480_v43  ;;  %v6539_v43 = vld [vmem:[#allocation8 + $0xc8] sm:$0xff]  }
 0x43c   : > { %4664 = vmatpush1.bf16.msra.mxu0 %v6478_v44  ;;  %v6540_v44 = vld [vmem:[#allocation8 + $0xd0] sm:$0xff]  }
 0x43d   : > { %4665 = vmatprep.subr.bf16.mxu0 %v6483_v45  ;;  %v6541_v45 = vld [vmem:[#allocation8 + $0xd8] sm:$0xff]  }
 0x440   : > { %4666 = vmatpush1.bf16.msra.mxu0 %v6481_v17  ;;  %v6542_v17 = vld [vmem:[#allocation8 + $0xe0] sm:$0xff]  }
 0x441   : > { %4667 = vmatprep.subr.bf16.mxu0 %v6486_v46  ;;  %v6543_v46 = vld [vmem:[#allocation8 + $0xe8] sm:$0xff]  }
 0x444   : > { %4668 = vmatpush1.bf16.msra.mxu0 %v6484_v20  ;;  %v6544_v20 = vld [vmem:[#allocation8 + $0xf0] sm:$0xff]  }
 0x445   : > { %4669 = vmatprep.subr.bf16.mxu0 %v6489_v47  ;;  %v6545_v47 = vld [vmem:[#allocation8 + $0xf8] sm:$0xff]  }
 0x448   : > { %4670 = vmatpush1.bf16.msra.mxu0 %v6487_v48  ;;  %v5807_v48 = vld [vmem:[#allocation10 + $0xf] ss:$0 sm:$0xff] }
 0x449   : > { %4671 = vmatprep.subr.bf16.mxu0 %v6492_v49 }
 0x44c   : > { %4672 = vmatpush1.bf16.msra.mxu0 %v6490_v50 }
 0x44d   : > { %4673 = vmatprep.subr.bf16.mxu0 %v6495_v51 }
 0x450   : > { %4674 = vmatpush1.bf16.msra.mxu0 %v6493_v52 }
 0x451   : > { %4675 = vmatprep.subr.bf16.mxu0 %v6498_v53 }
 0x454   : > { %4676 = vmatpush1.bf16.msra.mxu0 %v6496_v54 }
 0x455   : > { %4677 = vmatprep.subr.bf16.mxu0 %v6501_v56 }
 0x458   : > { %4678 = vmatpush1.bf16.msra.mxu0 %v6499_v57  ;;  %v5816_v57 = vld [vmem:[#allocation10 + $0x10] ss:$0 sm:$0xff] }
 0x459   : > { %4679 = vmatprep.subr.bf16.mxu0 %v6504_v61 }
 0x45c   : > { %4680 = vmatpush1.bf16.msra.mxu0 %v6502_v59 }
 0x45d   : > { %4681 = vmatprep.subr.bf16.mxu0 %v6507_v62 }
 0x460   : > { %4682 = vmatpush1.bf16.msra.mxu0 %v6505_v60 }
 0x461   : > { %4683 = vmatprep.subr.bf16.mxu0 %v6510_v1 }
 0x464   : > { %4684 = vmatpush1.bf16.msra.mxu0 %v6508_v2 }
 0x465   : > { %4685 = vmatprep.subr.bf16.mxu0 %v6513_v7 }
 0x468   : > { %4686 = vmatpush1.bf16.msra.mxu0 %v6511_v5 }
 0x46b   : > { %4688 = vmatmul.mubr.bf16.vlgmr.msra.gmra.mrb[4].mxu0 %v4216_v8 }
 0x53e   : > { %v4689_v16 = vpop.f32.mrb[4].mxu0 }
 0x53f   : > { %v5913_v18 = vadd.f32 %v4689_v16, %v4287_v13  ;;  %v4691_v19 = vpop.f32.mrb[5].mxu0 }
 0x540   : > { %v5914_v21 = vadd.f32 %v4691_v19, %v4291_v14  ;;  %v4693_v22 = vpop.f32.mrb[6].mxu0 }
 0x541   : > { %v4696_v23 = vmax.f32 %v5913_v18, 0.0  ;;  %v4694_v24 = vpop.f32.mrb[7].mxu0 }
 0x542   : > { %v4697_v25 = vmax.f32 %v5914_v21, 0.0 }
 0x543   : > { %v4698_v27 = vpack.c.bf16 %v4696_v23, %v4696_v23 }
 0x544   : > { %v4699_v26 = vpack.c.bf16 %v4697_v25, %v4697_v25 }
 0x546   : > { %4867 = vmatprep.mubr.bf16.mxu1 %v4699_v26 }
 0x547   : > { %4868 = vmatmul.mubr.bf16.vlgmr.msra.gmra.mrb[4].mxu1 %v4698_v27 }
 0x548   : > { %5870 = vmatpush3.bf16.msra.mxu1 %v6530_v58  ;;  %5885 = vmatprep.mubr.msk.bf16.mxu1 %vm6748_vm0, %v6747_v11 }
 0x549   : > { %5871 = vmatprep.subr.bf16.mxu1 %v6747_v11 }
 0x54c   : > { %5872 = vmatpush3.bf16.msra.mxu1 %v6531_v28 }
 0x54d   : > { %5873 = vmatprep.subr.bf16.mxu1 %v6747_v11 }
 0x550   : > { %5874 = vmatpush3.bf16.msra.mxu1 %v6532_v15 }
 0x551   : > { %5875 = vmatprep.subr.bf16.mxu1 %v6747_v11 }
 0x554   : > { %5876 = vmatpush3.bf16.msra.mxu1 %v6533_v4 }
 0x555   : > { %5877 = vmatprep.subr.bf16.mxu1 %v6747_v11 }
 0x558   : > { %5878 = vmatpush3.bf16.msra.mxu1 %v6534_v29 }
 0x559   : > { %5879 = vmatprep.subr.bf16.mxu1 %v6747_v11 }
 0x55c   : > { %5880 = vmatpush3.bf16.msra.mxu1 %v6535_v30 }
 0x55d   : > { %5881 = vmatprep.subr.bf16.mxu1 %v6747_v11 }
 0x560   : > { %5882 = vmatpush3.bf16.msra.mxu1 %v6536_v31 }
 0x561   : > { %5883 = vmatprep.subr.bf16.mxu1 %v6747_v11 }
 0x564   : > { %5884 = vmatpush3.bf16.msra.mxu1 %v6537_v32 }
 0x565   : > { %5889 = vmatprep.subr.bf16.mxu1 %v6747_v11 }
 0x61a   : > { %v5845_v33 = vpop.f32.mrb[4].mxu1 }
 0x61b   : > { %v5846_v36 = vpop.f32.mrb[5].mxu1 }
 0x61c   : > { %v5847_v37 = vadd.f32 %v5846_v36, %v5845_v33  ;;  %v5848_v55 = vpop.f32.mrb[6].mxu1 }
 0x61d   : > { %v5849_v38 = vpop.f32.mrb[7].mxu1 }
 0x61e   : > { %v4870_v39 = vadd.f32 %v5847_v37, %v5790_v34 }
 0x620   : > { %v4875_v40 = vmax.f32 %v4870_v39, 0.0 }
 0x622   : > { %v4876_v42 = vpack.c.bf16 %v4875_v40, %v4875_v40 }
 0x624   : > { %5886 = vmatmul.mubr.bf16.vlgmr.msra.gmra.mrb[8].mxu1 %v4876_v42 }
 0x625   : > { %5890 = vmatpush3.bf16.msra.mxu1 %v6538_v41  ;;  %5905 = vmatprep.mubr.msk.bf16.mxu1 %vm6748_vm0, %v6747_v11 }
 0x626   : > { %5891 = vmatprep.subr.bf16.mxu1 %v6747_v11 }
 0x629   : > { %5892 = vmatpush3.bf16.msra.mxu1 %v6539_v43 }
 0x62a   : > { %5893 = vmatprep.subr.bf16.mxu1 %v6747_v11 }
 0x62d   : > { %5894 = vmatpush3.bf16.msra.mxu1 %v6540_v44 }
 0x62e   : > { %5895 = vmatprep.subr.bf16.mxu1 %v6747_v11 }
 0x631   : > { %5896 = vmatpush3.bf16.msra.mxu1 %v6541_v45 }
 0x632   : > { %5897 = vmatprep.subr.bf16.mxu1 %v6747_v11 }
 0x635   : > { %5898 = vmatpush3.bf16.msra.mxu1 %v6542_v17 }
 0x636   : > { %5899 = vmatprep.subr.bf16.mxu1 %v6747_v11 }
 0x639   : > { %5900 = vmatpush3.bf16.msra.mxu1 %v6543_v46 }
 0x63a   : > { %5901 = vmatprep.subr.bf16.mxu1 %v6747_v11 }
 0x63d   : > { %5902 = vmatpush3.bf16.msra.mxu1 %v6544_v20 }
 0x63e   : > { %5903 = vmatprep.subr.bf16.mxu1 %v6747_v11 }
 0x641   : > { %5904 = vmatpush3.bf16.msra.mxu1 %v6545_v47 }
 0x6f7   : > { %v4982_v49 = vpop.f32.mrb[8].mxu1 }
 0x6f8   : > { %v4983_v50 = vadd.f32 %v5807_v48, %v4982_v49  ;;  %v5887_v51 = vpop.f32.mrb[9].mxu1 }
 0x6f9   : > { %v4985_v52 = vpop.f32.mrb[10].mxu1 }
 0x6fa   : > { %v4988_v53 = vmax.f32 %v4983_v50, 0.0  ;;  %v5888_v54 = vpop.f32.mrb[11].mxu1 }
 0x6fc   : > { %v4989_v56 = vpack.c.bf16 %v4988_v53, %v4988_v53 }
 0x6fe   : > { %5906 = vmatmul.mubr.bf16.vlgmr.msra.gmra.mrb[12].mxu1 %v4989_v56 }
 0x7d1   : > { %v5095_v61 = vpop.f32.mrb[12].mxu1 }
 0x7d2   : > { %v5096_v59 = vadd.f32 %v5816_v57, %v5095_v61  ;;  %v5907_v62 = vpop.f32.mrb[13].mxu1 }
 0x7d3   : > { %v5098_v60 = vpop.f32.mrb[14].mxu1 }
 0x7d4   : > { %v5101_v0 = vmax.f32 %v5096_v59, 0.0  ;;  %v5908_v1 = vpop.f32.mrb[15].mxu1 }
 0x7d6   : > { %5103 = vst.msk [vmem:[%s7366_s6] sm:$0xff] %vm5102_vm1, %v5101_v0 }
 0x7d7 PF: > { %p18_p5 = scmp.ge.s32.totalorder %s6914_s14, 5   ;;  %s7382_s21 = smov %s6723_s22 }
 0x7d8   : > { %s7383_s22 = smov %s6727_s23  ;;  %s7384_s23 = smov %s6925_s16 }
 0x7d9   : > { %s7385_s24 = smov %s6914_s14  ;;  %20 = sbr.rel (!%p18_p5) target bundleno = 5 (0x5), region = 107 }
 0x7e0   :  { %5115 = vsyncpa [#allocation4], 1 }
 0x7e1   :  { %5117 = vsyncpa [#allocation4 + $0x1], 1 }
 0x7e2   :  { %5118 = vsyncpa [#allocation6], 1 }
 0x7e3   :  { %5119 = vsyncpa [#allocation9], 1 }

</bundles_post_ra>
